<compile_context>
chip_gen: v7x
topology: tpu7x:2x2x1
jax: 0.10.0
libtpu: 0.0.40
codegen_flags: <defaults>
</compile_context>

<pallas_src>
import jax
import jax.numpy as jnp
from jax.experimental import pallas as pl
from jax.experimental.pallas import tpu as pltpu

WIN = 7          # win_size
K1 = 0.01
K2 = 0.03


def _ssim_kernel(xmax_ref, ymax_ref, x_ref, y_ref, out_ref):
    # xmax/ymax: (1,) SMEM scalars (global maxima for the X / X.max() norm).
    # x_ref, y_ref: (F, H, W) block of frames for the current grid step.
    x = x_ref[...].astype(jnp.float32) * (1.0 / xmax_ref[0])
    y = y_ref[...].astype(jnp.float32) * (1.0 / ymax_ref[0])
    nf, H, W = x.shape
    OH, OW = H - WIN + 1, W - WIN + 1

    # Stack the five quantities along the frame axis -> the box filter below is
    # computed once for all of them (shared shifts / shared matmul).
    q = jnp.concatenate([x, y, x * x, y * y, x * y], axis=0)       # (5F, H, W)

    # --- W (lane) direction: valid 7-wide box sum as one MXU matmul against a
    # constant banded 0/1 matrix, (5F*H, W) @ (W, OW).  HIGHEST precision keeps
    # the multi-pass f32 MXU path (a bf16 single-pass dot would break the 1e-5
    # agreement with the f32 reference).
    r = jax.lax.broadcasted_iota(jnp.int32, (W, OW), 0)
    c = jax.lax.broadcasted_iota(jnp.int32, (W, OW), 1)
    kw = jnp.where((r >= c) & (r < c + WIN), 1.0, 0.0).astype(jnp.float32)
    qc = jnp.dot(q.reshape(5 * nf * H, W), kw,
                 preferred_element_type=jnp.float32,
                 precision=jax.lax.Precision.HIGHEST)
    qc = qc.reshape(5 * nf, H, OW)

    # --- H (sublane) direction: 6 shift-adds shared by all five quantities.
    s = qc[:, 0:OH, :]
    for dy in range(1, WIN):
        s = s + qc[:, dy:dy + OH, :]
    s = s * (1.0 / (WIN * WIN))                                    # (5F,OH,OW)

    ux, uy = s[0:nf], s[nf:2 * nf]
    uxx, uyy, uxy = s[2 * nf:3 * nf], s[3 * nf:4 * nf], s[4 * nf:5 * nf]

    cov_norm = (WIN * WIN) / (WIN * WIN - 1.0)                     # NP/(NP-1)
    vx = cov_norm * (uxx - ux * ux)
    vy = cov_norm * (uyy - uy * uy)
    vxy = cov_norm * (uxy - ux * uy)

    # data_range is a tensor of ones in the reference => C1/C2 are constants.
    C1 = (K1 * 1.0) ** 2
    C2 = (K2 * 1.0) ** 2
    A1 = 2.0 * ux * uy + C1
    A2 = 2.0 * vxy + C2
    B1 = ux * ux + uy * uy + C1
    B2 = vx + vy + C2

    d = B1 * B2                                  # strictly positive (>= ~C1*C2)
    inv = pl.reciprocal(d, approx=True)          # EUP slot (otherwise idle)
    inv = inv * (2.0 - d * inv)                  # one Newton step -> ~f32 exact
    S = (A1 * A2) * inv

    # Per-step partial sum written as one lane-dense block (unmasked store).
    out_ref[...] = jnp.broadcast_to(jnp.sum(S), out_ref.shape)


def _pick_frames_per_step(n_frames, h, w):
    """Frames per grid step + VMEM limit, sized per TPU generation."""
    try:
        vmem_cap = int(pltpu.get_tpu_info().vmem_capacity_bytes)  # 64MiB v7x, 128MiB v5e/v6e
    except Exception:
        vmem_cap = 64 * 1024 * 1024                               # conservative (v7x)
    vmem_limit = int(min((vmem_cap * 3) // 4, 96 * 1024 * 1024))
    # Rough live-bytes model per frame: 2 inputs x 2 pipeline buffers plus
    # ~20 full-frame f32 temporaries inside the kernel.
    bytes_per_frame = 24 * h * w * 4
    budget = vmem_limit // 2                                      # headroom
    f = 1
    for d in range(n_frames, 0, -1):
        if n_frames % d == 0 and d * bytes_per_frame <= budget:
            f = d
            break
    return f, vmem_limit


def ssim_loss(X, Y):
    """Pallas implementation of SSIM().forward(X, Y) with default args."""
    B, T, H, W = X.shape
    assert H >= WIN and W >= WIN, "frame must be at least win_size x win_size"
    OH, OW = H - WIN + 1, W - WIN + 1
    N = B * T

    # Global maxima for the X / X.max() normalization (one extra full-tensor
    # HBM read; pass a known data range instead if the caller guarantees one).
    xmax = jnp.max(X).astype(jnp.float32).reshape(1)
    ymax = jnp.max(Y).astype(jnp.float32).reshape(1)

    Xf = X.astype(jnp.float32).reshape(N, H, W)
    Yf = Y.astype(jnp.float32).reshape(N, H, W)

    f, vmem_limit = _pick_frames_per_step(N, H, W)
    grid = (N // f,)

    sums = pl.pallas_call(
        _ssim_kernel,
        out_shape=jax.ShapeDtypeStruct((N // f, 8, 128), jnp.float32),
        grid=grid,
        in_specs=[
            pl.BlockSpec(memory_space=pltpu.MemorySpace.SMEM),   # xmax
            pl.BlockSpec(memory_space=pltpu.MemorySpace.SMEM),   # ymax
            pl.BlockSpec((f, H, W), lambda i: (i, 0, 0)),
            pl.BlockSpec((f, H, W), lambda i: (i, 0, 0)),
        ],
        out_specs=pl.BlockSpec((1, 8, 128), lambda i: (i, 0, 0)),
        compiler_params=pltpu.CompilerParams(
            dimension_semantics=("parallel",),
            vmem_limit_bytes=vmem_limit),
    )(xmax, ymax, Xf, Yf)

    # reference: loss = mean_t(1 - mean_{B,spatial} S_t)
    #                 = 1 - sum(S) / (B*T*OH*OW)   (B*OH*OW constant over t)
    total = jnp.sum(sums[:, 0, 0])
    return 1.0 - total / float(N * OH * OW)
    # TODO(synk): full=True branch (per-pixel 1 - S maps) not implemented; only
    # the default full=False scalar-loss path is reproduced.


def _ref_ssim(X, Y):
    # Pure-JAX reference mirroring the PyTorch math (for validation only).
    Xn = X / jnp.max(X)
    Yn = Y / jnp.max(Y)
    B, T, H, W = X.shape
    OH, OW = H - WIN + 1, W - WIN + 1

    def box(q):
        s = jnp.zeros((B, T, OH, OW), jnp.float32)
        for dy in range(WIN):
            for dx in range(WIN):
                s = s + q[:, :, dy:dy + OH, dx:dx + OW]
        return s / (WIN * WIN)

    ux, uy = box(Xn), box(Yn)
    uxx, uyy, uxy = box(Xn * Xn), box(Yn * Yn), box(Xn * Yn)
    cov = (WIN * WIN) / (WIN * WIN - 1.0)
    vx = cov * (uxx - ux * ux)
    vy = cov * (uyy - uy * uy)
    vxy = cov * (uxy - ux * uy)
    C1, C2 = K1 ** 2, K2 ** 2
    S = ((2 * ux * uy + C1) * (2 * vxy + C2)) / \
        ((ux * ux + uy * uy + C1) * (vx + vy + C2))
    per_t = 1.0 - jnp.mean(S, axis=(0, 2, 3))
    return jnp.mean(per_t)


if __name__ == "__main__":
    key = jax.random.PRNGKey(0)
    kx, ky = jax.random.split(key)
    B, T, H, W = 2, 4, 16, 16
    X = jax.random.uniform(kx, (B, T, H, W), jnp.float32, 0.1, 1.0)
    Y = jax.random.uniform(ky, (B, T, H, W), jnp.float32, 0.1, 1.0)

    loss = jax.block_until_ready(ssim_loss(X, Y))
    ref = jax.block_until_ready(_ref_ssim(X, Y))
    assert jnp.allclose(loss, ref, atol=1e-5, rtol=1e-5), (loss, ref)
    print("KERNEL_OK")
</pallas_src>

<mosaic_0001>
module attributes {stable_mosaic.version = 11 : i64} {
  func.func @_ssim_kernel(%arg0: i32, %arg1: memref<1xf32, #tpu.memory_space<smem>>, %arg2: memref<1xf32, #tpu.memory_space<smem>>, %arg3: memref<8x16x16xf32, #tpu.memory_space<vmem>>, %arg4: memref<8x16x16xf32, #tpu.memory_space<vmem>>, %arg5: memref<1x8x128xf32, #tpu.memory_space<vmem>>) attributes {dimension_semantics = [#tpu.dimension_semantics<parallel>], iteration_bounds = array<i64: 1>, scalar_prefetch = 0 : i64, scratch_operands = 0 : i64, tpu.core_type = #tpu.core_type<tc>, window_params = [{transform_indices = @transform_0, window_bounds = array<i64: 1>}, {transform_indices = @transform_1, window_bounds = array<i64: 1>}, {transform_indices = @transform_2, window_bounds = array<i64: 8, 16, 16>}, {transform_indices = @transform_3, window_bounds = array<i64: 8, 16, 16>}, {transform_indices = @transform_4, window_bounds = array<i64: 1, 8, 128>}]} {
    %c0 = arith.constant 0 : index
    %c0_0 = arith.constant 0 : index
    %c0_1 = arith.constant 0 : index
    %0 = vector.load %arg3[%c0, %c0_0, %c0_1] : memref<8x16x16xf32, #tpu.memory_space<vmem>>, vector<8x16x16xf32>
    %c0_2 = arith.constant 0 : index
    %1 = memref.load %arg1[%c0_2] : memref<1xf32, #tpu.memory_space<smem>>
    %cst = arith.constant 1.000000e+00 : f32
    %2 = arith.divf %cst, %1 : f32
    %3 = vector.broadcast %2 : f32 to vector<8x16x16xf32>
    %4 = arith.mulf %0, %3 : vector<8x16x16xf32>
    %c0_3 = arith.constant 0 : index
    %c0_4 = arith.constant 0 : index
    %c0_5 = arith.constant 0 : index
    %5 = vector.load %arg4[%c0_3, %c0_4, %c0_5] : memref<8x16x16xf32, #tpu.memory_space<vmem>>, vector<8x16x16xf32>
    %c0_6 = arith.constant 0 : index
    %6 = memref.load %arg2[%c0_6] : memref<1xf32, #tpu.memory_space<smem>>
    %cst_7 = arith.constant 1.000000e+00 : f32
    %7 = arith.divf %cst_7, %6 : f32
    %8 = vector.broadcast %7 : f32 to vector<8x16x16xf32>
    %9 = arith.mulf %5, %8 : vector<8x16x16xf32>
    %10 = arith.mulf %4, %4 : vector<8x16x16xf32>
    %11 = arith.mulf %9, %9 : vector<8x16x16xf32>
    %12 = arith.mulf %4, %9 : vector<8x16x16xf32>
    %13 = tpu.concatenate %4, %9, %10, %11, %12 in 0 : vector<8x16x16xf32>, vector<8x16x16xf32>, vector<8x16x16xf32>, vector<8x16x16xf32>, vector<8x16x16xf32> -> vector<40x16x16xf32>
    %14 = tpu.iota {dimensions = array<i32: 0>} : vector<16x10xi32>
    %15 = tpu.iota {dimensions = array<i32: 1>} : vector<16x10xi32>
    %16 = arith.cmpi sge, %14, %15 : vector<16x10xi32>
    %c7_i32 = arith.constant 7 : i32
    %17 = vector.broadcast %c7_i32 : i32 to vector<16x10xi32>
    %18 = arith.addi %15, %17 : vector<16x10xi32>
    %19 = arith.cmpi slt, %14, %18 : vector<16x10xi32>
    %20 = arith.andi %16, %19 : vector<16x10xi1>
    %cst_8 = arith.constant 1.000000e+00 : f32
    %cst_9 = arith.constant 0.000000e+00 : f32
    %21 = vector.broadcast %cst_8 : f32 to vector<16x10xf32>
    %22 = vector.broadcast %cst_9 : f32 to vector<16x10xf32>
    %23 = arith.select %20, %21, %22 : vector<16x10xi1>, vector<16x10xf32>
    %24 = vector.shape_cast %13 : vector<40x16x16xf32> to vector<640x16xf32>
    %cst_10 = arith.constant dense<0.000000e+00> : vector<640x10xf32>
    %25 = tpu.matmul %24, %23, %cst_10 {dimension_numbers = #tpu.dot_dimension_numbers<[1], [0], [0], [1], [0, 0, 1, 1], [], []>, precision = #tpu.contract_precision<fp32>} : vector<640x16xf32>, vector<16x10xf32>, vector<640x10xf32> -> vector<640x10xf32>
    %26 = vector.shape_cast %25 : vector<640x10xf32> to vector<40x16x10xf32>
    %27 = vector.extract_strided_slice %26 {offsets = [0, 0, 0], sizes = [40, 10, 10], strides = [1, 1, 1]} : vector<40x16x10xf32> to vector<40x10x10xf32>
    %28 = vector.extract_strided_slice %26 {offsets = [0, 1, 0], sizes = [40, 10, 10], strides = [1, 1, 1]} : vector<40x16x10xf32> to vector<40x10x10xf32>
    %29 = arith.addf %27, %28 : vector<40x10x10xf32>
    %30 = vector.extract_strided_slice %26 {offsets = [0, 2, 0], sizes = [40, 10, 10], strides = [1, 1, 1]} : vector<40x16x10xf32> to vector<40x10x10xf32>
    %31 = arith.addf %29, %30 : vector<40x10x10xf32>
    %32 = vector.extract_strided_slice %26 {offsets = [0, 3, 0], sizes = [40, 10, 10], strides = [1, 1, 1]} : vector<40x16x10xf32> to vector<40x10x10xf32>
    %33 = arith.addf %31, %32 : vector<40x10x10xf32>
    %34 = vector.extract_strided_slice %26 {offsets = [0, 4, 0], sizes = [40, 10, 10], strides = [1, 1, 1]} : vector<40x16x10xf32> to vector<40x10x10xf32>
    %35 = arith.addf %33, %34 : vector<40x10x10xf32>
    %36 = vector.extract_strided_slice %26 {offsets = [0, 5, 0], sizes = [40, 10, 10], strides = [1, 1, 1]} : vector<40x16x10xf32> to vector<40x10x10xf32>
    %37 = arith.addf %35, %36 : vector<40x10x10xf32>
    %38 = vector.extract_strided_slice %26 {offsets = [0, 6, 0], sizes = [40, 10, 10], strides = [1, 1, 1]} : vector<40x16x10xf32> to vector<40x10x10xf32>
    %39 = arith.addf %37, %38 : vector<40x10x10xf32>
    %cst_11 = arith.constant 0.0204081628 : f32
    %40 = vector.broadcast %cst_11 : f32 to vector<40x10x10xf32>
    %41 = arith.mulf %39, %40 : vector<40x10x10xf32>
    %42 = vector.extract_strided_slice %41 {offsets = [0, 0, 0], sizes = [8, 10, 10], strides = [1, 1, 1]} : vector<40x10x10xf32> to vector<8x10x10xf32>
    %43 = vector.extract_strided_slice %41 {offsets = [8, 0, 0], sizes = [8, 10, 10], strides = [1, 1, 1]} : vector<40x10x10xf32> to vector<8x10x10xf32>
    %44 = vector.extract_strided_slice %41 {offsets = [16, 0, 0], sizes = [8, 10, 10], strides = [1, 1, 1]} : vector<40x10x10xf32> to vector<8x10x10xf32>
    %45 = vector.extract_strided_slice %41 {offsets = [24, 0, 0], sizes = [8, 10, 10], strides = [1, 1, 1]} : vector<40x10x10xf32> to vector<8x10x10xf32>
    %46 = vector.extract_strided_slice %41 {offsets = [32, 0, 0], sizes = [8, 10, 10], strides = [1, 1, 1]} : vector<40x10x10xf32> to vector<8x10x10xf32>
    %47 = arith.mulf %42, %42 : vector<8x10x10xf32>
    %48 = arith.subf %44, %47 : vector<8x10x10xf32>
    %cst_12 = arith.constant 1.02083337 : f32
    %49 = vector.broadcast %cst_12 : f32 to vector<8x10x10xf32>
    %50 = arith.mulf %49, %48 : vector<8x10x10xf32>
    %51 = arith.mulf %43, %43 : vector<8x10x10xf32>
    %52 = arith.subf %45, %51 : vector<8x10x10xf32>
    %cst_13 = arith.constant 1.02083337 : f32
    %53 = vector.broadcast %cst_13 : f32 to vector<8x10x10xf32>
    %54 = arith.mulf %53, %52 : vector<8x10x10xf32>
    %55 = arith.mulf %42, %43 : vector<8x10x10xf32>
    %56 = arith.subf %46, %55 : vector<8x10x10xf32>
    %cst_14 = arith.constant 1.02083337 : f32
    %57 = vector.broadcast %cst_14 : f32 to vector<8x10x10xf32>
    %58 = arith.mulf %57, %56 : vector<8x10x10xf32>
    %cst_15 = arith.constant 2.000000e+00 : f32
    %59 = vector.broadcast %cst_15 : f32 to vector<8x10x10xf32>
    %60 = arith.mulf %59, %42 : vector<8x10x10xf32>
    %61 = arith.mulf %60, %43 : vector<8x10x10xf32>
    %cst_16 = arith.constant 9.99999974E-5 : f32
    %62 = vector.broadcast %cst_16 : f32 to vector<8x10x10xf32>
    %63 = arith.addf %61, %62 : vector<8x10x10xf32>
    %cst_17 = arith.constant 2.000000e+00 : f32
    %64 = vector.broadcast %cst_17 : f32 to vector<8x10x10xf32>
    %65 = arith.mulf %64, %58 : vector<8x10x10xf32>
    %cst_18 = arith.constant 8.99999984E-4 : f32
    %66 = vector.broadcast %cst_18 : f32 to vector<8x10x10xf32>
    %67 = arith.addf %65, %66 : vector<8x10x10xf32>
    %68 = arith.mulf %42, %42 : vector<8x10x10xf32>
    %69 = arith.mulf %43, %43 : vector<8x10x10xf32>
    %70 = arith.addf %68, %69 : vector<8x10x10xf32>
    %cst_19 = arith.constant 9.99999974E-5 : f32
    %71 = vector.broadcast %cst_19 : f32 to vector<8x10x10xf32>
    %72 = arith.addf %70, %71 : vector<8x10x10xf32>
    %73 = arith.addf %50, %54 : vector<8x10x10xf32>
    %cst_20 = arith.constant 8.99999984E-4 : f32
    %74 = vector.broadcast %cst_20 : f32 to vector<8x10x10xf32>
    %75 = arith.addf %73, %74 : vector<8x10x10xf32>
    %76 = arith.mulf %72, %75 : vector<8x10x10xf32>
    %77 = tpu.reciprocal %76 {approx = true} : vector<8x10x10xf32> -> vector<8x10x10xf32>
    %78 = arith.mulf %76, %77 : vector<8x10x10xf32>
    %cst_21 = arith.constant 2.000000e+00 : f32
    %79 = vector.broadcast %cst_21 : f32 to vector<8x10x10xf32>
    %80 = arith.subf %79, %78 : vector<8x10x10xf32>
    %81 = arith.mulf %77, %80 : vector<8x10x10xf32>
    %82 = arith.mulf %63, %67 : vector<8x10x10xf32>
    %83 = arith.mulf %82, %81 : vector<8x10x10xf32>
    %84 = vector.shape_cast %83 : vector<8x10x10xf32> to vector<1x8x10x10xf32>
    %cst_22 = arith.constant dense<0.000000e+00> : vector<1xf32>
    %85 = vector.multi_reduction <add>, %84, %cst_22 [1, 2, 3] : vector<1x8x10x10xf32> to vector<1xf32>
    %86 = vector.shape_cast %85 : vector<1xf32> to vector<1x1x1x1xf32>
    %87 = vector.extract %86[0, 0, 0, 0] : f32 from vector<1x1x1x1xf32>
    %88 = vector.broadcast %87 : f32 to vector<1x8x128xf32>
    %c0_23 = arith.constant 0 : index
    %c0_24 = arith.constant 0 : index
    %c0_25 = arith.constant 0 : index
    %89 = vector.load %arg5[%c0_23, %c0_24, %c0_25] : memref<1x8x128xf32, #tpu.memory_space<vmem>>, vector<1x8x128xf32>
    tpu.vector_store %arg5[%c0_23, %c0_24, %c0_25], %88 {strides = array<i32>} : memref<1x8x128xf32, #tpu.memory_space<vmem>>, vector<1x8x128xf32>,
    return
  }
  func.func @transform_0(%arg0: i32) -> i32 {
    %c0_i32 = arith.constant 0 : i32
    %c0_i32_0 = arith.constant 0 : i32
    return %c0_i32 : i32
  }
  func.func @transform_1(%arg0: i32) -> i32 {
    %c0_i32 = arith.constant 0 : i32
    %c0_i32_0 = arith.constant 0 : i32
    return %c0_i32 : i32
  }
  func.func @transform_2(%arg0: i32) -> (i32, i32, i32) {
    %c0_i32 = arith.constant 0 : i32
    %c0_i32_0 = arith.constant 0 : i32
    %c0_i32_1 = arith.constant 0 : i32
    return %arg0, %c0_i32, %c0_i32_0 : i32, i32, i32
  }
  func.func @transform_3(%arg0: i32) -> (i32, i32, i32) {
    %c0_i32 = arith.constant 0 : i32
    %c0_i32_0 = arith.constant 0 : i32
    %c0_i32_1 = arith.constant 0 : i32
    return %arg0, %c0_i32, %c0_i32_0 : i32, i32, i32
  }
  func.func @transform_4(%arg0: i32) -> (i32, i32, i32) {
    %c0_i32 = arith.constant 0 : i32
    %c0_i32_0 = arith.constant 0 : i32
    %c0_i32_1 = arith.constant 0 : i32
    return %arg0, %c0_i32, %c0_i32_0 : i32, i32, i32
  }
}

</mosaic_0001>

<bundles_post_ra>
// kernel: tpu_custom_call.1
= control target key start
LH: loop header
LB: loop body
LE: loop exit
PB: predicated region body
PF: predicated region fallthrough
CT: control target
= control target key end

     0   :  { %11 = vsyncpa [#allocation5], 0  ;;  %s12057_s0 = inlined_call_operand.<no memory space> [shape: f32[1], index: 0, kind: input, shape index: {}]   ;;  %s12058_s1 = inlined_call_operand.<no memory space> [shape: f32[1], index: 1, kind: input, shape index: {}]   ;;  %s12059_s2 = inlined_call_operand.hbm [shape: f32[8,16,16], index: 2, kind: input, shape index: {}]   ;;  %s12060_s3 = inlined_call_operand.hbm [shape: f32[8,16,16], index: 3, kind: input, shape index: {}]   ;;  %s12061_s4 = inlined_call_operand.hbm [shape: f32[1,8,128], index: 4, kind: output, shape index: {}]  }
   0x1   :  { %12 = vsyncpa [#allocation8], 0 }
   0x2   :  { %13 = vsyncpa [#allocation6], 0  ;;  %s8362_s15 = smov [#allocation4]   ;;  %s8290_s19 = scalar_lea.hbm %s12059_s2, 2048 }
   0x3   :  { %s23_s16 = sshll.u32 %s8362_s15, 4  ;;  %p8291_p0 = scmp.ne.s32.totalorder %s12059_s2, %s8290_s19  ;;  %s24_s16 = int_to_ptr.vmem [resolvable:$true] %s23_s16 }
   0x4   :  { %p8294_p1 = scmp.lt.u32.totalorder %s8290_s19, %s12059_s2 }
   0x6   :  { %p8296_p2 = pnand %p8294_p1, %p8291_p0 }
   0x8   :  { %8299 = shalt.err (!%p8296_p2)
}
   0x9   :  { %s8300_s24 = scalar_lea.vmem %s24_s16, 2048  ;;  %p8305_p4 = scmp.lt.s32.totalorder %s24_s16, %s24_s16 }
   0xa   :  { %p8301_p3 = scmp.ne.s32.totalorder %s24_s16, %s8300_s24  ;;  %p8306_p5 = scmp.lt.s32.totalorder %s8300_s24, %s8300_s24 }
   0xc   :  { %p8307_p6 = por %p8306_p5, %p8305_p4 }
   0xe   :  { %p8308_p7 = pnand %p8307_p6, %p8301_p3 }
  0x10   :  { %8311 = shalt.err (!%p8308_p7)
}
  0x11   :  { %s8363_s25 = smov 128   ;;  %s8364_s26 = smov 8  }
  0x12   :  { %29 = dma.hbm_to_vmem [thread:$0]  %s12059_s2, 2048, %s24_s16, [#allocation5], %s8363_s25, %s8363_s25, %s8364_s26  }
  0x13   :  { %s8365_s29 = smov [#allocation7]   ;;  %s8312_s7 = scalar_lea.hbm %s12060_s3, 2048 }
  0x14   :  { %s35_s30 = sshll.u32 %s8365_s29, 4  ;;  %p8313_p8 = scmp.ne.s32.totalorder %s12060_s3, %s8312_s7  ;;  %s36_s30 = int_to_ptr.vmem [resolvable:$true] %s35_s30 }
  0x15   :  { %p8316_p9 = scmp.lt.u32.totalorder %s8312_s7, %s12060_s3 }
  0x17   :  { %p8318_p10 = pnand %p8316_p9, %p8313_p8 }
  0x19   :  { %8321 = shalt.err (!%p8318_p10)
}
  0x1a   :  { %s8322_s12 = scalar_lea.vmem %s36_s30, 2048  ;;  %p8327_p12 = scmp.lt.s32.totalorder %s36_s30, %s36_s30 }
  0x1b   :  { %p8323_p11 = scmp.ne.s32.totalorder %s36_s30, %s8322_s12  ;;  %p8328_p13 = scmp.lt.s32.totalorder %s8322_s12, %s8322_s12 }
  0x1d   :  { %p8329_p0 = por %p8328_p13, %p8327_p12 }
  0x1f   :  { %p8330_p1 = pnand %p8329_p0, %p8323_p11 }
  0x21   :  { %8333 = shalt.err (!%p8330_p1)
}
  0x22   :  { %41 = dma.hbm_to_vmem [thread:$0]  %s12060_s3, 2048, %s36_s30, [#allocation8], %s8363_s25, %s8363_s25, %s8364_s26  }
  0x23   :  { %8356 = dma.done.wait [#allocation5], 2048  }
  0x24   :  { %8357 = vsyncadd [#allocation5], 4294965248  ;;  %v65_v0 = vstv %s12057_s0  ;;  %v102_v1 = vstv %s12058_s1 }
  0x25   :  { %8358 = dma.done.wait [#allocation8], 2048  }
  0x26   :  { %8359 = vsyncadd [#allocation8], 4294965248  ;;  %v170_v2 = vlaneseq  ;;  %8254 = vrcp.f32 %v65_v0  ;;  %v8366_v7 = vmov 0.0   ;;  %v12413_v10 = vmov 0  ;;  %v48_v24 = vld [vmem:[#allocation4] sm:$0xff]  ;;  %v49_v25 = vld [vmem:[#allocation4 + $0x8] sm:$0xff] }
  0x27   :  { %8256 = vrcp.f32 %v102_v1  ;;  %v12062_v13 = vmov 1.0|1.0   ;;  %v50_v26 = vld [vmem:[#allocation4 + $0x10] sm:$0xff]  ;;  %v51_v27 = vld [vmem:[#allocation4 + $0x18] sm:$0xff]  ;;  %v52_v28 = vld [vmem:[#allocation4 + $0x20] sm:$0xff]  ;;  %vm184_vm7 = vcmask 130048  }
  0x28   :  { %v171_v3 = vshrl.u32 %v170_v2, 7  ;;  %v174_v4 = vand.u32 127, %v170_v2  ;;  %v53_v29 = vld [vmem:[#allocation4 + $0x28] sm:$0xff]  ;;  %v54_v30 = vld [vmem:[#allocation4 + $0x30] sm:$0xff]  ;;  %v55_v32 = vld [vmem:[#allocation4 + $0x38] sm:$0xff]  ;;  %vm4349_vm8 = vcmask 1046528  }
  0x29   :  { %vm4630_vm9 = vcmask 1045504   ;;  %vm4911_vm10 = vcmask 1044480   ;;  %vm5192_vm11 = vcmask 1043456   ;;  %vm5473_vm12 = vcmask 1042432   ;;  %s8368_s3 = smov [#allocation9]  }
  0x2a   :  { %v172_v5 = vadd.s32 8, %v171_v3  ;;  %vm175_vm0 = vcmp.ge.s32.totalorder %v171_v3, %v174_v4  ;;  %v177_v6 = vadd.s32 7, %v174_v4  ;;  %vm5754_vm13 = vcmask 1041408   ;;  %s6565_s18 = sshll.u32 %s8368_s3, 4  ;;  %s6566_s18 = int_to_ptr.vmem [resolvable:$true] %s6565_s18 }
  0x2b   :  { %vm6517_vm14 = vcmask 74752   ;;  %vm6515_vm15 = vcmask 80896   ;;  %s8334_s20 = scalar_lea.vmem %s6566_s18, 128  ;;  %p8339_p3 = scmp.lt.s32.totalorder %s6566_s18, %s6566_s18 }
  0x2c   :  { %vm176_vm1 = vcmp.ge.s32.totalorder %v172_v5, %v174_v4  ;;  %vm178_vm2 = vcmp.lt.s32.totalorder %v171_v3, %v177_v6  ;;  %vm179_vm3 = vcmp.lt.s32.totalorder %v172_v5, %v177_v6  ;;  %p8335_p2 = scmp.ne.s32.totalorder %s6566_s18, %s8334_s20  ;;  %p8340_p4 = scmp.lt.s32.totalorder %s8334_s20, %s8334_s20 }
  0x2d   :  { %vm180_vm4 = vmand %vm175_vm0, %vm178_vm2 }
  0x2e   :  { %vm181_vm5 = vmand %vm176_vm1, %vm179_vm3  ;;  %v182_v8 = vsel %vm180_vm4, 1.0, %v8366_v7  ;;  %p8341_p5 = por %p8340_p4, %p8339_p3 }
  0x2f   :  { %v183_v9 = vsel %vm181_vm5, 1.0, %v8366_v7  ;;  %vm8424_vm6 = vmpackc.low %vm181_vm5, %vm180_vm4  ;;  %v8428_v11 = vsub.f32 %v182_v8, %v182_v8 }
  0x30   :  { %v12414_v10 = vsel %vm8424_vm6, 4294967295, %v12413_v10  ;;  %v8430_v12 = vsub.f32 %v183_v9, %v183_v9  ;;  %7830 = vmatprep.subr.msk.bf16.mxu0 %vm8424_vm6, %v12062_v13  ;;  %7818 = vmatprep.subr.msk.bf16.mxu1 %vm8424_vm6, %v12062_v13  ;;  %v8255_v14 = vpop.eup %8254  ;;  %p8342_p6 = pnand %p8341_p5, %p8335_p2 }
  0x31   :  { %12415 = vst [vmem:[#allocation13_spill] sm:$0xff] %v12414_v10  ;;  %7832 = vmatpush3.bf16.msk.msra.mxu0 %vm8424_vm6, %v12062_v13  ;;  %7820 = vmatpush3.bf16.msk.msra.mxu1 %vm8424_vm6, %v12062_v13  ;;  %v1292_v15 = vand.u32 4294901760, %v8428_v11  ;;  %v8257_v16 = vpop.eup %8256  ;;  %8241 = vpush %v8255_v14 }
  0x32   :  { %v1298_v17 = vand.u32 4294901760, %v8430_v12  ;;  %8243 = vpush %v8257_v16  ;;  %v56_v16 = vld [vmem:[#allocation4 + $0x40] sm:$0xff] }
  0x33   :  { %v1293_v18 = vsub.f32 %v8428_v11, %v1292_v15 }
  0x34   :  { %v1299_v19 = vsub.f32 %v8430_v12, %v1298_v17  ;;  %v8448_v20 = vpack.c.bf16 %v1298_v17, %v1292_v15  ;;  %v57_v17 = vld [vmem:[#allocation4 + $0x48] sm:$0xff] }
  0x35   :  { %v1294_v21 = vand.u32 4294901760, %v1293_v18  ;;  %v58_v18 = vld [vmem:[#allocation4 + $0x50] sm:$0xff] }
  0x36   :  { %v1300_v22 = vand.u32 4294901760, %v1299_v19  ;;  %7834 = vmatprep.subr.bf16.mxu0 %v8448_v20 }
  0x38   :  { %v8451_v23 = vpack.c.bf16 %v1300_v22, %v1294_v21 }
  0x3a   :  { %7822 = vmatprep.subr.bf16.mxu1 %v8451_v23 }
  0x62   :  { %s8242_s0 = spop %8241 }
  0x63   :  { %v8454_v31 = vstv %s8242_s0  ;;  %s8244_s1 = spop %8243 }
  0x64   :  { %v8457_v33 = vmul.f32 %v8454_v31, %v48_v24  ;;  %v8460_v34 = vmul.f32 %v8454_v31, %v49_v25  ;;  %v8463_v35 = vmul.f32 %v8454_v31, %v50_v26  ;;  %v8466_v36 = vmul.f32 %v8454_v31, %v51_v27  ;;  %v59_v25 = vld [vmem:[#allocation4 + $0x58] sm:$0xff] }
  0x65   :  { %v8469_v37 = vmul.f32 %v8454_v31, %v52_v28  ;;  %v8472_v38 = vmul.f32 %v8454_v31, %v53_v29  ;;  %v8475_v39 = vmul.f32 %v8454_v31, %v54_v30  ;;  %v8484_v43 = vmul.f32 %v8454_v31, %v55_v32  ;;  %v60_v30 = vld [vmem:[#allocation4 + $0x60] sm:$0xff] }
  0x66   :  { %v186_v40 = vsel %vm184_vm7, %v8457_v33, 0  ;;  %v189_v41 = vsel %vm184_vm7, %v8460_v34, 0  ;;  %v192_v42 = vsel %vm184_vm7, %v8463_v35, 0  ;;  %v195_v47 = vsel %vm184_vm7, %v8466_v36, 0 }
  0x67   :  { %v8486_v44 = vand.u32 4294901760, %v186_v40  ;;  %v8488_v45 = vand.u32 4294901760, %v189_v41  ;;  %v8490_v46 = vand.u32 4294901760, %v192_v42  ;;  %v8494_v48 = vand.u32 4294901760, %v195_v47 }
  0x68   :  { %v198_v49 = vsel %vm184_vm7, %v8469_v37, 0  ;;  %v201_v50 = vsel %vm184_vm7, %v8472_v38, 0  ;;  %v204_v51 = vsel %vm184_vm7, %v8475_v39, 0  ;;  %v207_v59 = vsel %vm184_vm7, %v8484_v43, 0 }
  0x69   :  { %12416 = vst [vmem:[#allocation14_spill] sm:$0xff] %v8488_v45  ;;  %12417 = vst [vmem:[#allocation15_spill] sm:$0xff] %v8490_v46  ;;  %v8503_v52 = vsub.f32 %v186_v40, %v8486_v44  ;;  %v8506_v53 = vsub.f32 %v189_v41, %v8488_v45  ;;  %v8509_v54 = vsub.f32 %v192_v42, %v8490_v46  ;;  %v8511_v55 = vand.u32 4294901760, %v198_v49 }
  0x6a   :  { %12418 = vst [vmem:[#allocation16_spill] sm:$0xff] %v8494_v48  ;;  %v8514_v56 = vsub.f32 %v195_v47, %v8494_v48  ;;  %v8516_v57 = vand.u32 4294901760, %v201_v50  ;;  %v8518_v58 = vand.u32 4294901760, %v204_v51  ;;  %v8535_v3 = vand.u32 4294901760, %v207_v59 }
  0x6b   :  { %12419 = vst [vmem:[#allocation17_spill] sm:$0xff] %v8503_v52  ;;  %12420 = vst [vmem:[#allocation18_spill] sm:$0xff] %v8506_v53  ;;  %v492_v60 = vand.u32 4294901760, %v8503_v52  ;;  %v502_v61 = vand.u32 4294901760, %v8506_v53  ;;  %v512_v62 = vand.u32 4294901760, %v8509_v54  ;;  %v8526_v63 = vsub.f32 %v198_v49, %v8511_v55 }
  0x6c   :  { %12421 = vst [vmem:[#allocation19_spill] sm:$0xff] %v8509_v54  ;;  %12422 = vst [vmem:[#allocation20_spill] sm:$0xff] %v8511_v55  ;;  %v522_v0 = vand.u32 4294901760, %v8514_v56  ;;  %v8530_v1 = vsub.f32 %v201_v50, %v8516_v57  ;;  %v8533_v2 = vsub.f32 %v204_v51, %v8518_v58  ;;  %v8545_v15 = vsub.f32 %v207_v59, %v8535_v3  ;;  %v61_v51 = vld [vmem:[#allocation4 + $0x68] sm:$0xff]  ;;  %v62_v59 = vld [vmem:[#allocation4 + $0x70] sm:$0xff] }
  0x6d   :  { %12423 = vst [vmem:[#allocation21_spill] sm:$0xff] %v8514_v56  ;;  %12424 = vst [vmem:[#allocation22_spill] sm:$0xff] %v8516_v57  ;;  %7449 = vmatprep.mubr.f32.mxu0 %v492_v60  ;;  %v493_v4 = vsub.f32 %v8503_v52, %v492_v60  ;;  %v503_v5 = vsub.f32 %v8506_v53, %v502_v61  ;;  %v513_v6 = vsub.f32 %v8509_v54, %v512_v62  ;;  %v89_v54 = vld [vmem:[#allocation7 + $0x20] sm:$0xff] }
  0x6e   :  { %12425 = vst [vmem:[#allocation23_spill] sm:$0xff] %v8518_v58  ;;  %12426 = vst [vmem:[#allocation24_spill] sm:$0xff] %v8526_v63  ;;  %v532_v7 = vand.u32 4294901760, %v8526_v63  ;;  %7450 = vmatmul.mubr.f32.vlgmr.msra.gmra.mrb[0].mxu0 %v502_v61  ;;  %v523_v8 = vsub.f32 %v8514_v56, %v522_v0  ;;  %v542_v9 = vand.u32 4294901760, %v8530_v1  ;;  %v552_v14 = vand.u32 4294901760, %v8533_v2 }
  0x6f   :  { %12427 = vst [vmem:[#allocation25_spill] sm:$0xff] %v8530_v1  ;;  %12428 = vst [vmem:[#allocation26_spill] sm:$0xff] %v8533_v2  ;;  %v8547_v19 = vstv %s8244_s1  ;;  %7452 = vmatprep.mubr.f32.mxu0 %v512_v62  ;;  %v494_v21 = vand.u32 4294901760, %v493_v4  ;;  %v504_v22 = vand.u32 4294901760, %v503_v5  ;;  %7836 = vmatpush3.bf16.msra.mxu0 %v8448_v20  ;;  %v514_v26 = vand.u32 4294901760, %v513_v6 }
  0x70   :  { %12429 = vst [vmem:[#allocation27_spill] sm:$0xff] %v8535_v3  ;;  %12430 = vst [vmem:[#allocation28_spill] sm:$0xff] %v8545_v15  ;;  %v533_v24 = vsub.f32 %v8526_v63, %v532_v7  ;;  %v543_v27 = vsub.f32 %v8530_v1, %v542_v9  ;;  %v562_v28 = vand.u32 4294901760, %v8545_v15  ;;  %v553_v29 = vsub.f32 %v8533_v2, %v552_v14  ;;  %v87_v2 = vld [vmem:[#allocation7 + $0x10] sm:$0xff] }
  0x71   :  { %7838 = vmatprep.subr.msk.bf16.mxu0 %vm8424_vm6, %v12062_v13  ;;  %7077 = vmatprep.mubr.f32.mxu1 %v494_v21  ;;  %v524_v32 = vand.u32 4294901760, %v523_v8  ;;  %v8558_v40 = vmul.f32 %v8454_v31, %v56_v16  ;;  %v8561_v20 = vmul.f32 %v8454_v31, %v57_v17  ;;  %v8564_v41 = vmul.f32 %v8454_v31, %v58_v18  ;;  %v63_v8 = vld [vmem:[#allocation4 + $0x78] sm:$0xff] }
  0x72   :  { %7078 = vmatmul.mubr.f32.vlgmr.msra.gmra.mrb[0].mxu1 %v504_v22  ;;  %7453 = vmatmul.mubr.f32.gmra.mrb[2].mxu0 %v522_v0  ;;  %v534_v42 = vand.u32 4294901760, %v533_v24  ;;  %v544_v47 = vand.u32 4294901760, %v543_v27  ;;  %v554_v49 = vand.u32 4294901760, %v553_v29  ;;  %v8567_v50 = vmul.f32 %v8454_v31, %v59_v25 }
  0x73   :  { %7824 = vmatpush3.bf16.msra.mxu1 %v8451_v23  ;;  %7080 = vmatprep.mubr.f32.mxu1 %v514_v26  ;;  %v210_v60 = vsel %vm184_vm7, %v8558_v40, 0  ;;  %v213_v61 = vsel %vm184_vm7, %v8561_v20, 0  ;;  %v216_v62 = vsel %vm184_vm7, %v8564_v41, 0  ;;  %v8577_v0 = vmul.f32 %v8454_v31, %v60_v30 }
  0x74   :  { %7455 = vmatprep.mubr.f32.mxu0 %v532_v7  ;;  %v8579_v4 = vand.u32 4294901760, %v210_v60  ;;  %v563_v5 = vsub.f32 %v8545_v15, %v562_v28  ;;  %v8582_v6 = vand.u32 4294901760, %v213_v61  ;;  %v8584_v23 = vand.u32 4294901760, %v216_v62 }
  0x75   :  { %v219_v16 = vsel %vm184_vm7, %v8567_v50, 0  ;;  %v222_v17 = vsel %vm184_vm7, %v8577_v0, 0  ;;  %v8591_v18 = vmul.f32 %v8454_v31, %v61_v51  ;;  %v8594_v7 = vmul.f32 %v8454_v31, %v62_v59 }
  0x76   :  { %12431 = vst [vmem:[#allocation29_spill] sm:$0xff] %v8579_v4  ;;  %12432 = vst [vmem:[#allocation30_spill] sm:$0xff] %v8582_v6  ;;  %7081 = vmatmul.mubr.f32.gmra.mrb[2].mxu1 %v524_v32  ;;  %7456 = vmatmul.mubr.f32.gmra.mrb[4].mxu0 %v542_v9  ;;  %v8597_v21 = vsub.f32 %v210_v60, %v8579_v4  ;;  %v8600_v22 = vsub.f32 %v213_v61, %v8582_v6  ;;  %v8605_v25 = vand.u32 4294901760, %v219_v16  ;;  %v95_v6 = vld [vmem:[#allocation7 + $0x50] sm:$0xff] }
  0x77   :  { %12433 = vst [vmem:[#allocation31_spill] sm:$0xff] %v8584_v23  ;;  %v8603_v24 = vsub.f32 %v216_v62, %v8584_v23  ;;  %7083 = vmatprep.mubr.f32.mxu1 %v534_v42  ;;  %7458 = vmatprep.mubr.f32.mxu0 %v552_v14  ;;  %v8607_v26 = vand.u32 4294901760, %v222_v17  ;;  %v225_v27 = vsel %vm184_vm7, %v8591_v18, 0  ;;  %v228_v9 = vsel %vm184_vm7, %v8594_v7, 0  ;;  %v94_v23 = vld [vmem:[#allocation7 + $0x48] sm:$0xff] }
  0x78   :  { %12434 = vst [vmem:[#allocation32_spill] sm:$0xff] %v8597_v21  ;;  %12435 = vst [vmem:[#allocation33_spill] sm:$0xff] %v8600_v22  ;;  %v8614_v29 = vmul.f32 %v8454_v31, %v63_v8  ;;  %v572_v30 = vand.u32 4294901760, %v8597_v21  ;;  %v582_v32 = vand.u32 4294901760, %v8600_v22  ;;  %v8620_v42 = vsub.f32 %v219_v16, %v8605_v25 }
  0x79   :  { %12436 = vst [vmem:[#allocation34_spill] sm:$0xff] %v8603_v24  ;;  %12437 = vst [vmem:[#allocation35_spill] sm:$0xff] %v8605_v25  ;;  %v592_v51 = vand.u32 4294901760, %v8603_v24  ;;  %v8623_v14 = vsub.f32 %v222_v17, %v8607_v26  ;;  %v8625_v59 = vand.u32 4294901760, %v225_v27  ;;  %v8627_v60 = vand.u32 4294901760, %v228_v9 }
  0x7a   :  { %12438 = vst [vmem:[#allocation36_spill] sm:$0xff] %v8607_v26  ;;  %12439 = vst [vmem:[#allocation37_spill] sm:$0xff] %v8620_v42  ;;  %v231_v31 = vsel %vm184_vm7, %v8614_v29, 0  ;;  %7084 = vmatmul.mubr.f32.gmra.mrb[4].mxu1 %v544_v47  ;;  %7459 = vmatmul.mubr.f32.gmra.mrb[6].mxu0 %v562_v28  ;;  %v573_v61 = vsub.f32 %v8597_v21, %v572_v30  ;;  %v583_v62 = vsub.f32 %v8600_v22, %v582_v32  ;;  %v85_v28 = vld [vmem:[#allocation7] sm:$0xff]  ;;  %v86_v21 = vld [vmem:[#allocation7 + $0x8] sm:$0xff] }
  0x7b   :  { %12440 = vst [vmem:[#allocation38_spill] sm:$0xff] %v8623_v14  ;;  %12441 = vst [vmem:[#allocation39_spill] sm:$0xff] %v8625_v59  ;;  %v602_v8 = vand.u32 4294901760, %v8620_v42  ;;  %v593_v16 = vsub.f32 %v8603_v24, %v592_v51  ;;  %7086 = vmatprep.mubr.f32.mxu1 %v554_v49  ;;  %7461 = vmatprep.mubr.f32.mxu0 %v572_v30  ;;  %v612_v17 = vand.u32 4294901760, %v8623_v14  ;;  %v8642_v47 = vand.u32 4294901760, %v231_v31 }
  0x7c   :  { %12442 = vst [vmem:[#allocation40_spill] sm:$0xff] %v8627_v60  ;;  %v8637_v13 = vsub.f32 %v225_v27, %v8625_v59  ;;  %v8640_v15 = vsub.f32 %v228_v9, %v8627_v60  ;;  %v564_v22 = vand.u32 4294901760, %v563_v5  ;;  %v574_v63 = vand.u32 4294901760, %v573_v61  ;;  %v88_v27 = vld [vmem:[#allocation7 + $0x18] sm:$0xff] }
  0x7d   :  { %12445 = vst [vmem:[#allocation43_spill] sm:$0xff] %v8642_v47  ;;  %v603_v1 = vsub.f32 %v8620_v42, %v602_v8  ;;  %v613_v30 = vsub.f32 %v8623_v14, %v612_v17  ;;  %v8648_v24 = vsub.f32 %v231_v31, %v8642_v47  ;;  %v8651_v9 = vmul.f32 %v8547_v19, %v85_v28  ;;  %v91_v28 = vld [vmem:[#allocation7 + $0x30] sm:$0xff] }
  0x7e   :  { %12443 = vst [vmem:[#allocation41_spill] sm:$0xff] %v8637_v13  ;;  %12444 = vst [vmem:[#allocation42_spill] sm:$0xff] %v8640_v15  ;;  %v622_v49 = vand.u32 4294901760, %v8637_v13  ;;  %7087 = vmatmul.mubr.f32.gmra.mrb[6].mxu1 %v564_v22  ;;  %7462 = vmatmul.mubr.f32.gmra.mrb[8].mxu0 %v582_v32  ;;  %v8654_v56 = vmul.f32 %v8547_v19, %v86_v21  ;;  %v8657_v5 = vmul.f32 %v8547_v19, %v87_v2 }
  0x7f   :  { %12446 = vst [vmem:[#allocation44_spill] sm:$0xff] %v8648_v24  ;;  %7089 = vmatprep.mubr.f32.mxu1 %v574_v63  ;;  %7464 = vmatprep.mubr.f32.mxu0 %v592_v51  ;;  %v584_v61 = vand.u32 4294901760, %v583_v62  ;;  %v594_v42 = vand.u32 4294901760, %v593_v16  ;;  %v604_v14 = vand.u32 4294901760, %v603_v1  ;;  %v632_v31 = vand.u32 4294901760, %v8640_v15  ;;  %v90_v63 = vld [vmem:[#allocation7 + $0x28] sm:$0xff] }
  0x80   :  { %v234_v22 = vsel %vm184_vm7, %v8651_v9, 0  ;;  %v237_v32 = vsel %vm184_vm7, %v8654_v56, 0  ;;  %v240_v21 = vsel %vm184_vm7, %v8657_v5, 0  ;;  %v8667_v2 = vmul.f32 %v8547_v19, %v88_v27 }
  0x81   :  { %v614_v51 = vand.u32 4294901760, %v613_v30  ;;  %v623_v62 = vsub.f32 %v8637_v13, %v622_v49  ;;  %v642_v1 = vand.u32 4294901760, %v8648_v24  ;;  %v8671_v16 = vand.u32 4294901760, %v234_v22 }
  0x82   :  { %7090 = vmatmul.mubr.f32.gmra.mrb[8].mxu1 %v584_v61  ;;  %7465 = vmatmul.mubr.f32.gmra.mrb[10].mxu0 %v602_v8  ;;  %v8673_v53 = vand.u32 4294901760, %v237_v32  ;;  %v8675_v52 = vand.u32 4294901760, %v240_v21  ;;  %v243_v47 = vsel %vm184_vm7, %v8667_v2, 0  ;;  %v8680_v27 = vmul.f32 %v8547_v19, %v89_v54 }
  0x83   :  { %12447 = vst [vmem:[#allocation45_spill] sm:$0xff] %v8671_v16  ;;  %7092 = vmatprep.mubr.f32.mxu1 %v594_v42  ;;  %7467 = vmatprep.mubr.f32.mxu0 %v612_v17  ;;  %v633_v30 = vsub.f32 %v8640_v15, %v632_v31  ;;  %v8684_v13 = vsub.f32 %v234_v22, %v8671_v16  ;;  %v8686_v60 = vand.u32 4294901760, %v243_v47  ;;  %v624_v16 = vand.u32 4294901760, %v623_v62 }
  0x84   :  { %12448 = vst [vmem:[#allocation46_spill] sm:$0xff] %v8673_v53  ;;  %12449 = vst [vmem:[#allocation47_spill] sm:$0xff] %v8675_v52  ;;  %v8689_v8 = vmul.f32 %v8547_v19, %v90_v63  ;;  %v8692_v61 = vsub.f32 %v237_v32, %v8673_v53  ;;  %v8695_v59 = vsub.f32 %v240_v21, %v8675_v52  ;;  %v246_v54 = vsel %vm184_vm7, %v8680_v27, 0  ;;  %v92_v63 = vld [vmem:[#allocation7 + $0x38] sm:$0xff] }
  0x85   :  { %12450 = vst [vmem:[#allocation48_spill] sm:$0xff] %v8684_v13  ;;  %12451 = vst [vmem:[#allocation49_spill] sm:$0xff] %v8686_v60  ;;  %v8700_v42 = vmul.f32 %v8547_v19, %v91_v28  ;;  %v652_v17 = vand.u32 4294901760, %v8684_v13  ;;  %v8704_v22 = vsub.f32 %v243_v47, %v8686_v60  ;;  %v8706_v15 = vand.u32 4294901760, %v246_v54 }
  0x86   :  { %12452 = vst [vmem:[#allocation50_spill] sm:$0xff] %v8692_v61  ;;  %12453 = vst [vmem:[#allocation51_spill] sm:$0xff] %v8695_v59  ;;  %v249_v32 = vsel %vm184_vm7, %v8689_v8, 0  ;;  %7093 = vmatmul.mubr.f32.gmra.mrb[10].mxu1 %v604_v14  ;;  %7468 = vmatmul.mubr.f32.gmra.mrb[12].mxu0 %v622_v49  ;;  %v662_v21 = vand.u32 4294901760, %v8692_v61  ;;  %v643_v28 = vsub.f32 %v8648_v24, %v642_v1  ;;  %v672_v47 = vand.u32 4294901760, %v8695_v59  ;;  %v93_v24 = vld [vmem:[#allocation7 + $0x40] sm:$0xff] }
  0x87   :  { %12454 = vst [vmem:[#allocation52_spill] sm:$0xff] %v8704_v22  ;;  %12455 = vst [vmem:[#allocation53_spill] sm:$0xff] %v8706_v15  ;;  %v252_v52 = vsel %vm184_vm7, %v8700_v42, 0  ;;  %7095 = vmatprep.mubr.f32.mxu1 %v614_v51  ;;  %7470 = vmatprep.mubr.f32.mxu0 %v632_v31  ;;  %v8715_v60 = vand.u32 4294901760, %v249_v32  ;;  %v634_v26 = vand.u32 4294901760, %v633_v30  ;;  %v8720_v14 = vmul.f32 %v8547_v19, %v92_v63 }
  0x88   :  { %v8717_v53 = vand.u32 4294901760, %v252_v52  ;;  %v653_v49 = vsub.f32 %v8684_v13, %v652_v17  ;;  %v663_v25 = vsub.f32 %v8692_v61, %v662_v21  ;;  %v682_v51 = vand.u32 4294901760, %v8704_v22 }
  0x89   :  { %12456 = vst [vmem:[#allocation54_spill] sm:$0xff] %v8715_v60  ;;  %v8726_v31 = vsub.f32 %v246_v54, %v8706_v15  ;;  %v255_v62 = vsel %vm184_vm7, %v8720_v14, 0  ;;  %v644_v30 = vand.u32 4294901760, %v643_v28  ;;  %v673_v63 = vsub.f32 %v8695_v59, %v672_v47  ;;  %v96_v54 = vld [vmem:[#allocation7 + $0x58] sm:$0xff] }
  0x8a   :  { %12457 = vst [vmem:[#allocation55_spill] sm:$0xff] %v8717_v53  ;;  %7096 = vmatmul.mubr.f32.gmra.mrb[12].mxu1 %v624_v16  ;;  %7471 = vmatmul.mubr.f32.gmra.mrb[14].mxu0 %v642_v1  ;;  %v8732_v61 = vsub.f32 %v249_v32, %v8715_v60  ;;  %v8735_v13 = vsub.f32 %v252_v52, %v8717_v53  ;;  %v8737_v15 = vand.u32 4294901760, %v255_v62  ;;  %v664_v28 = vand.u32 4294901760, %v663_v25  ;;  %v97_v52 = vld [vmem:[#allocation7 + $0x60] sm:$0xff]  ;;  %v98_v25 = vld [vmem:[#allocation7 + $0x68] sm:$0xff]  ;;  %v99_v60 = vld [vmem:[#allocation7 + $0x70] sm:$0xff] }
  0x8b   :  { %12458 = vst [vmem:[#allocation56_spill] sm:$0xff] %v8726_v31  ;;  %7098 = vmatprep.mubr.f32.mxu1 %v634_v26  ;;  %7473 = vmatprep.mubr.f32.mxu0 %v652_v17  ;;  %v8740_v16 = vmul.f32 %v8547_v19, %v93_v24  ;;  %v8743_v1 = vmul.f32 %v8547_v19, %v94_v23  ;;  %v654_v17 = vand.u32 4294901760, %v653_v49  ;;  %v692_v32 = vand.u32 4294901760, %v8726_v31 }
  0x8c   :  { %12459 = vst [vmem:[#allocation57_spill] sm:$0xff] %v8732_v61  ;;  %12460 = vst [vmem:[#allocation58_spill] sm:$0xff] %v8735_v13  ;;  %v8746_v26 = vmul.f32 %v8547_v19, %v95_v6  ;;  %v683_v59 = vsub.f32 %v8704_v22, %v682_v51  ;;  %v8757_v6 = vmul.f32 %v8547_v19, %v96_v54  ;;  %v702_v49 = vand.u32 4294901760, %v8732_v61 }
  0x8d   :  { %12461 = vst [vmem:[#allocation59_spill] sm:$0xff] %v8737_v15  ;;  %v258_v53 = vsel %vm184_vm7, %v8740_v16, 0  ;;  %v261_v24 = vsel %vm184_vm7, %v8743_v1, 0  ;;  %v674_v4 = vand.u32 4294901760, %v673_v63  ;;  %v8766_v3 = vsub.f32 %v255_v62, %v8737_v15 }
  0x8e   :  { %7099 = vmatmul.mubr.f32.gmra.mrb[14].mxu1 %v644_v30  ;;  %7474 = vmatmul.mubr.f32.gmra.mrb[16].mxu0 %v662_v21  ;;  %v264_v23 = vsel %vm184_vm7, %v8746_v26, 0  ;;  %v712_v30 = vand.u32 4294901760, %v8735_v13  ;;  %v8761_v21 = vand.u32 4294901760, %v258_v53  ;;  %v8763_v22 = vand.u32 4294901760, %v261_v24 }
  0x8f   :  { %7101 = vmatprep.mubr.f32.mxu1 %v654_v17  ;;  %7476 = vmatprep.mubr.f32.mxu0 %v672_v47  ;;  %12464 = vst [vmem:[#allocation62_spill] sm:$0xff] %v8766_v3  ;;  %v267_v54 = vsel %vm184_vm7, %v8757_v6, 0  ;;  %v8771_v58 = vmul.f32 %v8547_v19, %v97_v52  ;;  %v693_v47 = vsub.f32 %v8726_v31, %v692_v32  ;;  %v8777_v57 = vand.u32 4294901760, %v264_v23 }
  0x90   :  { %12462 = vst [vmem:[#allocation60_spill] sm:$0xff] %v8761_v21  ;;  %12463 = vst [vmem:[#allocation61_spill] sm:$0xff] %v8763_v22  ;;  %v8775_v17 = vsub.f32 %v258_v53, %v8761_v21  ;;  %v8780_v55 = vmul.f32 %v8547_v19, %v98_v25  ;;  %v8783_v62 = vsub.f32 %v261_v24, %v8763_v22  ;;  %v8785_v63 = vand.u32 4294901760, %v267_v54 }
  0x91   :  { %12466 = vst [vmem:[#allocation64_spill] sm:$0xff] %v8777_v57  ;;  %v270_v52 = vsel %vm184_vm7, %v8771_v58, 0  ;;  %v8790_v31 = vmul.f32 %v8547_v19, %v99_v60  ;;  %v684_v53 = vand.u32 4294901760, %v683_v59  ;;  %v703_v21 = vsub.f32 %v8732_v61, %v702_v49  ;;  %v100_v59 = vld [vmem:[#allocation7 + $0x78] sm:$0xff] }
  0x92   :  { %12465 = vst [vmem:[#allocation63_spill] sm:$0xff] %v8775_v17  ;;  %7102 = vmatmul.mubr.f32.gmra.mrb[16].mxu1 %v664_v28  ;;  %7477 = vmatmul.mubr.f32.gmra.mrb[18].mxu0 %v682_v51  ;;  %12467 = vst [vmem:[#allocation65_spill] sm:$0xff] %v8783_v62  ;;  %v713_v25 = vsub.f32 %v8735_v13, %v712_v30  ;;  %v722_v51 = vand.u32 4294901760, %v8766_v3  ;;  %v8795_v28 = vand.u32 4294901760, %v270_v52  ;;  %v273_v24 = vsel %vm184_vm7, %v8780_v55, 0 }
  0x93   :  { %12468 = vst [vmem:[#allocation66_spill] sm:$0xff] %v8785_v63  ;;  %7104 = vmatprep.mubr.f32.mxu1 %v674_v4  ;;  %7479 = vmatprep.mubr.f32.mxu0 %v692_v32  ;;  %v276_v22 = vsel %vm184_vm7, %v8790_v31, 0  ;;  %v694_v15 = vand.u32 4294901760, %v693_v47  ;;  %v732_v60 = vand.u32 4294901760, %v8775_v17  ;;  %v8803_v4 = vsub.f32 %v264_v23, %v8777_v57 }
  0x94   :  { %12469 = vst [vmem:[#allocation67_spill] sm:$0xff] %v8795_v28  ;;  %v742_v32 = vand.u32 4294901760, %v8783_v62  ;;  %v8807_v13 = vsub.f32 %v267_v54, %v8785_v63  ;;  %v704_v61 = vand.u32 4294901760, %v703_v21  ;;  %v8809_v48 = vand.u32 4294901760, %v273_v24 }
  0x95   :  { %12470 = vst [vmem:[#allocation68_spill] sm:$0xff] %v8803_v4  ;;  %v8811_v10 = vand.u32 4294901760, %v276_v22  ;;  %v714_v47 = vand.u32 4294901760, %v713_v25  ;;  %v723_v46 = vsub.f32 %v8766_v3, %v722_v51  ;;  %v8815_v23 = vsub.f32 %v270_v52, %v8795_v28 }
  0x96   :  { %7105 = vmatmul.mubr.f32.gmra.mrb[18].mxu1 %v684_v53  ;;  %7480 = vmatmul.mubr.f32.gmra.mrb[20].mxu0 %v702_v49  ;;  %12471 = vst [vmem:[#allocation69_spill] sm:$0xff] %v8807_v13  ;;  %12472 = vst [vmem:[#allocation70_spill] sm:$0xff] %v8809_v48  ;;  %v8818_v49 = vmul.f32 %v8547_v19, %v100_v59  ;;  %v733_v53 = vsub.f32 %v8775_v17, %v732_v60  ;;  %v752_v54 = vand.u32 4294901760, %v8803_v4 }
  0x97   :  { %7107 = vmatprep.mubr.f32.mxu1 %v694_v15  ;;  %7482 = vmatprep.mubr.f32.mxu0 %v712_v30  ;;  %12473 = vst [vmem:[#allocation71_spill] sm:$0xff] %v8811_v10  ;;  %12474 = vst [vmem:[#allocation72_spill] sm:$0xff] %v8815_v23  ;;  %v122_v15 = vmul.f32 %v8457_v33, %v8457_v33  ;;  %v123_v30 = vmul.f32 %v8460_v34, %v8460_v34  ;;  %v762_v52 = vand.u32 4294901760, %v8807_v13 }
  0x98   :  { %v743_v21 = vsub.f32 %v8783_v62, %v742_v32  ;;  %v279_v19 = vsel %vm184_vm7, %v8818_v49, 0  ;;  %v124_v25 = vmul.f32 %v8463_v35, %v8463_v35  ;;  %v8833_v59 = vsub.f32 %v273_v24, %v8809_v48 }
  0x99   :  { %v8836_v17 = vsub.f32 %v276_v22, %v8811_v10  ;;  %v724_v62 = vand.u32 4294901760, %v723_v46  ;;  %v772_v3 = vand.u32 4294901760, %v8815_v23  ;;  %v8841_v28 = vand.u32 4294901760, %v279_v19 }
  0x9a   :  { %7108 = vmatmul.mubr.f32.gmra.mrb[20].mxu1 %v704_v61  ;;  %7483 = vmatmul.mubr.f32.gmra.mrb[22].mxu0 %v722_v51  ;;  %12475 = vst [vmem:[#allocation73_spill] sm:$0xff] %v8833_v59  ;;  %v282_v61 = vsel %vm184_vm7, %v122_v15, 0  ;;  %v285_v51 = vsel %vm184_vm7, %v123_v30, 0  ;;  %v734_v57 = vand.u32 4294901760, %v733_v53  ;;  %v288_v24 = vsel %vm184_vm7, %v124_v25, 0 }
  0x9b   :  { %7110 = vmatprep.mubr.f32.mxu1 %v714_v47  ;;  %7485 = vmatprep.mubr.f32.mxu0 %v732_v60  ;;  %12476 = vst [vmem:[#allocation74_spill] sm:$0xff] %v8836_v17  ;;  %12477 = vst [vmem:[#allocation75_spill] sm:$0xff] %v8841_v28  ;;  %v8843_v63 = vand.u32 4294901760, %v282_v61  ;;  %v753_v60 = vsub.f32 %v8803_v4, %v752_v54  ;;  %v125_v22 = vmul.f32 %v8466_v36, %v8466_v36 }
  0x9c   :  { %v744_v47 = vand.u32 4294901760, %v743_v21  ;;  %v8849_v15 = vand.u32 4294901760, %v285_v51  ;;  %v126_v46 = vmul.f32 %v8469_v37, %v8469_v37  ;;  %v763_v30 = vsub.f32 %v8807_v13, %v762_v52 }
  0x9d   :  { %12478 = vst [vmem:[#allocation76_spill] sm:$0xff] %v8843_v63  ;;  %v782_v53 = vand.u32 4294901760, %v8833_v59  ;;  %v792_v4 = vand.u32 4294901760, %v8836_v17  ;;  %v8856_v25 = vand.u32 4294901760, %v288_v24  ;;  %v773_v10 = vsub.f32 %v8815_v23, %v772_v3 }
  0x9e   :  { %7111 = vmatmul.mubr.f32.gmra.mrb[22].mxu1 %v724_v62  ;;  %7486 = vmatmul.mubr.f32.gmra.mrb[24].mxu0 %v742_v32  ;;  %12479 = vst [vmem:[#allocation77_spill] sm:$0xff] %v8849_v15  ;;  %v8860_v62 = vsub.f32 %v279_v19, %v8841_v28  ;;  %v8863_v32 = vsub.f32 %v282_v61, %v8843_v63  ;;  %v291_v21 = vsel %vm184_vm7, %v125_v22, 0  ;;  %v294_v19 = vsel %vm184_vm7, %v126_v46, 0 }
  0x9f   :  { %7113 = vmatprep.mubr.f32.mxu1 %v734_v57  ;;  %7488 = vmatprep.mubr.f32.mxu0 %v752_v54  ;;  %12480 = vst [vmem:[#allocation78_spill] sm:$0xff] %v8856_v25  ;;  %v754_v57 = vand.u32 4294901760, %v753_v60  ;;  %v127_v54 = vmul.f32 %v8472_v38, %v8472_v38  ;;  %v128_v13 = vmul.f32 %v8475_v39, %v8475_v39  ;;  %v764_v61 = vand.u32 4294901760, %v763_v30 }
  0xa0   :  { %12481 = vst [vmem:[#allocation79_spill] sm:$0xff] %v8860_v62  ;;  %12482 = vst [vmem:[#allocation80_spill] sm:$0xff] %v8863_v32  ;;  %v8871_v48 = vsub.f32 %v285_v51, %v8849_v15  ;;  %v783_v23 = vsub.f32 %v8833_v59, %v782_v53  ;;  %v8876_v60 = vsub.f32 %v288_v24, %v8856_v25  ;;  %v8878_v22 = vand.u32 4294901760, %v291_v21 }
  0xa1   :  { %v774_v63 = vand.u32 4294901760, %v773_v10  ;;  %v802_v28 = vand.u32 4294901760, %v8860_v62  ;;  %v812_v51 = vand.u32 4294901760, %v8863_v32  ;;  %v297_v46 = vsel %vm184_vm7, %v127_v54, 0 }
  0xa2   :  { %7114 = vmatmul.mubr.f32.gmra.mrb[24].mxu1 %v744_v47  ;;  %7489 = vmatmul.mubr.f32.gmra.mrb[26].mxu0 %v762_v52  ;;  %12483 = vst [vmem:[#allocation81_spill] sm:$0xff] %v8871_v48  ;;  %12484 = vst [vmem:[#allocation82_spill] sm:$0xff] %v8876_v60  ;;  %v793_v52 = vsub.f32 %v8836_v17, %v792_v4  ;;  %v8883_v47 = vand.u32 4294901760, %v294_v19  ;;  %v129_v30 = vmul.f32 %v8484_v43, %v8484_v43 }
  0xa3   :  { %7116 = vmatprep.mubr.f32.mxu1 %v754_v57  ;;  %7491 = vmatprep.mubr.f32.mxu0 %v772_v3  ;;  %12485 = vst [vmem:[#allocation83_spill] sm:$0xff] %v8878_v22  ;;  %v300_v3 = vsel %vm184_vm7, %v128_v13, 0  ;;  %v822_v24 = vand.u32 4294901760, %v8871_v48  ;;  %v130_v10 = vmul.f32 %v8558_v40, %v8558_v40  ;;  %v832_v57 = vand.u32 4294901760, %v8876_v60 }
  0xa4   :  { %12486 = vst [vmem:[#allocation84_spill] sm:$0xff] %v8883_v47  ;;  %v8894_v17 = vsub.f32 %v291_v21, %v8878_v22  ;;  %v303_v54 = vsel %vm184_vm7, %v129_v30, 0  ;;  %v131_v13 = vmul.f32 %v8561_v20, %v8561_v20  ;;  %v784_v59 = vand.u32 4294901760, %v783_v23 }
  0xa5   :  { %v8902_v25 = vand.u32 4294901760, %v300_v3  ;;  %v794_v15 = vand.u32 4294901760, %v793_v52  ;;  %v8908_v21 = vand.u32 4294901760, %v303_v54  ;;  %v306_v30 = vsel %vm184_vm7, %v130_v10, 0 }
  0xa6   :  { %7117 = vmatmul.mubr.f32.gmra.mrb[26].mxu1 %v764_v61  ;;  %7492 = vmatmul.mubr.f32.gmra.mrb[28].mxu0 %v782_v53  ;;  %12487 = vst [vmem:[#allocation85_spill] sm:$0xff] %v8894_v17  ;;  %v803_v53 = vsub.f32 %v8860_v62, %v802_v28  ;;  %v8900_v61 = vand.u32 4294901760, %v297_v46  ;;  %v132_v23 = vmul.f32 %v8564_v41, %v8564_v41  ;;  %v842_v52 = vand.u32 4294901760, %v8894_v17 }
  0xa7   :  { %7119 = vmatprep.mubr.f32.mxu1 %v774_v63  ;;  %7494 = vmatprep.mubr.f32.mxu0 %v792_v4  ;;  %12489 = vst [vmem:[#allocation87_spill] sm:$0xff] %v8902_v25  ;;  %v813_v63 = vsub.f32 %v8863_v32, %v812_v51  ;;  %v8906_v4 = vsub.f32 %v294_v19, %v8883_v47  ;;  %12491 = vst [vmem:[#allocation89_spill] sm:$0xff] %v8908_v21  ;;  %v309_v19 = vsel %vm184_vm7, %v131_v13, 0 }
  0xa8   :  { %12488 = vst [vmem:[#allocation86_spill] sm:$0xff] %v8900_v61  ;;  %v823_v62 = vsub.f32 %v8871_v48, %v822_v24  ;;  %v833_v32 = vsub.f32 %v8876_v60, %v832_v57  ;;  %v804_v47 = vand.u32 4294901760, %v803_v53  ;;  %v133_v10 = vmul.f32 %v8567_v50, %v8567_v50 }
  0xa9   :  { %12490 = vst [vmem:[#allocation88_spill] sm:$0xff] %v8906_v4  ;;  %v8926_v48 = vand.u32 4294901760, %v306_v30  ;;  %v134_v60 = vmul.f32 %v8577_v0, %v8577_v0  ;;  %v8931_v13 = vsub.f32 %v303_v54, %v8908_v21 }
  0xaa   :  { %7120 = vmatmul.mubr.f32.gmra.mrb[28].mxu1 %v784_v59  ;;  %7495 = vmatmul.mubr.f32.gmra.mrb[30].mxu0 %v802_v28  ;;  %v8918_v28 = vsub.f32 %v297_v46, %v8900_v61  ;;  %v8921_v59 = vsub.f32 %v300_v3, %v8902_v25  ;;  %v8933_v46 = vand.u32 4294901760, %v309_v19  ;;  %v312_v3 = vsel %vm184_vm7, %v132_v23, 0 }
  0xab   :  { %7122 = vmatprep.mubr.f32.mxu1 %v794_v15  ;;  %7497 = vmatprep.mubr.f32.mxu0 %v812_v51  ;;  %v814_v15 = vand.u32 4294901760, %v813_v63  ;;  %v852_v51 = vand.u32 4294901760, %v8906_v4  ;;  %12494 = vst [vmem:[#allocation92_spill] sm:$0xff] %v8926_v48  ;;  %12495 = vst [vmem:[#allocation93_spill] sm:$0xff] %v8931_v13  ;;  %v824_v53 = vand.u32 4294901760, %v823_v62  ;;  %v834_v63 = vand.u32 4294901760, %v833_v32 }
  0xac   :  { %12492 = vst [vmem:[#allocation90_spill] sm:$0xff] %v8918_v28  ;;  %12493 = vst [vmem:[#allocation91_spill] sm:$0xff] %v8921_v59  ;;  %v843_v25 = vsub.f32 %v8894_v17, %v842_v52  ;;  %v862_v61 = vand.u32 4294901760, %v8918_v28  ;;  %v872_v22 = vand.u32 4294901760, %v8921_v59  ;;  %v8944_v21 = vsub.f32 %v306_v30, %v8926_v48 }
  0xad   :  { %12496 = vst [vmem:[#allocation94_spill] sm:$0xff] %v8933_v46  ;;  %v853_v54 = vsub.f32 %v8906_v4, %v852_v51  ;;  %v8946_v23 = vand.u32 4294901760, %v312_v3  ;;  %v318_v62 = vsel %vm184_vm7, %v134_v60, 0  ;;  %v882_v32 = vand.u32 4294901760, %v8931_v13 }
  0xae   :  { %7123 = vmatmul.mubr.f32.gmra.mrb[30].mxu1 %v804_v47  ;;  %7498 = vmatmul.mubr.f32.gmra.mrb[32].mxu0 %v822_v24  ;;  %v315_v47 = vsel %vm184_vm7, %v133_v10, 0  ;;  %v135_v24 = vmul.f32 %v8591_v18, %v8591_v18  ;;  %12497 = vst [vmem:[#allocation95_spill] sm:$0xff] %v8944_v21  ;;  %v136_v10 = vmul.f32 %v8594_v7, %v8594_v7  ;;  %v8959_v60 = vand.u32 4294901760, %v318_v62 }
  0xaf   :  { %7125 = vmatprep.mubr.f32.mxu1 %v814_v15  ;;  %7500 = vmatprep.mubr.f32.mxu0 %v832_v57  ;;  %12498 = vst [vmem:[#allocation96_spill] sm:$0xff] %v8946_v23  ;;  %v8951_v57 = vsub.f32 %v309_v19, %v8933_v46  ;;  %v844_v15 = vand.u32 4294901760, %v843_v25  ;;  %v8955_v4 = vand.u32 4294901760, %v315_v47  ;;  %v863_v30 = vsub.f32 %v8918_v28, %v862_v61 }
  0xb0   :  { %v873_v17 = vsub.f32 %v8921_v59, %v872_v22  ;;  %12501 = vst [vmem:[#allocation99_spill] sm:$0xff] %v8959_v60  ;;  %v892_v19 = vand.u32 4294901760, %v8944_v21  ;;  %v8964_v46 = vsub.f32 %v312_v3, %v8946_v23  ;;  %v883_v25 = vsub.f32 %v8931_v13, %v882_v32 }
  0xb1   :  { %12499 = vst [vmem:[#allocation97_spill] sm:$0xff] %v8951_v57  ;;  %12500 = vst [vmem:[#allocation98_spill] sm:$0xff] %v8955_v4  ;;  %v324_v59 = vsel %vm184_vm7, %v136_v10, 0  ;;  %v8981_v13 = vsub.f32 %v318_v62, %v8959_v60  ;;  %v140_v10 = vmul.f32 %v8657_v5, %v8657_v5  ;;  %v141_v48 = vmul.f32 %v8667_v2, %v8667_v2 }
  0xb2   :  { %7126 = vmatmul.mubr.f32.gmra.mrb[32].mxu1 %v824_v53  ;;  %7501 = vmatmul.mubr.f32.gmra.mrb[34].mxu0 %v842_v52  ;;  %v321_v52 = vsel %vm184_vm7, %v135_v24, 0  ;;  %v854_v53 = vand.u32 4294901760, %v853_v54  ;;  %12502 = vst [vmem:[#allocation100_spill] sm:$0xff] %v8964_v46  ;;  %v138_v24 = vmul.f32 %v8651_v9, %v8651_v9  ;;  %v8974_v54 = vsub.f32 %v315_v47, %v8955_v4 }
  0xb3   :  { %7128 = vmatprep.mubr.f32.mxu1 %v834_v63  ;;  %7503 = vmatprep.mubr.f32.mxu0 %v852_v51  ;;  %v137_v51 = vmul.f32 %v8614_v29, %v8614_v29  ;;  %v902_v63 = vand.u32 4294901760, %v8951_v57  ;;  %v8976_v3 = vand.u32 4294901760, %v321_v52  ;;  %v874_v28 = vand.u32 4294901760, %v873_v17  ;;  %12505 = vst [vmem:[#allocation103_spill] sm:$0xff] %v8981_v13 }
  0xb4   :  { %12503 = vst [vmem:[#allocation101_spill] sm:$0xff] %v8974_v54  ;;  %v893_v23 = vsub.f32 %v8944_v21, %v892_v19  ;;  %v884_v4 = vand.u32 4294901760, %v883_v25  ;;  %v330_v17 = vsel %vm184_vm7, %v138_v24, 0  ;;  %v922_v62 = vand.u32 4294901760, %v8974_v54 }
  0xb5   :  { %12504 = vst [vmem:[#allocation102_spill] sm:$0xff] %v8976_v3  ;;  %v327_v47 = vsel %vm184_vm7, %v137_v51, 0  ;;  %v8994_v60 = vsub.f32 %v321_v52, %v8976_v3  ;;  %v932_v51 = vand.u32 4294901760, %v8981_v13  ;;  %v336_v25 = vsel %vm184_vm7, %v140_v10, 0 }
  0xb6   :  { %7129 = vmatmul.mubr.f32.gmra.mrb[34].mxu1 %v844_v15  ;;  %7504 = vmatmul.mubr.f32.gmra.mrb[36].mxu0 %v862_v61  ;;  %v139_v15 = vmul.f32 %v8654_v56, %v8654_v56  ;;  %v864_v61 = vand.u32 4294901760, %v863_v30  ;;  %v903_v30 = vsub.f32 %v8951_v57, %v902_v63  ;;  %v923_v10 = vsub.f32 %v8974_v54, %v922_v62 }
  0xb7   :  { %7131 = vmatprep.mubr.f32.mxu1 %v854_v53  ;;  %7506 = vmatprep.mubr.f32.mxu0 %v872_v22  ;;  %v912_v22 = vand.u32 4294901760, %v8964_v46  ;;  %v8987_v53 = vand.u32 4294901760, %v324_v59  ;;  %12507 = vst [vmem:[#allocation105_spill] sm:$0xff] %v8994_v60  ;;  %v9014_v3 = vand.u32 4294901760, %v336_v25 }
  0xb8   :  { %v333_v21 = vsel %vm184_vm7, %v139_v15, 0  ;;  %v904_v57 = vand.u32 4294901760, %v903_v30  ;;  %v143_v30 = vmul.f32 %v8689_v8, %v8689_v8 }
  0xb9   :  { %12506 = vst [vmem:[#allocation104_spill] sm:$0xff] %v8987_v53  ;;  %v913_v24 = vsub.f32 %v8964_v46, %v912_v22  ;;  %v9007_v52 = vsub.f32 %v324_v59, %v8987_v53  ;;  %v9011_v15 = vand.u32 4294901760, %v333_v21  ;;  %12512 = vst [vmem:[#allocation110_spill] sm:$0xff] %v9014_v3  ;;  %v942_v46 = vand.u32 4294901760, %v8994_v60 }
  0xba   :  { %7132 = vmatmul.mubr.f32.gmra.mrb[36].mxu1 %v864_v61  ;;  %7507 = vmatmul.mubr.f32.gmra.mrb[38].mxu0 %v882_v32  ;;  %v9000_v32 = vand.u32 4294901760, %v327_v47  ;;  %v9009_v61 = vand.u32 4294901760, %v330_v17  ;;  %v933_v59 = vsub.f32 %v8981_v13, %v932_v51 }
  0xbb   :  { %7134 = vmatprep.mubr.f32.mxu1 %v874_v28  ;;  %7509 = vmatprep.mubr.f32.mxu0 %v892_v19  ;;  %v142_v28 = vmul.f32 %v8680_v27, %v8680_v27  ;;  %v894_v19 = vand.u32 4294901760, %v893_v23  ;;  %12509 = vst [vmem:[#allocation107_spill] sm:$0xff] %v9007_v52  ;;  %12511 = vst [vmem:[#allocation109_spill] sm:$0xff] %v9011_v15  ;;  %v339_v23 = vsel %vm184_vm7, %v141_v48, 0 }
  0xbc   :  { %12508 = vst [vmem:[#allocation106_spill] sm:$0xff] %v9000_v32  ;;  %12510 = vst [vmem:[#allocation108_spill] sm:$0xff] %v9009_v61  ;;  %v9020_v53 = vsub.f32 %v327_v47, %v9000_v32  ;;  %v9030_v48 = vsub.f32 %v333_v21, %v9011_v15  ;;  %v9032_v13 = vand.u32 4294901760, %v339_v23  ;;  %v144_v47 = vmul.f32 %v8700_v42, %v8700_v42 }
  0xbd   :  { %v934_v54 = vand.u32 4294901760, %v933_v59 }
  0xbe   :  { %7135 = vmatmul.mubr.f32.gmra.mrb[38].mxu1 %v884_v4  ;;  %7510 = vmatmul.mubr.f32.gmra.mrb[40].mxu0 %v902_v63  ;;  %12513 = vst [vmem:[#allocation111_spill] sm:$0xff] %v9020_v53  ;;  %v342_v4 = vsel %vm184_vm7, %v142_v28, 0  ;;  %v914_v63 = vand.u32 4294901760, %v913_v24  ;;  %12515 = vst [vmem:[#allocation113_spill] sm:$0xff] %v9030_v48  ;;  %v9037_v28 = vsub.f32 %v336_v25, %v9014_v3  ;;  %v924_v24 = vand.u32 4294901760, %v923_v10 }
  0xbf   :  { %7137 = vmatprep.mubr.f32.mxu1 %v894_v19  ;;  %7512 = vmatprep.mubr.f32.mxu0 %v912_v22  ;;  %v952_v19 = vand.u32 4294901760, %v9007_v52  ;;  %v9025_v22 = vsub.f32 %v330_v17, %v9009_v61  ;;  %12516 = vst [vmem:[#allocation114_spill] sm:$0xff] %v9032_v13  ;;  %v9039_v17 = vand.u32 4294901760, %v342_v4  ;;  %v345_v61 = vsel %vm184_vm7, %v143_v30, 0 }
  0xc0   :  { %12517 = vst [vmem:[#allocation115_spill] sm:$0xff] %v9037_v28  ;;  %v982_v25 = vand.u32 4294901760, %v9030_v48  ;;  %v9050_v10 = vsub.f32 %v339_v23, %v9032_v13  ;;  %v348_v59 = vsel %vm184_vm7, %v144_v47, 0  ;;  %v9062_v23 = vand.u32 4294901760, %v345_v61 }
  0xc1   :  { %12514 = vst [vmem:[#allocation112_spill] sm:$0xff] %v9025_v22  ;;  %12518 = vst [vmem:[#allocation116_spill] sm:$0xff] %v9039_v17  ;;  %v953_v21 = vsub.f32 %v9007_v52, %v952_v19  ;;  %v972_v15 = vand.u32 4294901760, %v9025_v22  ;;  %v992_v52 = vand.u32 4294901760, %v9037_v28  ;;  %v9057_v30 = vsub.f32 %v342_v4, %v9039_v17 }
  0xc2   :  { %7138 = vmatmul.mubr.f32.gmra.mrb[40].mxu1 %v904_v57  ;;  %7513 = vmatmul.mubr.f32.gmra.mrb[42].mxu0 %v922_v62  ;;  %v943_v57 = vsub.f32 %v8994_v60, %v942_v46  ;;  %v962_v62 = vand.u32 4294901760, %v9020_v53  ;;  %12519 = vst [vmem:[#allocation117_spill] sm:$0xff] %v9050_v10  ;;  %12521 = vst [vmem:[#allocation119_spill] sm:$0xff] %v9062_v23  ;;  %v9065_v3 = vand.u32 4294901760, %v348_v59 }
  0xc3   :  { %7140 = vmatprep.mubr.f32.mxu1 %v914_v63  ;;  %7515 = vmatprep.mubr.f32.mxu0 %v932_v51  ;;  %v145_v51 = vmul.f32 %v8720_v14, %v8720_v14  ;;  %v146_v63 = vmul.f32 %v8740_v16, %v8740_v16  ;;  %12520 = vst [vmem:[#allocation118_spill] sm:$0xff] %v9057_v30  ;;  %v954_v13 = vand.u32 4294901760, %v953_v21 }
  0xc4   :  { %v963_v60 = vsub.f32 %v9020_v53, %v962_v62  ;;  %v973_v47 = vsub.f32 %v9025_v22, %v972_v15  ;;  %12522 = vst [vmem:[#allocation120_spill] sm:$0xff] %v9065_v3  ;;  %v983_v4 = vsub.f32 %v9030_v48, %v982_v25  ;;  %v993_v21 = vsub.f32 %v9037_v28, %v992_v52 }
  0xc5   :  { %v354_v17 = vsel %vm184_vm7, %v146_v63, 0  ;;  %v1012_v22 = vand.u32 4294901760, %v9057_v30  ;;  %v150_v63 = vmul.f32 %v8771_v58, %v8771_v58 }
  0xc6   :  { %7141 = vmatmul.mubr.f32.gmra.mrb[42].mxu1 %v924_v24  ;;  %7516 = vmatmul.mubr.f32.gmra.mrb[44].mxu0 %v942_v46  ;;  %v147_v46 = vmul.f32 %v8743_v1, %v8743_v1  ;;  %v944_v24 = vand.u32 4294901760, %v943_v57  ;;  %v148_v57 = vmul.f32 %v8746_v26, %v8746_v26  ;;  %v9088_v28 = vand.u32 4294901760, %v354_v17 }
  0xc7   :  { %7143 = vmatprep.mubr.f32.mxu1 %v934_v54  ;;  %7518 = vmatprep.mubr.f32.mxu0 %v952_v19  ;;  %v351_v54 = vsel %vm184_vm7, %v145_v51, 0  ;;  %v1002_v19 = vand.u32 4294901760, %v9050_v10  ;;  %v964_v51 = vand.u32 4294901760, %v963_v60  ;;  %v1013_v45 = vsub.f32 %v9057_v30, %v1012_v22 }
  0xc8   :  { %v357_v53 = vsel %vm184_vm7, %v147_v46, 0  ;;  %v9081_v48 = vand.u32 4294901760, %v351_v54  ;;  %12525 = vst [vmem:[#allocation123_spill] sm:$0xff] %v9088_v28  ;;  %v984_v46 = vand.u32 4294901760, %v983_v4  ;;  %v360_v60 = vsel %vm184_vm7, %v148_v57, 0 }
  0xc9   :  { %v9090_v32 = vand.u32 4294901760, %v357_v53  ;;  %v151_v4 = vmul.f32 %v8780_v55, %v8780_v55  ;;  %v1014_v30 = vand.u32 4294901760, %v1013_v45 }
  0xca   :  { %7144 = vmatmul.mubr.f32.gmra.mrb[44].mxu1 %v944_v24  ;;  %7519 = vmatmul.mubr.f32.gmra.mrb[46].mxu0 %v962_v62  ;;  %v149_v62 = vmul.f32 %v8757_v6, %v8757_v6  ;;  %v9079_v24 = vsub.f32 %v345_v61, %v9062_v23  ;;  %v994_v61 = vand.u32 4294901760, %v993_v21  ;;  %v1003_v23 = vsub.f32 %v9050_v10, %v1002_v19 }
  0xcb   :  { %7146 = vmatprep.mubr.f32.mxu1 %v954_v13  ;;  %7521 = vmatprep.mubr.f32.mxu0 %v972_v15  ;;  %v974_v13 = vand.u32 4294901760, %v973_v47  ;;  %v9086_v15 = vsub.f32 %v348_v59, %v9065_v3  ;;  %v9098_v3 = vsub.f32 %v351_v54, %v9081_v48  ;;  %v9107_v21 = vand.u32 4294901760, %v360_v60 }
  0xcc   :  { %12523 = vst [vmem:[#allocation121_spill] sm:$0xff] %v9079_v24  ;;  %v363_v47 = vsel %vm184_vm7, %v149_v62, 0  ;;  %v1022_v59 = vand.u32 4294901760, %v9079_v24  ;;  %v152_v62 = vmul.f32 %v8790_v31, %v8790_v31  ;;  %v9112_v54 = vsub.f32 %v357_v53, %v9090_v32 }
  0xcd   :  { %12524 = vst [vmem:[#allocation122_spill] sm:$0xff] %v9086_v15  ;;  %12526 = vst [vmem:[#allocation124_spill] sm:$0xff] %v9098_v3  ;;  %v1032_v57 = vand.u32 4294901760, %v9086_v15 }
  0xce   :  { %7147 = vmatmul.mubr.f32.gmra.mrb[46].mxu1 %v964_v51  ;;  %7522 = vmatmul.mubr.f32.gmra.mrb[48].mxu0 %v982_v25  ;;  %v366_v25 = vsel %vm184_vm7, %v150_v63, 0  ;;  %12528 = vst [vmem:[#allocation126_spill] sm:$0xff] %v9112_v54  ;;  %v9114_v51 = vand.u32 4294901760, %v363_v47  ;;  %v1004_v63 = vand.u32 4294901760, %v1003_v23  ;;  %v1023_v10 = vsub.f32 %v9079_v24, %v1022_v59 }
  0xcf   :  { %7149 = vmatprep.mubr.f32.mxu1 %v974_v13  ;;  %7524 = vmatprep.mubr.f32.mxu0 %v992_v52  ;;  %v9105_v52 = vsub.f32 %v354_v17, %v9088_v28  ;;  %v9116_v13 = vand.u32 4294901760, %v366_v25  ;;  %v153_v17 = vmul.f32 %v8818_v49, %v8818_v49  ;;  %v1042_v28 = vand.u32 4294901760, %v9098_v3 }
  0xd0   :  { %12529 = vst [vmem:[#allocation127_spill] sm:$0xff] %v9114_v51  ;;  %v1033_v53 = vsub.f32 %v9086_v15, %v1032_v57  ;;  %v1062_v23 = vand.u32 4294901760, %v9112_v54  ;;  %v9131_v45 = vsub.f32 %v363_v47, %v9114_v51  ;;  %v154_v24 = vmul.f32 %v8651_v9, %v8457_v33 }
  0xd1   :  { %12527 = vst [vmem:[#allocation125_spill] sm:$0xff] %v9105_v52 }
  0xd2   :  { %7150 = vmatmul.mubr.f32.gmra.mrb[48].mxu1 %v984_v46  ;;  %7525 = vmatmul.mubr.f32.gmra.mrb[50].mxu0 %v1002_v19  ;;  %v369_v19 = vsel %vm184_vm7, %v151_v4, 0  ;;  %v1052_v46 = vand.u32 4294901760, %v9105_v52  ;;  %12531 = vst [vmem:[#allocation129_spill] sm:$0xff] %v9131_v45  ;;  %v9136_v4 = vsub.f32 %v366_v25, %v9116_v13  ;;  %v1034_v51 = vand.u32 4294901760, %v1033_v53 }
  0xd3   :  { %7152 = vmatprep.mubr.f32.mxu1 %v994_v61  ;;  %7527 = vmatprep.mubr.f32.mxu0 %v1012_v22  ;;  %v9126_v61 = vsub.f32 %v360_v60, %v9107_v21  ;;  %v372_v22 = vsel %vm184_vm7, %v152_v62, 0  ;;  %v9138_v15 = vand.u32 4294901760, %v369_v19  ;;  %v375_v60 = vsel %vm184_vm7, %v153_v17, 0 }
  0xd4   :  { %12532 = vst [vmem:[#allocation130_spill] sm:$0xff] %v9136_v4  ;;  %v1024_v62 = vand.u32 4294901760, %v1023_v10  ;;  %v9144_v47 = vand.u32 4294901760, %v372_v22  ;;  %v1053_v33 = vsub.f32 %v9105_v52, %v1052_v46  ;;  %v9149_v25 = vand.u32 4294901760, %v375_v60  ;;  %v12596_v52 = vld [vmem:[#allocation89_spill] sm:$0xff] }
  0xd5   :  { %12530 = vst [vmem:[#allocation128_spill] sm:$0xff] %v9126_v61  ;;  %v1072_v9 = vand.u32 4294901760, %v9126_v61  ;;  %v1092_v10 = vand.u32 4294901760, %v9136_v4  ;;  %v9157_v17 = vsub.f32 %v369_v19, %v9138_v15 }
  0xd6   :  { %7153 = vmatmul.mubr.f32.gmra.mrb[50].mxu1 %v1004_v63  ;;  %7528 = vmatmul.mubr.f32.gmra.mrb[52].mxu0 %v1022_v59  ;;  %v155_v59 = vmul.f32 %v8654_v56, %v8460_v34  ;;  %v1043_v63 = vsub.f32 %v9098_v3, %v1042_v28  ;;  %v156_v34 = vmul.f32 %v8657_v5, %v8463_v35  ;;  %v1082_v56 = vand.u32 4294901760, %v9131_v45  ;;  %v12597_v3 = vld [vmem:[#allocation92_spill] sm:$0xff] }
  0xd7   :  { %7155 = vmatprep.mubr.f32.mxu1 %v1014_v30  ;;  %7530 = vmatprep.mubr.f32.mxu0 %v1032_v57  ;;  %v1063_v30 = vsub.f32 %v9112_v54, %v1062_v23  ;;  %v378_v57 = vsel %vm184_vm7, %v154_v24, 0  ;;  %12533 = vst [vmem:[#allocation131_spill] sm:$0xff] %v9157_v17  ;;  %v157_v24 = vmul.f32 %v8667_v2, %v8466_v36  ;;  %v1054_v54 = vand.u32 4294901760, %v1053_v33 }
  0xd8   :  { %v1044_v53 = vand.u32 4294901760, %v1043_v63  ;;  %v1073_v35 = vsub.f32 %v9126_v61, %v1072_v9  ;;  %v9166_v5 = vand.u32 4294901760, %v378_v57  ;;  %v9171_v19 = vsub.f32 %v375_v60, %v9149_v25  ;;  %v12595_v61 = vld [vmem:[#allocation87_spill] sm:$0xff] }
  0xd9   :  { %v1064_v36 = vand.u32 4294901760, %v1063_v30  ;;  %v1083_v2 = vsub.f32 %v9131_v45, %v1082_v56  ;;  %v1093_v63 = vsub.f32 %v9136_v4, %v1092_v10  ;;  %v160_v60 = vmul.f32 %v8700_v42, %v8475_v39  ;;  %v12593_v4 = vld [vmem:[#allocation84_spill] sm:$0xff]  ;;  %v12594_v45 = vld [vmem:[#allocation86_spill] sm:$0xff] }
  0xda   :  { %7156 = vmatmul.mubr.f32.gmra.mrb[52].mxu1 %v1024_v62  ;;  %7531 = vmatmul.mubr.f32.gmra.mrb[54].mxu0 %v1042_v28  ;;  %v381_v28 = vsel %vm184_vm7, %v155_v59, 0  ;;  %v9161_v62 = vsub.f32 %v372_v22, %v9144_v47  ;;  %12535 = vst [vmem:[#allocation133_spill] sm:$0xff] %v9171_v19  ;;  %v384_v22 = vsel %vm184_vm7, %v156_v34, 0  ;;  %v1102_v59 = vand.u32 4294901760, %v9157_v17 }
  0xdb   :  { %7158 = vmatprep.mubr.f32.mxu1 %v1034_v51  ;;  %7533 = vmatprep.mubr.f32.mxu0 %v1052_v46  ;;  %v158_v51 = vmul.f32 %v8680_v27, %v8469_v37  ;;  %v9173_v46 = vand.u32 4294901760, %v381_v28  ;;  %v387_v27 = vsel %vm184_vm7, %v157_v24, 0  ;;  %v1074_v33 = vand.u32 4294901760, %v1073_v35 }
  0xdc   :  { %12534 = vst [vmem:[#allocation132_spill] sm:$0xff] %v9161_v62  ;;  %v1112_v37 = vand.u32 4294901760, %v9161_v62  ;;  %v1122_v34 = vand.u32 4294901760, %v9171_v19  ;;  %v1103_v39 = vsub.f32 %v9157_v17, %v1102_v59  ;;  %v9196_v42 = vand.u32 4294901760, %v387_v27  ;;  %v12592_v17 = vld [vmem:[#allocation83_spill] sm:$0xff] }
  0xdd   :  { %v390_v30 = vsel %vm184_vm7, %v158_v51, 0 }
  0xde   :  { %7159 = vmatmul.mubr.f32.gmra.mrb[54].mxu1 %v1044_v53  ;;  %7534 = vmatmul.mubr.f32.gmra.mrb[56].mxu0 %v1062_v23  ;;  %v159_v23 = vmul.f32 %v8689_v8, %v8472_v38  ;;  %v9193_v53 = vsub.f32 %v381_v28, %v9173_v46  ;;  %v1084_v38 = vand.u32 4294901760, %v1083_v2  ;;  %v1094_v8 = vand.u32 4294901760, %v1093_v63 }
  0xdf   :  { %7161 = vmatprep.mubr.f32.mxu1 %v1054_v54  ;;  %7536 = vmatprep.mubr.f32.mxu0 %v1072_v9  ;;  %v9186_v54 = vsub.f32 %v378_v57, %v9166_v5  ;;  %v9188_v9 = vand.u32 4294901760, %v384_v22  ;;  %v1113_v57 = vsub.f32 %v9161_v62, %v1112_v37  ;;  %v9199_v24 = vand.u32 4294901760, %v390_v30  ;;  %v12591_v62 = vld [vmem:[#allocation78_spill] sm:$0xff] }
  0xe0   :  { %12537 = vst [vmem:[#allocation135_spill] sm:$0xff] %v9193_v53  ;;  %v393_v35 = vsel %vm184_vm7, %v159_v23, 0  ;;  %v1123_v2 = vsub.f32 %v9171_v19, %v1122_v34  ;;  %v1142_v63 = vand.u32 4294901760, %v9193_v53  ;;  %v9214_v23 = vsub.f32 %v387_v27, %v9196_v42  ;;  %v12590_v19 = vld [vmem:[#allocation77_spill] sm:$0xff] }
  0xe1   :  { %12536 = vst [vmem:[#allocation134_spill] sm:$0xff] %v9186_v54  ;;  %v1132_v51 = vand.u32 4294901760, %v9186_v54  ;;  %v9205_v28 = vsub.f32 %v384_v22, %v9188_v9 }
  0xe2   :  { %7162 = vmatmul.mubr.f32.gmra.mrb[56].mxu1 %v1064_v36  ;;  %7537 = vmatmul.mubr.f32.gmra.mrb[58].mxu0 %v1082_v56  ;;  %v396_v56 = vsel %vm184_vm7, %v160_v60, 0  ;;  %v162_v36 = vmul.f32 %v8740_v16, %v8558_v40  ;;  %12539 = vst [vmem:[#allocation137_spill] sm:$0xff] %v9214_v23  ;;  %v9216_v60 = vand.u32 4294901760, %v393_v35  ;;  %v163_v40 = vmul.f32 %v8743_v1, %v8561_v20 }
  0xe3   :  { %7164 = vmatprep.mubr.f32.mxu1 %v1074_v33  ;;  %7539 = vmatprep.mubr.f32.mxu0 %v1092_v10  ;;  %12538 = vst [vmem:[#allocation136_spill] sm:$0xff] %v9205_v28  ;;  %v161_v10 = vmul.f32 %v8720_v14, %v8484_v43  ;;  %v9218_v22 = vand.u32 4294901760, %v396_v56  ;;  %v1104_v33 = vand.u32 4294901760, %v1103_v39  ;;  %v1114_v43 = vand.u32 4294901760, %v1113_v57 }
  0xe4   :  { %v9221_v14 = vsub.f32 %v390_v30, %v9199_v24  ;;  %v1133_v16 = vsub.f32 %v9186_v54, %v1132_v51  ;;  %v402_v27 = vsel %vm184_vm7, %v162_v36, 0  ;;  %v164_v30 = vmul.f32 %v8746_v26, %v8564_v41  ;;  %v12589_v54 = vld [vmem:[#allocation76_spill] sm:$0xff] }
  0xe5   :  { %v1162_v20 = vand.u32 4294901760, %v9214_v23  ;;  %v9234_v1 = vsub.f32 %v393_v35, %v9216_v60  ;;  %v9237_v39 = vsub.f32 %v396_v56, %v9218_v22  ;;  %v9241_v57 = vpack.c.bf16 %v8430_v12, %v8428_v11 }
  0xe6   :  { %7165 = vmatmul.mubr.f32.gmra.mrb[58].mxu1 %v1084_v38  ;;  %7540 = vmatmul.mubr.f32.gmra.mrb[60].mxu0 %v1102_v59  ;;  %12540 = vst [vmem:[#allocation138_spill] sm:$0xff] %v9221_v14  ;;  %v1152_v59 = vand.u32 4294901760, %v9205_v28  ;;  %v1124_v38 = vand.u32 4294901760, %v1123_v2  ;;  %v9246_v36 = vand.u32 4294901760, %v402_v27  ;;  %v405_v41 = vsel %vm184_vm7, %v163_v40, 0 }
  0xe7   :  { %7167 = vmatprep.mubr.f32.mxu1 %v1094_v8  ;;  %7542 = vmatprep.mubr.f32.mxu0 %v1112_v37  ;;  %v399_v37 = vsel %vm184_vm7, %v161_v10, 0  ;;  %v1143_v8 = vsub.f32 %v9193_v53, %v1142_v63  ;;  %12541 = vst [vmem:[#allocation139_spill] sm:$0xff] %v9234_v1  ;;  %12542 = vst [vmem:[#allocation140_spill] sm:$0xff] %v9237_v39  ;;  %v1134_v26 = vand.u32 4294901760, %v1133_v16  ;;  %v408_v11 = vsel %vm184_vm7, %v164_v30, 0  ;;  %v12588_v53 = vld [vmem:[#allocation75_spill] sm:$0xff] }
  0xe8   :  { %v9244_v10 = vand.u32 4294901760, %v399_v37  ;;  %v165_v35 = vmul.f32 %v8757_v6, %v8567_v50  ;;  %7826 = vmatprep.subr.bf16.mxu1 %v9241_v57  ;;  %v166_v12 = vmul.f32 %v8771_v58, %v8577_v0  ;;  %v1163_v56 = vsub.f32 %v9214_v23, %v1162_v20  ;;  %v12586_v23 = vld [vmem:[#allocation70_spill] sm:$0xff] }
  0xe9   :  { %v1182_v2 = vand.u32 4294901760, %v9234_v1  ;;  %v1144_v50 = vand.u32 4294901760, %v1143_v8  ;;  %v9266_v40 = vsub.f32 %v402_v27, %v9246_v36  ;;  %v9268_v0 = vand.u32 4294901760, %v408_v11 }
  0xea   :  { %7168 = vmatmul.mubr.f32.gmra.mrb[60].mxu1 %v1104_v33  ;;  %7543 = vmatmul.mubr.f32.gmra.mrb[62].mxu0 %v1122_v34  ;;  %v1172_v34 = vand.u32 4294901760, %v9221_v14  ;;  %v1192_v33 = vand.u32 4294901760, %v9237_v39  ;;  %v411_v16 = vsel %vm184_vm7, %v165_v35, 0  ;;  %v168_v8 = vmul.f32 %v8790_v31, %v8594_v7 }
  0xeb   :  { %7170 = vmatprep.mubr.f32.mxu1 %v1114_v43  ;;  %7545 = vmatprep.mubr.f32.mxu0 %v1132_v51  ;;  %v1153_v51 = vsub.f32 %v9205_v28, %v1152_v59  ;;  %v9259_v43 = vand.u32 4294901760, %v405_v41  ;;  %12544 = vst [vmem:[#allocation142_spill] sm:$0xff] %v9266_v40  ;;  %12545 = vst [vmem:[#allocation143_spill] sm:$0xff] %v9268_v0  ;;  %v1183_v27 = vsub.f32 %v9234_v1, %v1182_v2  ;;  %v12584_v1 = vld [vmem:[#allocation66_spill] sm:$0xff]  ;;  %v12587_v28 = vld [vmem:[#allocation71_spill] sm:$0xff] }
  0xec   :  { %v1173_v6 = vsub.f32 %v9221_v14, %v1172_v34  ;;  %v1193_v30 = vsub.f32 %v9237_v39, %v1192_v33  ;;  %v9286_v35 = vsub.f32 %v408_v11, %v9268_v0  ;;  %v12583_v39 = vld [vmem:[#allocation64_spill] sm:$0xff]  ;;  %v12585_v14 = vld [vmem:[#allocation67_spill] sm:$0xff] }
  0xed   :  { %v1154_v58 = vand.u32 4294901760, %v1153_v51 }
  0xee   :  { %7171 = vmatmul.mubr.f32.gmra.mrb[62].mxu1 %v1124_v38  ;;  %7546 = vmatmul.mubr.f32.gmra.mrb[64].mxu0 %v1142_v63  ;;  %v9263_v63 = vsub.f32 %v399_v37, %v9244_v10  ;;  %v414_v38 = vsel %vm184_vm7, %v166_v12, 0  ;;  %v1164_v37 = vand.u32 4294901760, %v1163_v56  ;;  %v1174_v51 = vand.u32 4294901760, %v1173_v6  ;;  %12548 = vst [vmem:[#allocation146_spill] sm:$0xff] %v9286_v35 }
  0xef   :  { %7173 = vmatprep.mubr.f32.mxu1 %v1134_v26  ;;  %7548 = vmatprep.mubr.f32.mxu0 %v1152_v59  ;;  %v167_v59 = vmul.f32 %v8780_v55, %v8591_v18  ;;  %v9279_v26 = vsub.f32 %v405_v41, %v9259_v43  ;;  %v1212_v18 = vand.u32 4294901760, %v9266_v40  ;;  %v9288_v7 = vand.u32 4294901760, %v414_v38 }
  0xf0   :  { %12543 = vst [vmem:[#allocation141_spill] sm:$0xff] %v9263_v63  ;;  %v1202_v55 = vand.u32 4294901760, %v9263_v63  ;;  %v420_v41 = vsel %vm184_vm7, %v168_v8, 0  ;;  %v1184_v12 = vand.u32 4294901760, %v1183_v27  ;;  %v1194_v56 = vand.u32 4294901760, %v1193_v30 }
  0xf1   :  { %12546 = vst [vmem:[#allocation144_spill] sm:$0xff] %v9279_v26  ;;  %12549 = vst [vmem:[#allocation147_spill] sm:$0xff] %v9288_v7  ;;  %v417_v31 = vsel %vm184_vm7, %v167_v59, 0  ;;  %v1213_v6 = vsub.f32 %v9266_v40, %v1212_v18 }
  0xf2   :  { %7174 = vmatmul.mubr.f32.gmra.mrb[64].mxu1 %v1144_v50  ;;  %7549 = vmatmul.mubr.f32.gmra.mrb[66].mxu0 %v1162_v20  ;;  %v9283_v20 = vand.u32 4294901760, %v411_v16  ;;  %v1222_v50 = vand.u32 4294901760, %v9279_v26  ;;  %v1203_v11 = vsub.f32 %v9263_v63, %v1202_v55  ;;  %v9300_v59 = vand.u32 4294901760, %v417_v31  ;;  %v12582_v63 = vld [vmem:[#allocation61_spill] sm:$0xff] }
  0xf3   :  { %7176 = vmatprep.mubr.f32.mxu1 %v1154_v58  ;;  %7551 = vmatprep.mubr.f32.mxu0 %v1172_v34  ;;  %v169_v34 = vmul.f32 %v8818_v49, %v8614_v29  ;;  %v1232_v29 = vand.u32 4294901760, %v9286_v35  ;;  %v9304_v49 = vsub.f32 %v414_v38, %v9288_v7  ;;  %v1214_v38 = vand.u32 4294901760, %v1213_v6 }
  0xf4   :  { %12547 = vst [vmem:[#allocation145_spill] sm:$0xff] %v9283_v20  ;;  %v9298_v58 = vsub.f32 %v411_v16, %v9283_v20  ;;  %12551 = vst [vmem:[#allocation149_spill] sm:$0xff] %v9300_v59  ;;  %v1223_v8 = vsub.f32 %v9279_v26, %v1222_v50  ;;  %v9312_v27 = vsub.f32 %v417_v31, %v9300_v59  ;;  %v12581_v26 = vld [vmem:[#allocation60_spill] sm:$0xff] }
  0xf5   :  { %12552 = vst [vmem:[#allocation150_spill] sm:$0xff] %v9304_v49  ;;  %v1252_v40 = vand.u32 4294901760, %v9304_v49 }
  0xf6   :  { %7177 = vmatmul.mubr.f32.gmra.mrb[66].mxu1 %v1164_v37  ;;  %7552 = vmatmul.mubr.f32.gmra.mrb[68].mxu0 %v1182_v2  ;;  %12550 = vst [vmem:[#allocation148_spill] sm:$0xff] %v9298_v58  ;;  %v9306_v2 = vand.u32 4294901760, %v420_v41  ;;  %v1204_v37 = vand.u32 4294901760, %v1203_v11  ;;  %v1242_v16 = vand.u32 4294901760, %v9298_v58  ;;  %12553 = vst [vmem:[#allocation151_spill] sm:$0xff] %v9312_v27  ;;  %v1262_v31 = vand.u32 4294901760, %v9312_v27 }
  0xf7   :  { %7179 = vmatprep.mubr.f32.mxu1 %v1174_v51  ;;  %7554 = vmatprep.mubr.f32.mxu0 %v1192_v33  ;;  %v423_v33 = vsel %vm184_vm7, %v169_v34, 0  ;;  %v1233_v51 = vsub.f32 %v9286_v35, %v1232_v29  ;;  %v1253_v11 = vsub.f32 %v9304_v49, %v1252_v40  ;;  %v12578_v49 = vld [vmem:[#allocation54_spill] sm:$0xff]  ;;  %v12580_v35 = vld [vmem:[#allocation59_spill] sm:$0xff] }
  0xf8   :  { %v9314_v30 = vand.u32 4294901760, %v423_v33  ;;  %v9319_v34 = vsub.f32 %v420_v41, %v9306_v2 }
  0xfa   :  { %7180 = vmatmul.mubr.f32.gmra.mrb[68].mxu1 %v1184_v12  ;;  %7555 = vmatmul.mubr.f32.gmra.mrb[70].mxu0 %v1202_v55  ;;  %12554 = vst [vmem:[#allocation152_spill] sm:$0xff] %v9319_v34  ;;  %v1224_v55 = vand.u32 4294901760, %v1223_v8  ;;  %v9324_v12 = vsub.f32 %v423_v33, %v9314_v30  ;;  %v1272_v6 = vand.u32 4294901760, %v9319_v34  ;;  %v1254_v8 = vand.u32 4294901760, %v1253_v11  ;;  %v12561_v11 = vld [vmem:[#allocation20_spill] sm:$0xff] }
  0xfb   :  { %7182 = vmatprep.mubr.f32.mxu1 %v1194_v56  ;;  %7557 = vmatprep.mubr.f32.mxu0 %v1212_v18  ;;  %v1243_v18 = vsub.f32 %v9298_v58, %v1242_v16  ;;  %v1234_v56 = vand.u32 4294901760, %v1233_v51  ;;  %v12579_v58 = vld [vmem:[#allocation55_spill] sm:$0xff] }
  0xfc   :  { %12555 = vst [vmem:[#allocation153_spill] sm:$0xff] %v9324_v12 }
  0xfd   :  { %v1244_v41 = vand.u32 4294901760, %v1243_v18  ;;  %v12558_v18 = vmov 1.0|1.0  }
  0xfe   :  { %7183 = vmatmul.mubr.f32.gmra.mrb[70].mxu1 %v1204_v37  ;;  %7558 = vmatmul.mubr.f32.gmra.mrb[72].mxu0 %v1222_v50  ;;  %v1263_v50 = vsub.f32 %v9312_v27, %v1262_v31  ;;  %v1273_v37 = vsub.f32 %v9319_v34, %v1272_v6  ;;  %v12576_v34 = vld [vmem:[#allocation49_spill] sm:$0xff] }
  0xff   :  { %7185 = vmatprep.mubr.f32.mxu1 %v1214_v38  ;;  %7560 = vmatprep.mubr.f32.mxu0 %v1232_v29  ;;  %v1282_v29 = vand.u32 4294901760, %v9324_v12  ;;  %v12577_v27 = vld [vmem:[#allocation53_spill] sm:$0xff] }
 0x100   :  { %v1264_v33 = vand.u32 4294901760, %v1263_v50  ;;  %v1274_v51 = vand.u32 4294901760, %v1273_v37  ;;  %v12564_v50 = vld [vmem:[#allocation27_spill] sm:$0xff] }
 0x101   :  { %v1283_v38 = vsub.f32 %v9324_v12, %v1282_v29  ;;  %v12568_v37 = vld [vmem:[#allocation35_spill] sm:$0xff] }
 0x102   :  { %7186 = vmatmul.mubr.f32.gmra.mrb[72].mxu1 %v1224_v55  ;;  %7561 = vmatmul.mubr.f32.gmra.mrb[74].mxu0 %v1242_v16  ;;  %v12556_v16 = vld [vmem:[#allocation14_spill] sm:$0xff]  ;;  %v12557_v55 = vld [vmem:[#allocation15_spill] sm:$0xff] }
 0x103   :  { %7188 = vmatprep.mubr.f32.mxu1 %v1234_v56  ;;  %7563 = vmatprep.mubr.f32.mxu0 %v1252_v40  ;;  %v1284_v40 = vand.u32 4294901760, %v1283_v38  ;;  %v12560_v56 = vld [vmem:[#allocation16_spill] sm:$0xff]  ;;  %v12570_v38 = vld [vmem:[#allocation39_spill] sm:$0xff] }
 0x104   :  { %v12575_v12 = vld [vmem:[#allocation47_spill] sm:$0xff] }
 0x106   :  { %7189 = vmatmul.mubr.f32.gmra.mrb[74].mxu1 %v1244_v41  ;;  %7564 = vmatmul.mubr.f32.gmra.mrb[76].mxu0 %v1262_v31  ;;  %v12563_v41 = vld [vmem:[#allocation23_spill] sm:$0xff]  ;;  %v12574_v31 = vld [vmem:[#allocation46_spill] sm:$0xff] }
 0x107   :  { %7191 = vmatprep.mubr.f32.mxu1 %v1254_v8  ;;  %7566 = vmatprep.mubr.f32.mxu0 %v1272_v6  ;;  %v12562_v6 = vld [vmem:[#allocation22_spill] sm:$0xff]  ;;  %v12567_v8 = vld [vmem:[#allocation31_spill] sm:$0xff] }
 0x10a   :  { %7192 = vmatmul.mubr.f32.gmra.mrb[76].mxu1 %v1264_v33  ;;  %7567 = vmatmul.mubr.f32.gmra.mrb[78].mxu0 %v1282_v29  ;;  %v12565_v29 = vld [vmem:[#allocation29_spill] sm:$0xff]  ;;  %v12569_v33 = vld [vmem:[#allocation36_spill] sm:$0xff] }
 0x10b   :  { %7194 = vmatprep.mubr.f32.mxu1 %v1274_v51  ;;  %7573 = vmatprep.mubr.f32.mxu0 %v8486_v44  ;;  %v12571_v51 = vld [vmem:[#allocation40_spill] sm:$0xff] }
 0x10e   :  { %7195 = vmatmul.mubr.f32.gmra.mrb[78].mxu1 %v1284_v40  ;;  %7574 = vmatmul.mubr.f32.vlgmr.msra.gmra.mrb[0].mxu0 %v12556_v16  ;;  %v12572_v40 = vld [vmem:[#allocation43_spill] sm:$0xff] }
 0x10f   :  { %7201 = vmatprep.mubr.f32.mxu1 %v8486_v44  ;;  %7576 = vmatprep.mubr.f32.mxu0 %v12557_v55 }
 0x110   :  { %7840 = vmatpush3.bf16.msk.msra.mxu0 %vm8424_vm6, %v12558_v18  ;;  %v12573_v18 = vld [vmem:[#allocation45_spill] sm:$0xff] }
 0x112   :  { %7202 = vmatmul.mubr.f32.vlgmr.msra.gmra.mrb[0].mxu1 %v12556_v16  ;;  %7577 = vmatmul.mubr.f32.gmra.mrb[2].mxu0 %v12560_v56 }
 0x113   :  { %7828 = vmatpush3.bf16.msra.mxu1 %v9241_v57  ;;  %7204 = vmatprep.mubr.f32.mxu1 %v12557_v55  ;;  %v12566_v57 = vld [vmem:[#allocation30_spill] sm:$0xff] }
 0x114   :  { %7579 = vmatprep.mubr.f32.mxu0 %v12561_v11 }
 0x116   :  { %7205 = vmatmul.mubr.f32.gmra.mrb[2].mxu1 %v12560_v56  ;;  %7580 = vmatmul.mubr.f32.gmra.mrb[4].mxu0 %v12562_v6 }
 0x117   :  { %7207 = vmatprep.mubr.f32.mxu1 %v12561_v11  ;;  %7582 = vmatprep.mubr.f32.mxu0 %v12563_v41 }
 0x11a   :  { %7208 = vmatmul.mubr.f32.gmra.mrb[4].mxu1 %v12562_v6  ;;  %7583 = vmatmul.mubr.f32.gmra.mrb[6].mxu0 %v12564_v50 }
 0x11b   :  { %7210 = vmatprep.mubr.f32.mxu1 %v12563_v41  ;;  %7585 = vmatprep.mubr.f32.mxu0 %v12565_v29 }
 0x11e   :  { %7211 = vmatmul.mubr.f32.gmra.mrb[6].mxu1 %v12564_v50  ;;  %7586 = vmatmul.mubr.f32.gmra.mrb[8].mxu0 %v12566_v57 }
 0x11f   :  { %7213 = vmatprep.mubr.f32.mxu1 %v12565_v29  ;;  %7588 = vmatprep.mubr.f32.mxu0 %v12567_v8 }
 0x122   :  { %7214 = vmatmul.mubr.f32.gmra.mrb[8].mxu1 %v12566_v57  ;;  %7589 = vmatmul.mubr.f32.gmra.mrb[10].mxu0 %v12568_v37 }
 0x123   :  { %7216 = vmatprep.mubr.f32.mxu1 %v12567_v8  ;;  %7591 = vmatprep.mubr.f32.mxu0 %v12569_v33 }
 0x126   :  { %7217 = vmatmul.mubr.f32.gmra.mrb[10].mxu1 %v12568_v37  ;;  %7592 = vmatmul.mubr.f32.gmra.mrb[12].mxu0 %v12570_v38 }
 0x127   :  { %7219 = vmatprep.mubr.f32.mxu1 %v12569_v33  ;;  %7594 = vmatprep.mubr.f32.mxu0 %v12571_v51 }
 0x12a   :  { %7220 = vmatmul.mubr.f32.gmra.mrb[12].mxu1 %v12570_v38  ;;  %7595 = vmatmul.mubr.f32.gmra.mrb[14].mxu0 %v12572_v40 }
 0x12b   :  { %7222 = vmatprep.mubr.f32.mxu1 %v12571_v51  ;;  %7597 = vmatprep.mubr.f32.mxu0 %v12573_v18 }
 0x12e   :  { %7223 = vmatmul.mubr.f32.gmra.mrb[14].mxu1 %v12572_v40  ;;  %7598 = vmatmul.mubr.f32.gmra.mrb[16].mxu0 %v12574_v31 }
 0x12f   :  { %7225 = vmatprep.mubr.f32.mxu1 %v12573_v18  ;;  %7600 = vmatprep.mubr.f32.mxu0 %v12575_v12 }
 0x132   :  { %7226 = vmatmul.mubr.f32.gmra.mrb[16].mxu1 %v12574_v31  ;;  %7601 = vmatmul.mubr.f32.gmra.mrb[18].mxu0 %v12576_v34 }
 0x133   :  { %7228 = vmatprep.mubr.f32.mxu1 %v12575_v12  ;;  %7603 = vmatprep.mubr.f32.mxu0 %v12577_v27 }
 0x136   :  { %7229 = vmatmul.mubr.f32.gmra.mrb[18].mxu1 %v12576_v34  ;;  %7604 = vmatmul.mubr.f32.gmra.mrb[20].mxu0 %v12578_v49 }
 0x137   :  { %7231 = vmatprep.mubr.f32.mxu1 %v12577_v27  ;;  %7606 = vmatprep.mubr.f32.mxu0 %v12579_v58 }
 0x13a   :  { %7232 = vmatmul.mubr.f32.gmra.mrb[20].mxu1 %v12578_v49  ;;  %7607 = vmatmul.mubr.f32.gmra.mrb[22].mxu0 %v12580_v35 }
 0x13b   :  { %7234 = vmatprep.mubr.f32.mxu1 %v12579_v58  ;;  %7609 = vmatprep.mubr.f32.mxu0 %v12581_v26 }
 0x13e   :  { %7235 = vmatmul.mubr.f32.gmra.mrb[22].mxu1 %v12580_v35  ;;  %7610 = vmatmul.mubr.f32.gmra.mrb[24].mxu0 %v12582_v63 }
 0x13f   :  { %7237 = vmatprep.mubr.f32.mxu1 %v12581_v26  ;;  %7612 = vmatprep.mubr.f32.mxu0 %v12583_v39 }
 0x142   :  { %7238 = vmatmul.mubr.f32.gmra.mrb[24].mxu1 %v12582_v63  ;;  %7613 = vmatmul.mubr.f32.gmra.mrb[26].mxu0 %v12584_v1 }
 0x143   :  { %7240 = vmatprep.mubr.f32.mxu1 %v12583_v39  ;;  %7615 = vmatprep.mubr.f32.mxu0 %v12585_v14 }
 0x146   :  { %7241 = vmatmul.mubr.f32.gmra.mrb[26].mxu1 %v12584_v1  ;;  %7616 = vmatmul.mubr.f32.gmra.mrb[28].mxu0 %v12586_v23 }
 0x147   :  { %7243 = vmatprep.mubr.f32.mxu1 %v12585_v14  ;;  %7618 = vmatprep.mubr.f32.mxu0 %v12587_v28 }
 0x14a   :  { %7244 = vmatmul.mubr.f32.gmra.mrb[28].mxu1 %v12586_v23  ;;  %7619 = vmatmul.mubr.f32.gmra.mrb[30].mxu0 %v12588_v53 }
 0x14b   :  { %7246 = vmatprep.mubr.f32.mxu1 %v12587_v28  ;;  %7621 = vmatprep.mubr.f32.mxu0 %v12589_v54 }
 0x14e   :  { %7247 = vmatmul.mubr.f32.gmra.mrb[30].mxu1 %v12588_v53  ;;  %7622 = vmatmul.mubr.f32.gmra.mrb[32].mxu0 %v12590_v19 }
 0x14f   :  { %7249 = vmatprep.mubr.f32.mxu1 %v12589_v54  ;;  %7624 = vmatprep.mubr.f32.mxu0 %v12591_v62 }
 0x152   :  { %7250 = vmatmul.mubr.f32.gmra.mrb[32].mxu1 %v12590_v19  ;;  %7625 = vmatmul.mubr.f32.gmra.mrb[34].mxu0 %v12592_v17 }
 0x153   :  { %7252 = vmatprep.mubr.f32.mxu1 %v12591_v62  ;;  %7627 = vmatprep.mubr.f32.mxu0 %v12593_v4  ;;  %v12598_v62 = vld [vmem:[#allocation94_spill] sm:$0xff] }
 0x156   :  { %7253 = vmatmul.mubr.f32.gmra.mrb[34].mxu1 %v12592_v17  ;;  %7628 = vmatmul.mubr.f32.gmra.mrb[36].mxu0 %v12594_v45  ;;  %v12599_v17 = vld [vmem:[#allocation96_spill] sm:$0xff] }
 0x157   :  { %7255 = vmatprep.mubr.f32.mxu1 %v12593_v4  ;;  %7630 = vmatprep.mubr.f32.mxu0 %v12595_v61  ;;  %v12600_v4 = vld [vmem:[#allocation98_spill] sm:$0xff] }
 0x15a   :  { %7256 = vmatmul.mubr.f32.gmra.mrb[36].mxu1 %v12594_v45  ;;  %7631 = vmatmul.mubr.f32.gmra.mrb[38].mxu0 %v12596_v52  ;;  %v12601_v45 = vld [vmem:[#allocation99_spill] sm:$0xff] }
 0x15b   :  { %7258 = vmatprep.mubr.f32.mxu1 %v12595_v61  ;;  %7633 = vmatprep.mubr.f32.mxu0 %v12597_v3  ;;  %v12602_v61 = vld [vmem:[#allocation102_spill] sm:$0xff] }
 0x15e   :  { %7259 = vmatmul.mubr.f32.gmra.mrb[38].mxu1 %v12596_v52  ;;  %7634 = vmatmul.mubr.f32.gmra.mrb[40].mxu0 %v12598_v62  ;;  %v12603_v52 = vld [vmem:[#allocation104_spill] sm:$0xff] }
 0x15f   :  { %7261 = vmatprep.mubr.f32.mxu1 %v12597_v3  ;;  %7636 = vmatprep.mubr.f32.mxu0 %v12599_v17  ;;  %v12604_v3 = vld [vmem:[#allocation106_spill] sm:$0xff] }
 0x162   :  { %7262 = vmatmul.mubr.f32.gmra.mrb[40].mxu1 %v12598_v62  ;;  %7637 = vmatmul.mubr.f32.gmra.mrb[42].mxu0 %v12600_v4  ;;  %v12605_v62 = vld [vmem:[#allocation108_spill] sm:$0xff] }
 0x163   :  { %7264 = vmatprep.mubr.f32.mxu1 %v12599_v17  ;;  %7639 = vmatprep.mubr.f32.mxu0 %v12601_v45  ;;  %v12606_v17 = vld [vmem:[#allocation109_spill] sm:$0xff] }
 0x166   :  { %7265 = vmatmul.mubr.f32.gmra.mrb[42].mxu1 %v12600_v4  ;;  %7640 = vmatmul.mubr.f32.gmra.mrb[44].mxu0 %v12602_v61  ;;  %v12607_v4 = vld [vmem:[#allocation110_spill] sm:$0xff] }
 0x167   :  { %7267 = vmatprep.mubr.f32.mxu1 %v12601_v45  ;;  %7642 = vmatprep.mubr.f32.mxu0 %v12603_v52  ;;  %v12608_v45 = vld [vmem:[#allocation114_spill] sm:$0xff] }
 0x16a   :  { %7268 = vmatmul.mubr.f32.gmra.mrb[44].mxu1 %v12602_v61  ;;  %7643 = vmatmul.mubr.f32.gmra.mrb[46].mxu0 %v12604_v3  ;;  %v12609_v61 = vld [vmem:[#allocation116_spill] sm:$0xff] }
 0x16b   :  { %7270 = vmatprep.mubr.f32.mxu1 %v12603_v52  ;;  %7645 = vmatprep.mubr.f32.mxu0 %v12605_v62  ;;  %v12610_v52 = vld [vmem:[#allocation119_spill] sm:$0xff] }
 0x16e   :  { %7271 = vmatmul.mubr.f32.gmra.mrb[46].mxu1 %v12604_v3  ;;  %7646 = vmatmul.mubr.f32.gmra.mrb[48].mxu0 %v12606_v17  ;;  %v12611_v3 = vld [vmem:[#allocation120_spill] sm:$0xff] }
 0x16f   :  { %7273 = vmatprep.mubr.f32.mxu1 %v12605_v62  ;;  %7648 = vmatprep.mubr.f32.mxu0 %v12607_v4 }
 0x172   :  { %7274 = vmatmul.mubr.f32.gmra.mrb[48].mxu1 %v12606_v17  ;;  %7649 = vmatmul.mubr.f32.gmra.mrb[50].mxu0 %v12608_v45  ;;  %v12612_v17 = vld [vmem:[#allocation123_spill] sm:$0xff] }
 0x173   :  { %7276 = vmatprep.mubr.f32.mxu1 %v12607_v4  ;;  %7651 = vmatprep.mubr.f32.mxu0 %v12609_v61 }
 0x176   :  { %7277 = vmatmul.mubr.f32.gmra.mrb[50].mxu1 %v12608_v45  ;;  %7652 = vmatmul.mubr.f32.gmra.mrb[52].mxu0 %v12610_v52 }
 0x177   :  { %7279 = vmatprep.mubr.f32.mxu1 %v12609_v61  ;;  %7654 = vmatprep.mubr.f32.mxu0 %v12611_v3  ;;  %v12613_v61 = vld [vmem:[#allocation127_spill] sm:$0xff] }
 0x17a   :  { %7280 = vmatmul.mubr.f32.gmra.mrb[52].mxu1 %v12610_v52  ;;  %7655 = vmatmul.mubr.f32.gmra.mrb[54].mxu0 %v9081_v48 }
 0x17b   :  { %7282 = vmatprep.mubr.f32.mxu1 %v12611_v3  ;;  %7657 = vmatprep.mubr.f32.mxu0 %v12612_v17 }
 0x17e   :  { %7283 = vmatmul.mubr.f32.gmra.mrb[54].mxu1 %v9081_v48  ;;  %7658 = vmatmul.mubr.f32.gmra.mrb[56].mxu0 %v9090_v32 }
 0x17f   :  { %7285 = vmatprep.mubr.f32.mxu1 %v12612_v17  ;;  %7660 = vmatprep.mubr.f32.mxu0 %v9107_v21 }
 0x182   :  { %7286 = vmatmul.mubr.f32.gmra.mrb[56].mxu1 %v9090_v32  ;;  %7661 = vmatmul.mubr.f32.gmra.mrb[58].mxu0 %v12613_v61 }
 0x183   :  { %7288 = vmatprep.mubr.f32.mxu1 %v9107_v21  ;;  %7663 = vmatprep.mubr.f32.mxu0 %v9116_v13 }
 0x186   :  { %7289 = vmatmul.mubr.f32.gmra.mrb[58].mxu1 %v12613_v61  ;;  %7664 = vmatmul.mubr.f32.gmra.mrb[60].mxu0 %v9138_v15 }
 0x187   :  { %7291 = vmatprep.mubr.f32.mxu1 %v9116_v13  ;;  %7666 = vmatprep.mubr.f32.mxu0 %v9144_v47 }
 0x18a   :  { %7292 = vmatmul.mubr.f32.gmra.mrb[60].mxu1 %v9138_v15  ;;  %7667 = vmatmul.mubr.f32.gmra.mrb[62].mxu0 %v9149_v25 }
 0x18b   :  { %7294 = vmatprep.mubr.f32.mxu1 %v9144_v47  ;;  %7669 = vmatprep.mubr.f32.mxu0 %v9166_v5 }
 0x18e   :  { %7295 = vmatmul.mubr.f32.gmra.mrb[62].mxu1 %v9149_v25  ;;  %7670 = vmatmul.mubr.f32.gmra.mrb[64].mxu0 %v9173_v46 }
 0x18f   :  { %7297 = vmatprep.mubr.f32.mxu1 %v9166_v5  ;;  %7672 = vmatprep.mubr.f32.mxu0 %v9188_v9 }
 0x192   :  { %7298 = vmatmul.mubr.f32.gmra.mrb[64].mxu1 %v9173_v46  ;;  %7673 = vmatmul.mubr.f32.gmra.mrb[66].mxu0 %v9196_v42 }
 0x193   :  { %7300 = vmatprep.mubr.f32.mxu1 %v9188_v9  ;;  %7675 = vmatprep.mubr.f32.mxu0 %v9199_v24 }
 0x196   :  { %7301 = vmatmul.mubr.f32.gmra.mrb[66].mxu1 %v9196_v42  ;;  %7676 = vmatmul.mubr.f32.gmra.mrb[68].mxu0 %v9216_v60 }
 0x197   :  { %7303 = vmatprep.mubr.f32.mxu1 %v9199_v24  ;;  %7678 = vmatprep.mubr.f32.mxu0 %v9218_v22 }
 0x19a   :  { %7304 = vmatmul.mubr.f32.gmra.mrb[68].mxu1 %v9216_v60  ;;  %7679 = vmatmul.mubr.f32.gmra.mrb[70].mxu0 %v9244_v10 }
 0x19b   :  { %7306 = vmatprep.mubr.f32.mxu1 %v9218_v22  ;;  %7681 = vmatprep.mubr.f32.mxu0 %v9246_v36 }
 0x19e   :  { %7307 = vmatmul.mubr.f32.gmra.mrb[70].mxu1 %v9244_v10  ;;  %7682 = vmatmul.mubr.f32.gmra.mrb[72].mxu0 %v9259_v43 }
 0x19f   :  { %7309 = vmatprep.mubr.f32.mxu1 %v9246_v36  ;;  %7684 = vmatprep.mubr.f32.mxu0 %v9268_v0 }
 0x1a2   :  { %7310 = vmatmul.mubr.f32.gmra.mrb[72].mxu1 %v9259_v43  ;;  %7685 = vmatmul.mubr.f32.gmra.mrb[74].mxu0 %v9283_v20 }
 0x1a3   :  { %7312 = vmatprep.mubr.f32.mxu1 %v9268_v0  ;;  %7687 = vmatprep.mubr.f32.mxu0 %v9288_v7  ;;  %v12614_v0 = vld [vmem:[#allocation17_spill] sm:$0xff] }
 0x1a6   :  { %7313 = vmatmul.mubr.f32.gmra.mrb[74].mxu1 %v9283_v20  ;;  %7688 = vmatmul.mubr.f32.gmra.mrb[76].mxu0 %v9300_v59  ;;  %v12615_v20 = vld [vmem:[#allocation18_spill] sm:$0xff] }
 0x1a7   :  { %7315 = vmatprep.mubr.f32.mxu1 %v9288_v7  ;;  %7690 = vmatprep.mubr.f32.mxu0 %v9306_v2  ;;  %v12616_v7 = vld [vmem:[#allocation19_spill] sm:$0xff] }
 0x1aa   :  { %7316 = vmatmul.mubr.f32.gmra.mrb[76].mxu1 %v9300_v59  ;;  %7691 = vmatmul.mubr.f32.gmra.mrb[78].mxu0 %v9314_v30  ;;  %v12617_v59 = vld [vmem:[#allocation21_spill] sm:$0xff] }
 0x1ab   :  { %7318 = vmatprep.mubr.f32.mxu1 %v9306_v2  ;;  %7697 = vmatprep.mubr.f32.mxu0 %v8486_v44  ;;  %v12618_v44 = vld [vmem:[#allocation24_spill] sm:$0xff] }
 0x1ae   :  { %7319 = vmatmul.mubr.f32.gmra.mrb[78].mxu1 %v9314_v30  ;;  %7698 = vmatmul.mubr.f32.vlgmr.msra.gmra.mrb[0].mxu0 %v12556_v16  ;;  %v12619_v16 = vld [vmem:[#allocation25_spill] sm:$0xff] }
 0x1af   :  { %7325 = vmatprep.mubr.f32.mxu1 %v12614_v0  ;;  %7700 = vmatprep.mubr.f32.mxu0 %v12557_v55  ;;  %v12620_v0 = vld [vmem:[#allocation26_spill] sm:$0xff] }
 0x1b0   :  { %v12624_v55 = vld [vmem:[#allocation34_spill] sm:$0xff] }
 0x1b2   :  { %7326 = vmatmul.mubr.f32.vlgmr.msra.gmra.mrb[0].mxu1 %v12615_v20  ;;  %7701 = vmatmul.mubr.f32.gmra.mrb[2].mxu0 %v12560_v56  ;;  %v12621_v20 = vld [vmem:[#allocation28_spill] sm:$0xff]  ;;  %v12625_v56 = vld [vmem:[#allocation37_spill] sm:$0xff] }
 0x1b3   :  { %7328 = vmatprep.mubr.f32.mxu1 %v12616_v7  ;;  %7703 = vmatprep.mubr.f32.mxu0 %v12561_v11  ;;  %v12622_v7 = vld [vmem:[#allocation32_spill] sm:$0xff]  ;;  %v12626_v11 = vld [vmem:[#allocation38_spill] sm:$0xff] }
 0x1b6   :  { %7329 = vmatmul.mubr.f32.gmra.mrb[2].mxu1 %v12617_v59  ;;  %7704 = vmatmul.mubr.f32.gmra.mrb[4].mxu0 %v12562_v6  ;;  %v12623_v59 = vld [vmem:[#allocation33_spill] sm:$0xff] }
 0x1b7   :  { %7331 = vmatprep.mubr.f32.mxu1 %v12618_v44  ;;  %7706 = vmatprep.mubr.f32.mxu0 %v12563_v41  ;;  %v12627_v6 = vld [vmem:[#allocation41_spill] sm:$0xff]  ;;  %v12628_v41 = vld [vmem:[#allocation42_spill] sm:$0xff]  ;;  %v12655_v44 = vld [vmem:[#allocation87_spill] sm:$0xff] }
 0x1ba   :  { %7332 = vmatmul.mubr.f32.gmra.mrb[4].mxu1 %v12619_v16  ;;  %7707 = vmatmul.mubr.f32.gmra.mrb[6].mxu0 %v12564_v50  ;;  %v12629_v50 = vld [vmem:[#allocation44_spill] sm:$0xff]  ;;  %v12657_v16 = vld [vmem:[#allocation89_spill] sm:$0xff] }
 0x1bb   :  { %7334 = vmatprep.mubr.f32.mxu1 %v12620_v0  ;;  %7709 = vmatprep.mubr.f32.mxu0 %v12565_v29  ;;  %v12630_v29 = vld [vmem:[#allocation48_spill] sm:$0xff]  ;;  %v12658_v0 = vld [vmem:[#allocation91_spill] sm:$0xff] }
 0x1be   :  { %7335 = vmatmul.mubr.f32.gmra.mrb[6].mxu1 %v12621_v20  ;;  %7710 = vmatmul.mubr.f32.gmra.mrb[8].mxu0 %v12566_v57  ;;  %v12631_v57 = vld [vmem:[#allocation50_spill] sm:$0xff]  ;;  %v12659_v20 = vld [vmem:[#allocation92_spill] sm:$0xff] }
 0x1bf   :  { %7337 = vmatprep.mubr.f32.mxu1 %v12622_v7  ;;  %7712 = vmatprep.mubr.f32.mxu0 %v12567_v8  ;;  %v12632_v8 = vld [vmem:[#allocation51_spill] sm:$0xff]  ;;  %v12660_v7 = vld [vmem:[#allocation93_spill] sm:$0xff] }
 0x1c2   :  { %7338 = vmatmul.mubr.f32.gmra.mrb[8].mxu1 %v12623_v59  ;;  %7713 = vmatmul.mubr.f32.gmra.mrb[10].mxu0 %v12568_v37  ;;  %v12633_v37 = vld [vmem:[#allocation52_spill] sm:$0xff]  ;;  %v12661_v59 = vld [vmem:[#allocation94_spill] sm:$0xff] }
 0x1c3   :  { %7340 = vmatprep.mubr.f32.mxu1 %v12624_v55  ;;  %7715 = vmatprep.mubr.f32.mxu0 %v12569_v33  ;;  %v12634_v33 = vld [vmem:[#allocation56_spill] sm:$0xff]  ;;  %v12662_v55 = vld [vmem:[#allocation95_spill] sm:$0xff] }
 0x1c6   :  { %7341 = vmatmul.mubr.f32.gmra.mrb[10].mxu1 %v12625_v56  ;;  %7716 = vmatmul.mubr.f32.gmra.mrb[12].mxu0 %v12570_v38  ;;  %v12635_v38 = vld [vmem:[#allocation57_spill] sm:$0xff]  ;;  %v12663_v56 = vld [vmem:[#allocation96_spill] sm:$0xff] }
 0x1c7   :  { %7343 = vmatprep.mubr.f32.mxu1 %v12626_v11  ;;  %7718 = vmatprep.mubr.f32.mxu0 %v12571_v51  ;;  %v12647_v51 = vld [vmem:[#allocation78_spill] sm:$0xff]  ;;  %v12664_v11 = vld [vmem:[#allocation97_spill] sm:$0xff] }
 0x1ca   :  { %7344 = vmatmul.mubr.f32.gmra.mrb[12].mxu1 %v12627_v6  ;;  %7719 = vmatmul.mubr.f32.gmra.mrb[14].mxu0 %v12572_v40  ;;  %v12649_v40 = vld [vmem:[#allocation83_spill] sm:$0xff]  ;;  %v12665_v6 = vld [vmem:[#allocation98_spill] sm:$0xff] }
 0x1cb   :  { %7346 = vmatprep.mubr.f32.mxu1 %v12628_v41  ;;  %7721 = vmatprep.mubr.f32.mxu0 %v12573_v18  ;;  %v12651_v18 = vld [vmem:[#allocation84_spill] sm:$0xff] }
 0x1cc   :  { %v12666_v41 = vld [vmem:[#allocation100_spill] sm:$0xff] }
 0x1ce   :  { %7347 = vmatmul.mubr.f32.gmra.mrb[14].mxu1 %v12629_v50  ;;  %7722 = vmatmul.mubr.f32.gmra.mrb[16].mxu0 %v12574_v31  ;;  %v12653_v31 = vld [vmem:[#allocation86_spill] sm:$0xff]  ;;  %v12667_v50 = vld [vmem:[#allocation99_spill] sm:$0xff] }
 0x1cf   :  { %7349 = vmatprep.mubr.f32.mxu1 %v12630_v29  ;;  %7724 = vmatprep.mubr.f32.mxu0 %v12575_v12  ;;  %v12636_v12 = vld [vmem:[#allocation58_spill] sm:$0xff]  ;;  %v12668_v29 = vld [vmem:[#allocation101_spill] sm:$0xff] }
 0x1d2   :  { %7350 = vmatmul.mubr.f32.gmra.mrb[16].mxu1 %v12631_v57  ;;  %7725 = vmatmul.mubr.f32.gmra.mrb[18].mxu0 %v12576_v34  ;;  %v12637_v34 = vld [vmem:[#allocation62_spill] sm:$0xff] }
 0x1d3   :  { %7352 = vmatprep.mubr.f32.mxu1 %v12632_v8  ;;  %7727 = vmatprep.mubr.f32.mxu0 %v12577_v27  ;;  %v12638_v27 = vld [vmem:[#allocation63_spill] sm:$0xff]  ;;  %v12669_v57 = vld [vmem:[#allocation102_spill] sm:$0xff] }
 0x1d4   :  { %v12670_v8 = vld [vmem:[#allocation103_spill] sm:$0xff] }
 0x1d6   :  { %7353 = vmatmul.mubr.f32.gmra.mrb[18].mxu1 %v12633_v37  ;;  %7728 = vmatmul.mubr.f32.gmra.mrb[20].mxu0 %v12578_v49  ;;  %v12639_v49 = vld [vmem:[#allocation65_spill] sm:$0xff]  ;;  %v12671_v37 = vld [vmem:[#allocation104_spill] sm:$0xff] }
 0x1d7   :  { %7355 = vmatprep.mubr.f32.mxu1 %v12634_v33  ;;  %7730 = vmatprep.mubr.f32.mxu0 %v12579_v58  ;;  %v12640_v58 = vld [vmem:[#allocation68_spill] sm:$0xff]  ;;  %v12672_v33 = vld [vmem:[#allocation105_spill] sm:$0xff] }
 0x1da   :  { %7356 = vmatmul.mubr.f32.gmra.mrb[20].mxu1 %v12635_v38  ;;  %7731 = vmatmul.mubr.f32.gmra.mrb[22].mxu0 %v12580_v35  ;;  %v12641_v35 = vld [vmem:[#allocation69_spill] sm:$0xff]  ;;  %v12673_v38 = vld [vmem:[#allocation106_spill] sm:$0xff] }
 0x1db   :  { %7358 = vmatprep.mubr.f32.mxu1 %v12636_v12  ;;  %7733 = vmatprep.mubr.f32.mxu0 %v12581_v26  ;;  %v12642_v26 = vld [vmem:[#allocation72_spill] sm:$0xff]  ;;  %v12674_v12 = vld [vmem:[#allocation107_spill] sm:$0xff] }
 0x1de   :  { %7359 = vmatmul.mubr.f32.gmra.mrb[22].mxu1 %v12637_v34  ;;  %7734 = vmatmul.mubr.f32.gmra.mrb[24].mxu0 %v12582_v63  ;;  %v12643_v63 = vld [vmem:[#allocation73_spill] sm:$0xff]  ;;  %v12675_v34 = vld [vmem:[#allocation111_spill] sm:$0xff] }
 0x1df   :  { %7361 = vmatprep.mubr.f32.mxu1 %v12638_v27  ;;  %7736 = vmatprep.mubr.f32.mxu0 %v12583_v39  ;;  %v12644_v39 = vld [vmem:[#allocation74_spill] sm:$0xff]  ;;  %v12676_v27 = vld [vmem:[#allocation109_spill] sm:$0xff] }
 0x1e2   :  { %7362 = vmatmul.mubr.f32.gmra.mrb[24].mxu1 %v12639_v49  ;;  %7737 = vmatmul.mubr.f32.gmra.mrb[26].mxu0 %v12584_v1  ;;  %v12645_v1 = vld [vmem:[#allocation79_spill] sm:$0xff]  ;;  %v12677_v49 = vld [vmem:[#allocation112_spill] sm:$0xff] }
 0x1e3   :  { %7364 = vmatprep.mubr.f32.mxu1 %v12640_v58  ;;  %7739 = vmatprep.mubr.f32.mxu0 %v12585_v14  ;;  %v12646_v14 = vld [vmem:[#allocation80_spill] sm:$0xff]  ;;  %v12678_v58 = vld [vmem:[#allocation113_spill] sm:$0xff] }
 0x1e6   :  { %7365 = vmatmul.mubr.f32.gmra.mrb[26].mxu1 %v12641_v35  ;;  %7740 = vmatmul.mubr.f32.gmra.mrb[28].mxu0 %v12586_v23  ;;  %v12648_v23 = vld [vmem:[#allocation81_spill] sm:$0xff]  ;;  %v12679_v35 = vld [vmem:[#allocation115_spill] sm:$0xff] }
 0x1e7   :  { %7367 = vmatprep.mubr.f32.mxu1 %v12642_v26  ;;  %7742 = vmatprep.mubr.f32.mxu0 %v12587_v28  ;;  %v12650_v28 = vld [vmem:[#allocation82_spill] sm:$0xff]  ;;  %v12680_v26 = vld [vmem:[#allocation116_spill] sm:$0xff] }
 0x1ea   :  { %7368 = vmatmul.mubr.f32.gmra.mrb[28].mxu1 %v12643_v63  ;;  %7743 = vmatmul.mubr.f32.gmra.mrb[30].mxu0 %v12588_v53  ;;  %v12652_v53 = vld [vmem:[#allocation85_spill] sm:$0xff] }
 0x1eb   :  { %7370 = vmatprep.mubr.f32.mxu1 %v12644_v39  ;;  %7745 = vmatprep.mubr.f32.mxu0 %v12589_v54  ;;  %v12654_v54 = vld [vmem:[#allocation88_spill] sm:$0xff]  ;;  %v12681_v63 = vld [vmem:[#allocation117_spill] sm:$0xff] }
 0x1ec   :  { %v12683_v39 = vld [vmem:[#allocation121_spill] sm:$0xff] }
 0x1ee   :  { %7371 = vmatmul.mubr.f32.gmra.mrb[30].mxu1 %v12645_v1  ;;  %7746 = vmatmul.mubr.f32.gmra.mrb[32].mxu0 %v12590_v19  ;;  %v12656_v19 = vld [vmem:[#allocation90_spill] sm:$0xff]  ;;  %v12686_v1 = vld [vmem:[#allocation125_spill] sm:$0xff] }
 0x1ef   :  { %7373 = vmatprep.mubr.f32.mxu1 %v12646_v14  ;;  %7748 = vmatprep.mubr.f32.mxu0 %v12647_v51  ;;  %v12703_v14 = vld [vmem:[#allocation143_spill] sm:$0xff]  ;;  %v12705_v51 = vld [vmem:[#allocation145_spill] sm:$0xff] }
 0x1f2   :  { %7374 = vmatmul.mubr.f32.gmra.mrb[32].mxu1 %v12648_v23  ;;  %7749 = vmatmul.mubr.f32.gmra.mrb[34].mxu0 %v12649_v40  ;;  %v12707_v23 = vld [vmem:[#allocation147_spill] sm:$0xff]  ;;  %v12709_v40 = vld [vmem:[#allocation149_spill] sm:$0xff] }
 0x1f3   :  { %7376 = vmatprep.mubr.f32.mxu1 %v12650_v28  ;;  %7751 = vmatprep.mubr.f32.mxu0 %v12651_v18  ;;  %v12712_v28 = vld [vmem:[#allocation152_spill] sm:$0xff]  ;;  %v12713_v18 = vld [vmem:[#allocation153_spill] sm:$0xff] }
 0x1f6   :  { %7377 = vmatmul.mubr.f32.gmra.mrb[34].mxu1 %v12652_v53  ;;  %7752 = vmatmul.mubr.f32.gmra.mrb[36].mxu0 %v12653_v31 }
 0x1f7   :  { %7379 = vmatprep.mubr.f32.mxu1 %v12654_v54  ;;  %7754 = vmatprep.mubr.f32.mxu0 %v12655_v44 }
 0x1fa   :  { %7380 = vmatmul.mubr.f32.gmra.mrb[36].mxu1 %v12656_v19  ;;  %7755 = vmatmul.mubr.f32.gmra.mrb[38].mxu0 %v12657_v16 }
 0x1fb   :  { %7382 = vmatprep.mubr.f32.mxu1 %v12658_v0  ;;  %7757 = vmatprep.mubr.f32.mxu0 %v12659_v20 }
 0x1fe   :  { %7383 = vmatmul.mubr.f32.gmra.mrb[38].mxu1 %v12660_v7  ;;  %7758 = vmatmul.mubr.f32.gmra.mrb[40].mxu0 %v12661_v59 }
 0x1ff   :  { %7385 = vmatprep.mubr.f32.mxu1 %v12662_v55  ;;  %7760 = vmatprep.mubr.f32.mxu0 %v12663_v56 }
 0x202   :  { %7386 = vmatmul.mubr.f32.gmra.mrb[40].mxu1 %v12664_v11  ;;  %7761 = vmatmul.mubr.f32.gmra.mrb[42].mxu0 %v12665_v6 }
 0x203   :  { %7388 = vmatprep.mubr.f32.mxu1 %v12666_v41  ;;  %7763 = vmatprep.mubr.f32.mxu0 %v12667_v50 }
 0x206   :  { %7389 = vmatmul.mubr.f32.gmra.mrb[42].mxu1 %v12668_v29  ;;  %7764 = vmatmul.mubr.f32.gmra.mrb[44].mxu0 %v12669_v57 }
 0x207   :  { %7391 = vmatprep.mubr.f32.mxu1 %v12670_v8  ;;  %7766 = vmatprep.mubr.f32.mxu0 %v12671_v37 }
 0x20a   :  { %7392 = vmatmul.mubr.f32.gmra.mrb[44].mxu1 %v12672_v33  ;;  %7767 = vmatmul.mubr.f32.gmra.mrb[46].mxu0 %v12673_v38 }
 0x20b   :  { %7394 = vmatprep.mubr.f32.mxu1 %v12674_v12  ;;  %7769 = vmatprep.mubr.f32.mxu0 %v12605_v62  ;;  %v12682_v62 = vld [vmem:[#allocation118_spill] sm:$0xff] }
 0x20e   :  { %7395 = vmatmul.mubr.f32.gmra.mrb[46].mxu1 %v12675_v34  ;;  %7770 = vmatmul.mubr.f32.gmra.mrb[48].mxu0 %v12676_v27 }
 0x20f   :  { %7397 = vmatprep.mubr.f32.mxu1 %v12677_v49  ;;  %7772 = vmatprep.mubr.f32.mxu0 %v12607_v4  ;;  %v12684_v4 = vld [vmem:[#allocation122_spill] sm:$0xff] }
 0x212   :  { %7398 = vmatmul.mubr.f32.gmra.mrb[48].mxu1 %v12678_v58  ;;  %7773 = vmatmul.mubr.f32.gmra.mrb[50].mxu0 %v12608_v45  ;;  %v12685_v45 = vld [vmem:[#allocation124_spill] sm:$0xff] }
 0x213   :  { %7400 = vmatprep.mubr.f32.mxu1 %v12679_v35  ;;  %7775 = vmatprep.mubr.f32.mxu0 %v12680_v26 }
 0x216   :  { %7401 = vmatmul.mubr.f32.gmra.mrb[50].mxu1 %v12681_v63  ;;  %7776 = vmatmul.mubr.f32.gmra.mrb[52].mxu0 %v12610_v52  ;;  %v12687_v52 = vld [vmem:[#allocation126_spill] sm:$0xff] }
 0x217   :  { %7403 = vmatprep.mubr.f32.mxu1 %v12682_v62  ;;  %7778 = vmatprep.mubr.f32.mxu0 %v12611_v3  ;;  %v12688_v3 = vld [vmem:[#allocation128_spill] sm:$0xff] }
 0x21a   :  { %7404 = vmatmul.mubr.f32.gmra.mrb[52].mxu1 %v12683_v39  ;;  %7779 = vmatmul.mubr.f32.gmra.mrb[54].mxu0 %v9081_v48  ;;  %v12689_v48 = vld [vmem:[#allocation129_spill] sm:$0xff] }
 0x21b   :  { %7406 = vmatprep.mubr.f32.mxu1 %v12684_v4  ;;  %7781 = vmatprep.mubr.f32.mxu0 %v12612_v17  ;;  %v12690_v17 = vld [vmem:[#allocation130_spill] sm:$0xff] }
 0x21e   :  { %7407 = vmatmul.mubr.f32.gmra.mrb[54].mxu1 %v12685_v45  ;;  %7782 = vmatmul.mubr.f32.gmra.mrb[56].mxu0 %v9090_v32  ;;  %v12691_v32 = vld [vmem:[#allocation131_spill] sm:$0xff] }
 0x21f   :  { %7409 = vmatprep.mubr.f32.mxu1 %v12686_v1  ;;  %7784 = vmatprep.mubr.f32.mxu0 %v9107_v21  ;;  %v12692_v21 = vld [vmem:[#allocation132_spill] sm:$0xff] }
 0x222   :  { %7410 = vmatmul.mubr.f32.gmra.mrb[56].mxu1 %v12687_v52  ;;  %7785 = vmatmul.mubr.f32.gmra.mrb[58].mxu0 %v12613_v61  ;;  %v12693_v61 = vld [vmem:[#allocation133_spill] sm:$0xff] }
 0x223   :  { %7412 = vmatprep.mubr.f32.mxu1 %v12688_v3  ;;  %7787 = vmatprep.mubr.f32.mxu0 %v9116_v13  ;;  %v12694_v13 = vld [vmem:[#allocation134_spill] sm:$0xff] }
 0x226   :  { %7413 = vmatmul.mubr.f32.gmra.mrb[58].mxu1 %v12689_v48  ;;  %7788 = vmatmul.mubr.f32.gmra.mrb[60].mxu0 %v9138_v15  ;;  %v12695_v15 = vld [vmem:[#allocation135_spill] sm:$0xff] }
 0x227   :  { %7415 = vmatprep.mubr.f32.mxu1 %v12690_v17  ;;  %7790 = vmatprep.mubr.f32.mxu0 %v9144_v47  ;;  %v12696_v47 = vld [vmem:[#allocation136_spill] sm:$0xff] }
 0x22a   :  { %7416 = vmatmul.mubr.f32.gmra.mrb[60].mxu1 %v12691_v32  ;;  %7791 = vmatmul.mubr.f32.gmra.mrb[62].mxu0 %v9149_v25  ;;  %v12697_v25 = vld [vmem:[#allocation137_spill] sm:$0xff] }
 0x22b   :  { %7418 = vmatprep.mubr.f32.mxu1 %v12692_v21  ;;  %7793 = vmatprep.mubr.f32.mxu0 %v9166_v5  ;;  %v12698_v5 = vld [vmem:[#allocation138_spill] sm:$0xff] }
 0x22e   :  { %7419 = vmatmul.mubr.f32.gmra.mrb[62].mxu1 %v12693_v61  ;;  %7794 = vmatmul.mubr.f32.gmra.mrb[64].mxu0 %v9173_v46  ;;  %v12699_v46 = vld [vmem:[#allocation139_spill] sm:$0xff] }
 0x22f   :  { %7421 = vmatprep.mubr.f32.mxu1 %v12694_v13  ;;  %7796 = vmatprep.mubr.f32.mxu0 %v9188_v9  ;;  %v12700_v9 = vld [vmem:[#allocation140_spill] sm:$0xff] }
 0x232   :  { %7422 = vmatmul.mubr.f32.gmra.mrb[64].mxu1 %v12695_v15  ;;  %7797 = vmatmul.mubr.f32.gmra.mrb[66].mxu0 %v9196_v42  ;;  %v12701_v42 = vld [vmem:[#allocation141_spill] sm:$0xff] }
 0x233   :  { %7424 = vmatprep.mubr.f32.mxu1 %v12696_v47  ;;  %7799 = vmatprep.mubr.f32.mxu0 %v9199_v24  ;;  %v12702_v24 = vld [vmem:[#allocation142_spill] sm:$0xff] }
 0x236   :  { %7425 = vmatmul.mubr.f32.gmra.mrb[66].mxu1 %v12697_v25  ;;  %7800 = vmatmul.mubr.f32.gmra.mrb[68].mxu0 %v9216_v60  ;;  %v12704_v60 = vld [vmem:[#allocation144_spill] sm:$0xff] }
 0x237   :  { %7427 = vmatprep.mubr.f32.mxu1 %v12698_v5  ;;  %7802 = vmatprep.mubr.f32.mxu0 %v9218_v22  ;;  %v12706_v22 = vld [vmem:[#allocation146_spill] sm:$0xff] }
 0x23a   :  { %7428 = vmatmul.mubr.f32.gmra.mrb[68].mxu1 %v12699_v46  ;;  %7803 = vmatmul.mubr.f32.gmra.mrb[70].mxu0 %v9244_v10  ;;  %v12708_v10 = vld [vmem:[#allocation148_spill] sm:$0xff] }
 0x23b   :  { %7430 = vmatprep.mubr.f32.mxu1 %v12700_v9  ;;  %7805 = vmatprep.mubr.f32.mxu0 %v9246_v36  ;;  %v12710_v36 = vld [vmem:[#allocation150_spill] sm:$0xff] }
 0x23e   :  { %7431 = vmatmul.mubr.f32.gmra.mrb[70].mxu1 %v12701_v42  ;;  %7806 = vmatmul.mubr.f32.gmra.mrb[72].mxu0 %v9259_v43  ;;  %v12711_v43 = vld [vmem:[#allocation151_spill] sm:$0xff] }
 0x23f   :  { %7433 = vmatprep.mubr.f32.mxu1 %v12702_v24  ;;  %7808 = vmatprep.mubr.f32.mxu0 %v12703_v14 }
 0x242   :  { %7434 = vmatmul.mubr.f32.gmra.mrb[72].mxu1 %v12704_v60  ;;  %7809 = vmatmul.mubr.f32.gmra.mrb[74].mxu0 %v12705_v51 }
 0x243   :  { %7436 = vmatprep.mubr.f32.mxu1 %v12706_v22  ;;  %7811 = vmatprep.mubr.f32.mxu0 %v12707_v23 }
 0x246   :  { %7437 = vmatmul.mubr.f32.gmra.mrb[74].mxu1 %v12708_v10  ;;  %7812 = vmatmul.mubr.f32.gmra.mrb[76].mxu0 %v12709_v40 }
 0x247   :  { %7439 = vmatprep.mubr.f32.mxu1 %v12710_v36  ;;  %7814 = vmatprep.mubr.f32.mxu0 %v9306_v2 }
 0x24a   :  { %7440 = vmatmul.mubr.f32.gmra.mrb[76].mxu1 %v12711_v43  ;;  %7815 = vmatmul.mubr.f32.gmra.mrb[78].mxu0 %v9314_v30 }
 0x24b   :  { %7442 = vmatprep.mubr.f32.mxu1 %v12712_v28 }
 0x24e   :  { %7443 = vmatmul.mubr.f32.gmra.mrb[78].mxu1 %v12713_v18 }
 0x281   :  { %v7699_v53 = vpop.f32.mrb[0].mxu0 }
 0x282   :  { %v3791_v31 = vpop.f32.mrb[1].mxu0 }
 0x285   :  { %v7327_v54 = vpop.f32.mrb[0].mxu1  ;;  %v7702_v44 = vpop.f32.mrb[2].mxu0 }
 0x286   :  { %v9656_v19 = vadd.f32 %v7699_v53, %v7327_v54  ;;  %v1913_v16 = vpop.f32.mrb[1].mxu1  ;;  %v3803_v0 = vpop.f32.mrb[3].mxu0 }
 0x287   :  { %v7842_v2 = vadd.f32 %v3791_v31, %v1913_v16 }
 0x288   :  { %v4351_v30 = vrot.slane %v9656_v19, 1  ;;  %v4632_v20 = vrot.slane %v9656_v19, 2  ;;  %v4913_v7 = vrot.slane %v9656_v19, 3  ;;  %v5194_v59 = vrot.slane %v9656_v19, 4 }
 0x289   :  { %v5475_v55 = vrot.slane %v9656_v19, 5  ;;  %v5756_v56 = vrot.slane %v9656_v19, 6  ;;  %v4350_v11 = vrot.slane %v7842_v2, 1  ;;  %v4631_v6 = vrot.slane %v7842_v2, 2  ;;  %v7330_v41 = vpop.f32.mrb[2].mxu1  ;;  %v7705_v50 = vpop.f32.mrb[4].mxu0 }
 0x28a   :  { %v4551_v29 = vadd.f32 %v9656_v19, %v4351_v30  ;;  %v4912_v57 = vrot.slane %v7842_v2, 3  ;;  %v5193_v8 = vrot.slane %v7842_v2, 4  ;;  %v5474_v37 = vrot.slane %v7842_v2, 5  ;;  %v1927_v33 = vpop.f32.mrb[3].mxu1  ;;  %v3815_v38 = vpop.f32.mrb[5].mxu0 }
 0x28b   :  { %v4352_v12 = vsel %vm4349_vm8, %v4350_v11, %v4351_v30  ;;  %v4633_v34 = vsel %vm4630_vm9, %v4631_v6, %v4632_v20  ;;  %v5755_v27 = vrot.slane %v7842_v2, 6  ;;  %v9667_v49 = vadd.f32 %v7702_v44, %v7330_v41 }
 0x28c   :  { %v4832_v58 = vadd.f32 %v4632_v20, %v4551_v29  ;;  %v4550_v35 = vadd.f32 %v7842_v2, %v4352_v12  ;;  %v4914_v26 = vsel %vm4911_vm10, %v4912_v57, %v4913_v7  ;;  %v5195_v63 = vsel %vm5192_vm11, %v5193_v8, %v5194_v59 }
 0x28d   :  { %v5476_v62 = vsel %vm5473_vm12, %v5474_v37, %v5475_v55  ;;  %v5757_v39 = vsel %vm5754_vm13, %v5755_v27, %v5756_v56  ;;  %v4354_v4 = vrot.slane %v9667_v49, 1  ;;  %v4635_v45 = vrot.slane %v9667_v49, 2  ;;  %v7333_v1 = vpop.f32.mrb[4].mxu1  ;;  %v9675_v52 = vpop.f32.mrb[6].mxu0 }
 0x28e   :  { %v5113_v3 = vadd.f32 %v4913_v7, %v4832_v58  ;;  %v4831_v48 = vadd.f32 %v4633_v34, %v4550_v35  ;;  %v4916_v17 = vrot.slane %v9667_v49, 3  ;;  %v5197_v32 = vrot.slane %v9667_v49, 4  ;;  %v1941_v21 = vpop.f32.mrb[5].mxu1  ;;  %v9679_v61 = vpop.f32.mrb[7].mxu0 }
 0x28f   :  { %v4553_v13 = vadd.f32 %v9667_v49, %v4354_v4  ;;  %v5478_v15 = vrot.slane %v9667_v49, 5  ;;  %v5759_v47 = vrot.slane %v9667_v49, 6  ;;  %v7844_v25 = vadd.f32 %v3803_v0, %v1927_v33 }
 0x290   :  { %v5394_v5 = vadd.f32 %v5194_v59, %v5113_v3  ;;  %v5112_v46 = vadd.f32 %v4914_v26, %v4831_v48  ;;  %v9684_v9 = vadd.f32 %v7705_v50, %v7333_v1  ;;  %v9686_v42 = vadd.f32 %v3815_v38, %v1941_v21 }
 0x291   :  { %v4834_v24 = vadd.f32 %v4635_v45, %v4553_v13  ;;  %v4353_v14 = vrot.slane %v7844_v25, 1  ;;  %v4634_v60 = vrot.slane %v7844_v25, 2  ;;  %v4915_v51 = vrot.slane %v7844_v25, 3  ;;  %v9688_v22 = vpop.f32.mrb[6].mxu1  ;;  %v9690_v23 = vpop.f32.mrb[8].mxu0 }
 0x292   :  { %v5675_v10 = vadd.f32 %v5475_v55, %v5394_v5  ;;  %v5393_v40 = vadd.f32 %v5195_v63, %v5112_v46  ;;  %v5196_v36 = vrot.slane %v7844_v25, 4  ;;  %v5477_v43 = vrot.slane %v7844_v25, 5  ;;  %v9692_v28 = vpop.f32.mrb[7].mxu1  ;;  %v9694_v18 = vpop.f32.mrb[9].mxu0 }
 0x293   :  { %v5115_v53 = vadd.f32 %v4916_v17, %v4834_v24  ;;  %v4355_v31 = vsel %vm4349_vm8, %v4353_v14, %v4354_v4  ;;  %v4636_v54 = vsel %vm4630_vm9, %v4634_v60, %v4635_v45  ;;  %v4917_v44 = vsel %vm4911_vm10, %v4915_v51, %v4916_v17 }
 0x294   :  { %v5956_v19 = vadd.f32 %v5756_v56, %v5675_v10  ;;  %v5674_v16 = vadd.f32 %v5476_v62, %v5393_v40  ;;  %v4552_v0 = vadd.f32 %v7844_v25, %v4355_v31  ;;  %v5198_v2 = vsel %vm5192_vm11, %v5196_v36, %v5197_v32 }
 0x295   :  { %v5396_v30 = vadd.f32 %v5197_v32, %v5115_v53  ;;  %v5479_v20 = vsel %vm5473_vm12, %v5477_v43, %v5478_v15  ;;  %v5758_v7 = vrot.slane %v7844_v25, 6  ;;  %v4357_v59 = vrot.slane %v9684_v9, 1  ;;  %v7339_v55 = vpop.f32.mrb[8].mxu1  ;;  %v9702_v11 = vpop.f32.mrb[10].mxu0 }
 0x296   :  { %v9704_v6 = vmul.f32 0.020408163, %v5956_v19  ;;  %v5955_v41 = vadd.f32 %v5757_v39, %v5674_v16  ;;  %v4833_v50 = vadd.f32 %v4636_v54, %v4552_v0  ;;  %v4638_v29 = vrot.slane %v9684_v9, 2  ;;  %v1969_v56 = vpop.f32.mrb[9].mxu1  ;;  %v9707_v57 = vpop.f32.mrb[11].mxu0 }
 0x297   :  { %v5677_v8 = vadd.f32 %v5478_v15, %v5396_v30  ;;  %v5760_v37 = vsel %vm5754_vm13, %v5758_v7, %v5759_v47  ;;  %v4555_v33 = vadd.f32 %v9684_v9, %v4357_v59  ;;  %v4919_v38 = vrot.slane %v9684_v9, 3 }
 0x298   :  { %12714 = vst [vmem:[#allocation14_spill] sm:$0xff] %v9704_v6  ;;  %v9713_v12 = vmul.f32 2.0, %v9704_v6  ;;  %v9715_v34 = vmul.f32 0.020408163, %v5955_v41  ;;  %v5114_v27 = vadd.f32 %v4917_v44, %v4833_v50  ;;  %v5200_v49 = vrot.slane %v9684_v9, 4 }
 0x299   :  { %v5958_v58 = vadd.f32 %v5759_v47, %v5677_v8  ;;  %v4836_v35 = vadd.f32 %v4638_v29, %v4555_v33  ;;  %v5481_v26 = vrot.slane %v9684_v9, 5  ;;  %v5762_v63 = vrot.slane %v9684_v9, 6  ;;  %v9720_v62 = vpop.f32.mrb[10].mxu1  ;;  %v9722_v39 = vpop.f32.mrb[12].mxu0 }
 0x29a   :  { %12715 = vst [vmem:[#allocation15_spill] sm:$0xff] %v9715_v34  ;;  %v9725_v4 = vmul.f32 2.0, %v9715_v34  ;;  %v5395_v45 = vadd.f32 %v5198_v2, %v5114_v27  ;;  %v4356_v1 = vrot.slane %v9686_v42, 1  ;;  %v4637_v3 = vrot.slane %v9686_v42, 2  ;;  %v9729_v48 = vpop.f32.mrb[11].mxu1  ;;  %v9731_v17 = vpop.f32.mrb[13].mxu0 }
 0x29b   :  { %v9733_v32 = vmul.f32 0.020408163, %v5958_v58  ;;  %v5117_v21 = vadd.f32 %v4919_v38, %v4836_v35  ;;  %v4918_v13 = vrot.slane %v9686_v42, 3  ;;  %v5199_v15 = vrot.slane %v9686_v42, 4 }
 0x29c   :  { %12716 = vst [vmem:[#allocation13_spill] sm:$0xff] %v9725_v4  ;;  %v5676_v47 = vadd.f32 %v5479_v20, %v5395_v45  ;;  %v4358_v25 = vsel %vm4349_vm8, %v4356_v1, %v4357_v59  ;;  %v4639_v5 = vsel %vm4630_vm9, %v4637_v3, %v4638_v29  ;;  %v5480_v46 = vrot.slane %v9686_v42, 5 }
 0x29d   :  { %12717 = vst [vmem:[#allocation16_spill] sm:$0xff] %v9733_v32  ;;  %v9741_v9 = vmul.f32 2.0, %v9733_v32  ;;  %v5398_v24 = vadd.f32 %v5200_v49, %v5117_v21  ;;  %v4554_v14 = vadd.f32 %v9686_v42, %v4358_v25  ;;  %v4920_v60 = vsel %vm4911_vm10, %v4918_v13, %v4919_v38  ;;  %v9745_v51 = vpop.f32.mrb[12].mxu1  ;;  %v9747_v10 = vpop.f32.mrb[14].mxu0 }
 0x29e   :  { %v5957_v40 = vadd.f32 %v5760_v37, %v5676_v47  ;;  %v5201_v36 = vsel %vm5192_vm11, %v5199_v15, %v5200_v49  ;;  %v5482_v43 = vsel %vm5473_vm12, %v5480_v46, %v5481_v26  ;;  %v5761_v53 = vrot.slane %v9686_v42, 6  ;;  %v9752_v31 = vpop.f32.mrb[13].mxu1  ;;  %v9754_v54 = vpop.f32.mrb[15].mxu0 }
 0x29f   :  { %12718 = vst [vmem:[#allocation20_spill] sm:$0xff] %v9741_v9  ;;  %v5679_v44 = vadd.f32 %v5481_v26, %v5398_v24  ;;  %v4835_v19 = vadd.f32 %v4639_v5, %v4554_v14  ;;  %v9758_v16 = vadd.f32 %v9675_v52, %v9688_v22  ;;  %v7848_v0 = vadd.f32 %v9679_v61, %v9692_v28 }
 0x2a0   :  { %v9762_v2 = vmul.f32 0.020408163, %v5957_v40  ;;  %v5763_v30 = vsel %vm5754_vm13, %v5761_v53, %v5762_v63  ;;  %v9766_v20 = vadd.f32 %v9690_v23, %v7339_v55  ;;  %v9769_v42 = vadd.f32 %v9694_v18, %v1969_v56 }
 0x2a1   :  { %v5960_v7 = vadd.f32 %v5762_v63, %v5679_v44  ;;  %v5116_v59 = vadd.f32 %v4920_v60, %v4835_v19  ;;  %v4360_v41 = vrot.slane %v9758_v16, 1  ;;  %v4641_v52 = vrot.slane %v9758_v16, 2  ;;  %v9773_v22 = vpop.f32.mrb[14].mxu1  ;;  %v9775_v50 = vpop.f32.mrb[16].mxu0 }
 0x2a2   :  { %12719 = vst [vmem:[#allocation22_spill] sm:$0xff] %v9762_v2  ;;  %12720 = vst [vmem:[#allocation23_spill] sm:$0xff] %v9766_v20  ;;  %v4922_v61 = vrot.slane %v9758_v16, 3  ;;  %v5203_v28 = vrot.slane %v9758_v16, 4  ;;  %v5484_v23 = vrot.slane %v9758_v16, 5  ;;  %v5765_v55 = vrot.slane %v9758_v16, 6 }
 0x2a3   :  { %12721 = vst [vmem:[#allocation27_spill] sm:$0xff] %v9769_v42  ;;  %v9781_v18 = vpop.f32.mrb[15].mxu1  ;;  %v9783_v29 = vpop.f32.mrb[17].mxu0  ;;  %v9785_v56 = vmul.f32 0.020408163, %v5960_v7  ;;  %v5397_v8 = vadd.f32 %v5201_v36, %v5116_v59  ;;  %v4557_v37 = vadd.f32 %v9758_v16, %v4360_v41  ;;  %v4359_v33 = vrot.slane %v7848_v0, 1 }
 0x2a4   :  { %v4640_v38 = vrot.slane %v7848_v0, 2  ;;  %v4921_v27 = vrot.slane %v7848_v0, 3  ;;  %v5202_v49 = vrot.slane %v7848_v0, 4  ;;  %v5483_v58 = vrot.slane %v7848_v0, 5 }
 0x2a5   :  { %12722 = vst [vmem:[#allocation29_spill] sm:$0xff] %v9785_v56  ;;  %v5678_v35 = vadd.f32 %v5482_v43, %v5397_v8  ;;  %v4838_v26 = vadd.f32 %v4641_v52, %v4557_v37  ;;  %v4361_v63 = vsel %vm4349_vm8, %v4359_v33, %v4360_v41  ;;  %v5764_v45 = vrot.slane %v7848_v0, 6  ;;  %v9789_v1 = vpop.f32.mrb[16].mxu1  ;;  %v9791_v3 = vpop.f32.mrb[18].mxu0 }
 0x2a6   :  { %v4556_v21 = vadd.f32 %v7848_v0, %v4361_v63  ;;  %v4642_v13 = vsel %vm4630_vm9, %v4640_v38, %v4641_v52  ;;  %v4923_v15 = vsel %vm4911_vm10, %v4921_v27, %v4922_v61  ;;  %v5204_v47 = vsel %vm5192_vm11, %v5202_v49, %v5203_v28  ;;  %v9796_v25 = vpop.f32.mrb[17].mxu1  ;;  %v9798_v5 = vpop.f32.mrb[19].mxu0 }
 0x2a7   :  { %v5959_v46 = vadd.f32 %v5763_v30, %v5678_v35  ;;  %v5119_v24 = vadd.f32 %v4922_v61, %v4838_v26  ;;  %v5485_v14 = vsel %vm5473_vm12, %v5483_v58, %v5484_v23  ;;  %v5766_v60 = vsel %vm5754_vm13, %v5764_v45, %v5765_v55 }
 0x2a8   :  { %v4837_v40 = vadd.f32 %v4642_v13, %v4556_v21  ;;  %v4363_v36 = vrot.slane %v9766_v20, 1  ;;  %v4644_v43 = vrot.slane %v9766_v20, 2  ;;  %v4925_v53 = vrot.slane %v9766_v20, 3 }
 0x2a9   :  { %v9805_v44 = vmul.f32 0.020408163, %v5959_v46  ;;  %v5400_v19 = vadd.f32 %v5203_v28, %v5119_v24  ;;  %v5206_v16 = vrot.slane %v9766_v20, 4  ;;  %v5487_v0 = vrot.slane %v9766_v20, 5  ;;  %v9809_v30 = vpop.f32.mrb[18].mxu1  ;;  %v9811_v7 = vpop.f32.mrb[20].mxu0 }
 0x2aa   :  { %v5118_v59 = vadd.f32 %v4923_v15, %v4837_v40  ;;  %v4559_v41 = vadd.f32 %v9766_v20, %v4363_v36  ;;  %v4362_v61 = vrot.slane %v9769_v42, 1  ;;  %v9816_v8 = vpop.f32.mrb[19].mxu1  ;;  %v9818_v37 = vpop.f32.mrb[21].mxu0  ;;  %v4643_v33 = vrot.slane %v9769_v42, 2 }
 0x2ab   :  { %12723 = vst [vmem:[#allocation30_spill] sm:$0xff] %v9805_v44  ;;  %v5681_v28 = vadd.f32 %v5484_v23, %v5400_v19  ;;  %v4924_v38 = vrot.slane %v9769_v42, 3  ;;  %v5205_v27 = vrot.slane %v9769_v42, 4  ;;  %v5486_v26 = vrot.slane %v9769_v42, 5 }
 0x2ac   :  { %v5399_v49 = vadd.f32 %v5204_v47, %v5118_v59  ;;  %v4840_v58 = vadd.f32 %v4644_v43, %v4559_v41  ;;  %v4364_v35 = vsel %vm4349_vm8, %v4362_v61, %v4363_v36  ;;  %v4645_v21 = vsel %vm4630_vm9, %v4643_v33, %v4644_v43 }
 0x2ad   :  { %v5962_v63 = vadd.f32 %v5765_v55, %v5681_v28  ;;  %v4558_v45 = vadd.f32 %v9769_v42, %v4364_v35  ;;  %v4926_v13 = vsel %vm4911_vm10, %v4924_v38, %v4925_v53  ;;  %v9828_v23 = vpop.f32.mrb[20].mxu1  ;;  %v9830_v15 = vpop.f32.mrb[22].mxu0  ;;  %v5207_v47 = vsel %vm5192_vm11, %v5205_v27, %v5206_v16 }
 0x2ae   :  { %v5680_v46 = vadd.f32 %v5485_v14, %v5399_v49  ;;  %v5121_v24 = vadd.f32 %v4925_v53, %v4840_v58  ;;  %v9834_v40 = vsel %vm5473_vm12, %v5486_v26, %v5487_v0  ;;  %v9836_v36 = vpop.f32.mrb[21].mxu1  ;;  %v9838_v55 = vpop.f32.mrb[23].mxu0  ;;  %v9845_v41 = vadd.f32 %v9702_v11, %v9720_v62 }
 0x2af   :  { %12724 = vst [vmem:[#allocation31_spill] sm:$0xff] %v9834_v40  ;;  %v9840_v19 = vmul.f32 0.020408163, %v5962_v63  ;;  %v4839_v43 = vadd.f32 %v4645_v21, %v4558_v45  ;;  %v9849_v61 = vadd.f32 %v9707_v57, %v9729_v48  ;;  %v9853_v28 = vadd.f32 %v9722_v39, %v9745_v51 }
 0x2b0   :  { %12726 = vst [vmem:[#allocation36_spill] sm:$0xff] %v9845_v41  ;;  %v5961_v14 = vadd.f32 %v5766_v60, %v5680_v46  ;;  %v5402_v53 = vadd.f32 %v5206_v16, %v5121_v24  ;;  %v4366_v38 = vrot.slane %v9845_v41, 1  ;;  %v4647_v27 = vrot.slane %v9845_v41, 2 }
 0x2b1   :  { %12725 = vst [vmem:[#allocation35_spill] sm:$0xff] %v9840_v19  ;;  %12727 = vst [vmem:[#allocation39_spill] sm:$0xff] %v9849_v61  ;;  %v5120_v33 = vadd.f32 %v4926_v13, %v4839_v43  ;;  %v4928_v49 = vrot.slane %v9845_v41, 3  ;;  %v9858_v58 = vpop.f32.mrb[22].mxu1  ;;  %v9860_v11 = vpop.f32.mrb[24].mxu0  ;;  %v4365_v26 = vrot.slane %v9849_v61, 1 }
 0x2b2   :  { %12728 = vst [vmem:[#allocation40_spill] sm:$0xff] %v9853_v28  ;;  %v9862_v62 = vmul.f32 0.020408163, %v5961_v14  ;;  %v9864_v60 = vadd.f32 %v5487_v0, %v5402_v53  ;;  %v9868_v48 = vpop.f32.mrb[23].mxu1  ;;  %v9870_v51 = vpop.f32.mrb[25].mxu0  ;;  %v4561_v35 = vadd.f32 %v9845_v41, %v4366_v38  ;;  %v4646_v63 = vrot.slane %v9849_v61, 2 }
 0x2b3   :  { %v9872_v16 = vadd.f32 %v5207_v47, %v5120_v33  ;;  %v4927_v45 = vrot.slane %v9849_v61, 3  ;;  %v4367_v24 = vsel %vm4349_vm8, %v4365_v26, %v4366_v38  ;;  %v4369_v43 = vrot.slane %v9853_v28, 1 }
 0x2b4   :  { %12729 = vst [vmem:[#allocation43_spill] sm:$0xff] %v9862_v62  ;;  %12730 = vst [vmem:[#allocation45_spill] sm:$0xff] %v9864_v60  ;;  %v4842_v46 = vadd.f32 %v4647_v27, %v4561_v35  ;;  %v4648_v47 = vsel %vm4630_vm9, %v4646_v63, %v4647_v27  ;;  %v4560_v33 = vadd.f32 %v9849_v61, %v4367_v24  ;;  %v12276_v52 = vrot.slane %v9853_v28, 2 }
 0x2b5   :  { %12731 = vst [vmem:[#allocation46_spill] sm:$0xff] %v9872_v16  ;;  %v9884_v14 = vpop.f32.mrb[24].mxu1  ;;  %v9886_v53 = vpop.f32.mrb[26].mxu0  ;;  %v4929_v59 = vsel %vm4911_vm10, %v4927_v45, %v4928_v49  ;;  %v9899_v27 = vadd.f32 %v9853_v28, %v4369_v43  ;;  %v9903_v26 = vadd.f32 %v9731_v17, %v9752_v31  ;;  %v9907_v63 = vadd.f32 %v9747_v10, %v9773_v22 }
 0x2b6   :  { %v9892_v13 = vpop.f32.mrb[25].mxu1  ;;  %v9894_v35 = vpop.f32.mrb[27].mxu0  ;;  %v9896_v38 = vadd.f32 %v4928_v49, %v4842_v46  ;;  %v4841_v45 = vadd.f32 %v4648_v47, %v4560_v33  ;;  %v9911_v24 = vadd.f32 %v9754_v54, %v9781_v18  ;;  %v9915_v49 = vadd.f32 %v9775_v50, %v9789_v1 }
 0x2b7   :  { %12733 = vst [vmem:[#allocation49_spill] sm:$0xff] %v9899_v27  ;;  %12734 = vst [vmem:[#allocation53_spill] sm:$0xff] %v9903_v26  ;;  %v7858_v46 = vadd.f32 %v9783_v29, %v9796_v25  ;;  %v4368_v39 = vrot.slane %v9903_v26, 1  ;;  %v4649_v17 = vrot.slane %v9903_v26, 2  ;;  %v12277_v29 = vrot.slane %v9907_v63, 1 }
 0x2b8   :  { %12732 = vst [vmem:[#allocation47_spill] sm:$0xff] %v9896_v38  ;;  %12735 = vst [vmem:[#allocation54_spill] sm:$0xff] %v9907_v63  ;;  %v9927_v54 = vadd.f32 %v4929_v59, %v4841_v45  ;;  %v4371_v0 = vrot.slane %v9911_v24, 1  ;;  %v4375_v57 = vrot.slane %v9915_v49, 1  ;;  %v5218_v31 = vrot.slane %v9915_v49, 4 }
 0x2b9   :  { %12736 = vst [vmem:[#allocation55_spill] sm:$0xff] %v9911_v24  ;;  %v9923_v22 = vpop.f32.mrb[26].mxu1  ;;  %v9925_v47 = vpop.f32.mrb[28].mxu0  ;;  %v4370_v33 = vsel %vm4349_vm8, %v4368_v39, %v4369_v43  ;;  %v4651_v10 = vsel %vm4630_vm9, %v4649_v17, %v12276_v52  ;;  %v4656_v43 = vrot.slane %v9915_v49, 2  ;;  %v4937_v17 = vrot.slane %v9915_v49, 3 }
 0x2ba   :  { %12737 = vst [vmem:[#allocation59_spill] sm:$0xff] %v9927_v54  ;;  %v9932_v1 = vpop.f32.mrb[27].mxu1  ;;  %v9934_v25 = vpop.f32.mrb[29].mxu0  ;;  %v4562_v45 = vadd.f32 %v9903_v26, %v4370_v33  ;;  %v4373_v39 = vsel %vm4349_vm8, %v4371_v0, %v12277_v29  ;;  %v4567_v18 = vadd.f32 %v9915_v49, %v4375_v57  ;;  %v5499_v59 = vrot.slane %v9915_v49, 5 }
 0x2bb   :  { %v9959_v50 = vadd.f32 %v9911_v24, %v4373_v39  ;;  %v5780_v9 = vrot.slane %v9915_v49, 6  ;;  %v4374_v4 = vrot.slane %v7858_v46, 1  ;;  %v4655_v62 = vrot.slane %v7858_v46, 2 }
 0x2bc   :  { %v9956_v33 = vadd.f32 %v4651_v10, %v4562_v45  ;;  %v4936_v60 = vrot.slane %v7858_v46, 3  ;;  %v4848_v42 = vadd.f32 %v4656_v43, %v4567_v18  ;;  %v5217_v20 = vrot.slane %v7858_v46, 4 }
 0x2bd   :  { %v9952_v21 = vpop.f32.mrb[28].mxu1  ;;  %v9954_v52 = vpop.f32.mrb[30].mxu0  ;;  %12739 = vst [vmem:[#allocation61_spill] sm:$0xff] %v9959_v50  ;;  %v5498_v10 = vrot.slane %v7858_v46, 5  ;;  %v5779_v45 = vrot.slane %v7858_v46, 6  ;;  %v4376_v39 = vsel %vm4349_vm8, %v4374_v4, %v4375_v57  ;;  %v4657_v40 = vsel %vm4630_vm9, %v4655_v62, %v4656_v43 }
 0x2be   :  { %12738 = vst [vmem:[#allocation60_spill] sm:$0xff] %v9956_v33  ;;  %v9963_v0 = vpop.f32.mrb[29].mxu1  ;;  %v9965_v29 = vpop.f32.mrb[31].mxu0  ;;  %v4938_v16 = vsel %vm4911_vm10, %v4936_v60, %v4937_v17  ;;  %v9973_v38 = vadd.f32 %v9791_v3, %v9809_v30  ;;  %v5129_v61 = vadd.f32 %v4937_v17, %v4848_v42  ;;  %v4566_v41 = vadd.f32 %v7858_v46, %v4376_v39 }
 0x2bf   :  { %v5219_v18 = vsel %vm5192_vm11, %v5217_v20, %v5218_v31  ;;  %v5500_v33 = vsel %vm5473_vm12, %v5498_v10, %v5499_v59  ;;  %v5781_v62 = vsel %vm5754_vm13, %v5779_v45, %v5780_v9  ;;  %v7860_v10 = vadd.f32 %v9798_v5, %v9816_v8 }
 0x2c0   :  { %v4378_v60 = vrot.slane %v9973_v38, 1  ;;  %v4659_v3 = vrot.slane %v9973_v38, 2  ;;  %v4940_v30 = vrot.slane %v9973_v38, 3  ;;  %v5410_v57 = vadd.f32 %v5218_v31, %v5129_v61 }
 0x2c1   :  { %v9975_v54 = vpop.f32.mrb[30].mxu1  ;;  %v9977_v49 = vpop.f32.mrb[32].mxu0  ;;  %v4847_v43 = vadd.f32 %v4657_v40, %v4566_v41  ;;  %v5221_v42 = vrot.slane %v9973_v38, 4  ;;  %v5502_v20 = vrot.slane %v9973_v38, 5  ;;  %v5783_v17 = vrot.slane %v9973_v38, 6 }
 0x2c2   :  { %v9981_v26 = vpop.f32.mrb[31].mxu1  ;;  %v9983_v4 = vpop.f32.mrb[33].mxu0  ;;  %v4569_v46 = vadd.f32 %v9973_v38, %v4378_v60  ;;  %v9997_v45 = vadd.f32 %v9811_v7, %v9828_v23  ;;  %v5691_v40 = vadd.f32 %v5499_v59, %v5410_v57  ;;  %v10005_v61 = vadd.f32 %v9818_v37, %v9836_v36 }
 0x2c3   :  { %v5128_v41 = vadd.f32 %v4938_v16, %v4847_v43  ;;  %v10009_v38 = vadd.f32 %v9830_v15, %v9858_v58  ;;  %v4377_v8 = vrot.slane %v7860_v10, 1  ;;  %v4658_v23 = vrot.slane %v7860_v10, 2 }
 0x2c4   :  { %v4850_v7 = vadd.f32 %v4659_v3, %v4569_v46  ;;  %v4939_v28 = vrot.slane %v7860_v10, 3  ;;  %v5972_v27 = vadd.f32 %v5780_v9, %v5691_v40  ;;  %v5220_v59 = vrot.slane %v7860_v10, 4 }
 0x2c5   :  { %v9999_v39 = vpop.f32.mrb[32].mxu1  ;;  %v10001_v50 = vpop.f32.mrb[34].mxu0  ;;  %v5409_v24 = vadd.f32 %v5219_v18, %v5128_v41  ;;  %v5501_v16 = vrot.slane %v7860_v10, 5  ;;  %v4379_v37 = vsel %vm4349_vm8, %v4377_v8, %v4378_v60  ;;  %v4660_v36 = vsel %vm4630_vm9, %v4658_v23, %v4659_v3 }
 0x2c6   :  { %v10011_v31 = vpop.f32.mrb[33].mxu1  ;;  %v10013_v5 = vpop.f32.mrb[35].mxu0  ;;  %v5131_v57 = vadd.f32 %v4940_v30, %v4850_v7  ;;  %v4941_v15 = vsel %vm4911_vm10, %v4939_v28, %v4940_v30  ;;  %v10022_v63 = vmul.f32 0.020408163, %v5972_v27  ;;  %v4568_v19 = vadd.f32 %v7860_v10, %v4379_v37 }
 0x2c7   :  { %v5690_v46 = vadd.f32 %v5500_v33, %v5409_v24  ;;  %v5222_v9 = vsel %vm5192_vm11, %v5220_v59, %v5221_v42  ;;  %v5503_v60 = vsel %vm5473_vm12, %v5501_v16, %v5502_v20  ;;  %v5782_v3 = vrot.slane %v7860_v10, 6 }
 0x2c8   :  { %12740 = vst [vmem:[#allocation64_spill] sm:$0xff] %v10022_v63  ;;  %v5412_v41 = vadd.f32 %v5221_v42, %v5131_v57  ;;  %v4381_v28 = vrot.slane %v9997_v45, 1  ;;  %v6276_v30 = vmul.f32 %v9713_v12, %v10022_v63  ;;  %v4849_v27 = vadd.f32 %v4660_v36, %v4568_v19 }
 0x2c9   :  { %v10018_v58 = vpop.f32.mrb[34].mxu1  ;;  %v10020_v43 = vpop.f32.mrb[36].mxu0  ;;  %v5971_v7 = vadd.f32 %v5781_v62, %v5690_v46  ;;  %v4662_v24 = vrot.slane %v9997_v45, 2  ;;  %v5784_v8 = vsel %vm5754_vm13, %v5782_v3, %v5783_v17  ;;  %v4943_v59 = vrot.slane %v9997_v45, 3 }
 0x2ca   :  { %v10025_v18 = vpop.f32.mrb[35].mxu1  ;;  %v10027_v40 = vpop.f32.mrb[37].mxu0  ;;  %v5693_v33 = vadd.f32 %v5502_v20, %v5412_v41  ;;  %v4571_v23 = vadd.f32 %v9997_v45, %v4381_v28  ;;  %v10041_v10 = vadd.f32 0.0001, %v6276_v30  ;;  %v5130_v12 = vadd.f32 %v4941_v15, %v4849_v27 }
 0x2cb   :  { %v10043_v57 = vmul.f32 0.020408163, %v5971_v7  ;;  %v5224_v19 = vrot.slane %v9997_v45, 4  ;;  %v5505_v36 = vrot.slane %v9997_v45, 5  ;;  %v5786_v46 = vrot.slane %v9997_v45, 6 }
 0x2cc   :  { %12742 = vst [vmem:[#allocation67_spill] sm:$0xff] %v10041_v10  ;;  %v5974_v20 = vadd.f32 %v5783_v17, %v5693_v33  ;;  %v4852_v37 = vadd.f32 %v4662_v24, %v4571_v23  ;;  %v5411_v3 = vadd.f32 %v5222_v9, %v5130_v12  ;;  %v4380_v63 = vrot.slane %v10005_v61, 1 }
 0x2cd   :  { %v10037_v42 = vpop.f32.mrb[36].mxu1  ;;  %v10039_v16 = vpop.f32.mrb[38].mxu0  ;;  %12743 = vst [vmem:[#allocation70_spill] sm:$0xff] %v10043_v57  ;;  %v4661_v30 = vrot.slane %v10005_v61, 2  ;;  %v4942_v7 = vrot.slane %v10005_v61, 3  ;;  %v5223_v10 = vrot.slane %v10005_v61, 4 }
 0x2ce   :  { %12741 = vst [vmem:[#allocation66_spill] sm:$0xff] %v10039_v16  ;;  %v10046_v62 = vpop.f32.mrb[37].mxu1  ;;  %v10050_v41 = vpop.f32.mrb[39].mxu0  ;;  %v10055_v15 = vmul.f32 0.020408163, %v5974_v20  ;;  %v5133_v27 = vadd.f32 %v4943_v59, %v4852_v37  ;;  %v5504_v17 = vrot.slane %v10005_v61, 5  ;;  %v5692_v45 = vadd.f32 %v5503_v60, %v5411_v3 }
 0x2cf   :  { %12744 = vst [vmem:[#allocation71_spill] sm:$0xff] %v10050_v41  ;;  %v4382_v9 = vsel %vm4349_vm8, %v4380_v63, %v4381_v28  ;;  %v4663_v12 = vsel %vm4630_vm9, %v4661_v30, %v4662_v24  ;;  %v4944_v57 = vsel %vm4911_vm10, %v4942_v7, %v4943_v59  ;;  %v5225_v16 = vsel %vm5192_vm11, %v5223_v10, %v5224_v19 }
 0x2d0   :  { %12745 = vst [vmem:[#allocation75_spill] sm:$0xff] %v10055_v15  ;;  %v5414_v37 = vadd.f32 %v5224_v19, %v5133_v27  ;;  %v4570_v15 = vadd.f32 %v10005_v61, %v4382_v9  ;;  %v5973_v44 = vadd.f32 %v5784_v8, %v5692_v45  ;;  %v5785_v60 = vrot.slane %v10005_v61, 6 }
 0x2d1   :  { %v10059_v33 = vpop.f32.mrb[38].mxu1  ;;  %v10061_v23 = vpop.f32.mrb[40].mxu0  ;;  %v4384_v63 = vrot.slane %v10009_v38, 1  ;;  %v4665_v28 = vrot.slane %v10009_v38, 2  ;;  %v4946_v3 = vrot.slane %v10009_v38, 3  ;;  %v5227_v30 = vrot.slane %v10009_v38, 4 }
 0x2d2   :  { %12746 = vst [vmem:[#allocation76_spill] sm:$0xff] %v10059_v33  ;;  %v10066_v41 = vpop.f32.mrb[39].mxu1  ;;  %v10068_v20 = vpop.f32.mrb[41].mxu0  ;;  %v5506_v33 = vsel %vm5473_vm12, %v5504_v17, %v5505_v36  ;;  %v5695_v24 = vadd.f32 %v5505_v36, %v5414_v37  ;;  %v4851_v59 = vadd.f32 %v4663_v12, %v4570_v15  ;;  %v10082_v10 = vmul.f32 0.020408163, %v5973_v44 }
 0x2d3   :  { %v5787_v8 = vsel %vm5754_vm13, %v5785_v60, %v5786_v46  ;;  %v4573_v61 = vadd.f32 %v10009_v38, %v4384_v63  ;;  %v5508_v19 = vrot.slane %v10009_v38, 5  ;;  %v5789_v9 = vrot.slane %v10009_v38, 6 }
 0x2d4   :  { %12748 = vst [vmem:[#allocation108_spill] sm:$0xff] %v10082_v10  ;;  %v5976_v15 = vadd.f32 %v5786_v46, %v5695_v24  ;;  %v5132_v45 = vadd.f32 %v4944_v57, %v4851_v59  ;;  %v7864_v12 = vadd.f32 %v9838_v55, %v9868_v48  ;;  %v10096_v44 = vadd.f32 %v9860_v11, %v9884_v14 }
 0x2d5   :  { %v10078_v7 = vpop.f32.mrb[40].mxu1  ;;  %v10080_v27 = vpop.f32.mrb[42].mxu0  ;;  %v4854_v37 = vadd.f32 %v4665_v28, %v4573_v61  ;;  %v10100_v60 = vadd.f32 %v9870_v51, %v9892_v13  ;;  %v10104_v10 = vadd.f32 %v9886_v53, %v9923_v22 }
 0x2d6   :  { %12747 = vst [vmem:[#allocation77_spill] sm:$0xff] %v10080_v27  ;;  %v10087_v17 = vpop.f32.mrb[41].mxu1  ;;  %v10089_v36 = vpop.f32.mrb[43].mxu0  ;;  %12750 = vst [vmem:[#allocation114_spill] sm:$0xff] %v10096_v44  ;;  %v10106_v46 = vmul.f32 0.020408163, %v5976_v15  ;;  %v5413_v57 = vadd.f32 %v5225_v16, %v5132_v45 }
 0x2d7   :  { %12749 = vst [vmem:[#allocation110_spill] sm:$0xff] %v10089_v36  ;;  %12751 = vst [vmem:[#allocation119_spill] sm:$0xff] %v10100_v60  ;;  %v4383_v38 = vrot.slane %v7864_v12, 1  ;;  %v4664_v24 = vrot.slane %v7864_v12, 2  ;;  %v5135_v48 = vadd.f32 %v4946_v3, %v4854_v37  ;;  %v4945_v11 = vrot.slane %v7864_v12, 3 }
 0x2d8   :  { %12752 = vst [vmem:[#allocation120_spill] sm:$0xff] %v10104_v10  ;;  %12753 = vst [vmem:[#allocation123_spill] sm:$0xff] %v10106_v46  ;;  %v5226_v14 = vrot.slane %v7864_v12, 4  ;;  %v5507_v61 = vrot.slane %v7864_v12, 5  ;;  %v5694_v13 = vadd.f32 %v5506_v33, %v5413_v57  ;;  %v5788_v16 = vrot.slane %v7864_v12, 6 }
 0x2d9   :  { %v10108_v59 = vpop.f32.mrb[42].mxu1  ;;  %v10110_v55 = vpop.f32.mrb[44].mxu0  ;;  %v4385_v53 = vsel %vm4349_vm8, %v4383_v38, %v4384_v63  ;;  %v4666_v22 = vsel %vm4630_vm9, %v4664_v24, %v4665_v28  ;;  %v5416_v15 = vadd.f32 %v5227_v30, %v5135_v48  ;;  %v4947_v46 = vsel %vm4911_vm10, %v4945_v11, %v4946_v3 }
 0x2da   :  { %12754 = vst [vmem:[#allocation127_spill] sm:$0xff] %v10108_v59  ;;  %12755 = vst [vmem:[#allocation17_spill] sm:$0xff] %v10110_v55  ;;  %v10112_v36 = vpop.f32.mrb[43].mxu1  ;;  %v10114_v51 = vpop.f32.mrb[45].mxu0  ;;  %v4572_v45 = vadd.f32 %v7864_v12, %v4385_v53  ;;  %v5228_v55 = vsel %vm5192_vm11, %v5226_v14, %v5227_v30  ;;  %v5975_v37 = vadd.f32 %v5787_v8, %v5694_v13  ;;  %v4668_v12 = vrot.slane %v10096_v44, 2 }
 0x2db   :  { %12756 = vst [vmem:[#allocation18_spill] sm:$0xff] %v10114_v51  ;;  %v5509_v27 = vsel %vm5473_vm12, %v5507_v61, %v5508_v19  ;;  %v10122_v59 = vsel %vm5754_vm13, %v5788_v16, %v5789_v9  ;;  %v4387_v51 = vrot.slane %v10096_v44, 1  ;;  %v5697_v28 = vadd.f32 %v5508_v19, %v5416_v15 }
 0x2dc   :  { %12757 = vst [vmem:[#allocation19_spill] sm:$0xff] %v10122_v59  ;;  %v4853_v57 = vadd.f32 %v4666_v22, %v4572_v45  ;;  %v4949_v3 = vrot.slane %v10096_v44, 3  ;;  %v10135_v8 = vmul.f32 0.020408163, %v5975_v37  ;;  %v5230_v48 = vrot.slane %v10096_v44, 4 }
 0x2dd   :  { %v10125_v33 = vpop.f32.mrb[44].mxu1  ;;  %v10127_v63 = vpop.f32.mrb[46].mxu0  ;;  %v4575_v24 = vadd.f32 %v10096_v44, %v4387_v51  ;;  %v5978_v14 = vadd.f32 %v5789_v9, %v5697_v28  ;;  %v4386_v13 = vrot.slane %v10100_v60, 1  ;;  %v4667_v22 = vrot.slane %v10100_v60, 2 }
 0x2de   :  { %v10131_v38 = vpop.f32.mrb[45].mxu1  ;;  %v10133_v30 = vpop.f32.mrb[47].mxu0  ;;  %12759 = vst [vmem:[#allocation24_spill] sm:$0xff] %v10135_v8  ;;  %v5134_v61 = vadd.f32 %v4947_v46, %v4853_v57  ;;  %v4948_v16 = vrot.slane %v10100_v60, 3  ;;  %v5229_v15 = vrot.slane %v10100_v60, 4 }
 0x2df   :  { %12758 = vst [vmem:[#allocation21_spill] sm:$0xff] %v10133_v30  ;;  %v4856_v53 = vadd.f32 %v4668_v12, %v4575_v24  ;;  %v10149_v59 = vmul.f32 0.020408163, %v5978_v14  ;;  %v4388_v9 = vsel %vm4349_vm8, %v4386_v13, %v4387_v51  ;;  %v4669_v44 = vsel %vm4630_vm9, %v4667_v22, %v4668_v12 }
 0x2e0   :  { %v5415_v11 = vadd.f32 %v5228_v55, %v5134_v61  ;;  %v4574_v19 = vadd.f32 %v10100_v60, %v4388_v9  ;;  %v4950_v8 = vsel %vm4911_vm10, %v4948_v16, %v4949_v3  ;;  %v10163_v14 = vsel %vm5192_vm11, %v5229_v15, %v5230_v48 }
 0x2e1   :  { %v10145_v45 = vpop.f32.mrb[46].mxu1  ;;  %v10147_v37 = vpop.f32.mrb[48].mxu0  ;;  %12760 = vst [vmem:[#allocation25_spill] sm:$0xff] %v10149_v59  ;;  %v5137_v24 = vadd.f32 %v4949_v3, %v4856_v53  ;;  %12762 = vst [vmem:[#allocation28_spill] sm:$0xff] %v10163_v14  ;;  %v4390_v51 = vrot.slane %v10104_v10, 1  ;;  %v4671_v53 = vrot.slane %v10104_v10, 2  ;;  %v10193_v16 = vadd.f32 %v9934_v25, %v9963_v0 }
 0x2e2   :  { %v10153_v28 = vpop.f32.mrb[47].mxu1  ;;  %v10155_v57 = vpop.f32.mrb[49].mxu0  ;;  %v10160_v30 = vadd.f32 %v5509_v27, %v5415_v11  ;;  %v4855_v13 = vadd.f32 %v4669_v44, %v4574_v19  ;;  %v10179_v11 = vadd.f32 %v9894_v35, %v9932_v1  ;;  %v10197_v15 = vadd.f32 %v9954_v52, %v9975_v54 }
 0x2e3   :  { %v10167_v61 = vadd.f32 %v5230_v48, %v5137_v24  ;;  %v4577_v27 = vadd.f32 %v10104_v10, %v4390_v51  ;;  %v10183_v48 = vadd.f32 %v9925_v47, %v9952_v21  ;;  %12767 = vst [vmem:[#allocation38_spill] sm:$0xff] %v10193_v16  ;;  %v10201_v35 = vadd.f32 %v9965_v29, %v9981_v26 }
 0x2e4   :  { %12761 = vst [vmem:[#allocation26_spill] sm:$0xff] %v10160_v30  ;;  %12764 = vst [vmem:[#allocation33_spill] sm:$0xff] %v10179_v11  ;;  %v10189_v22 = vadd.f32 %v4950_v8, %v4855_v13  ;;  %v4389_v47 = vrot.slane %v10179_v11, 1  ;;  %v4670_v1 = vrot.slane %v10179_v11, 2  ;;  %v4392_v55 = vrot.slane %v10193_v16, 1 }
 0x2e5   :  { %12763 = vst [vmem:[#allocation32_spill] sm:$0xff] %v10167_v61  ;;  %v10171_v46 = vpop.f32.mrb[48].mxu1  ;;  %v10173_v12 = vpop.f32.mrb[50].mxu0  ;;  %12765 = vst [vmem:[#allocation34_spill] sm:$0xff] %v10183_v48  ;;  %v10203_v21 = vadd.f32 %v4671_v53, %v4577_v27  ;;  %v4393_v52 = vrot.slane %v10183_v48, 1 }
 0x2e6   :  { %v10185_v44 = vpop.f32.mrb[49].mxu1  ;;  %v10187_v19 = vpop.f32.mrb[51].mxu0  ;;  %12766 = vst [vmem:[#allocation37_spill] sm:$0xff] %v10189_v22  ;;  %12768 = vst [vmem:[#allocation41_spill] sm:$0xff] %v10197_v15  ;;  %v4391_v29 = vsel %vm4349_vm8, %v4389_v47, %v4390_v51  ;;  %v4672_v13 = vsel %vm4630_vm9, %v4670_v1, %v4671_v53  ;;  %v10265_v53 = vadd.f32 %v10001_v50, %v10018_v58 }
 0x2e7   :  { %12769 = vst [vmem:[#allocation42_spill] sm:$0xff] %v10201_v35  ;;  %12770 = vst [vmem:[#allocation44_spill] sm:$0xff] %v10203_v21  ;;  %v4576_v0 = vadd.f32 %v10179_v11, %v4391_v29  ;;  %v10226_v25 = vadd.f32 %v10183_v48, %v4393_v52  ;;  %v4394_v51 = vsel %vm4349_vm8, %v4392_v55, %v4393_v52 }
 0x2e8   :  { %v10237_v30 = vadd.f32 %v10193_v16, %v4394_v51  ;;  %v10247_v55 = vadd.f32 %v9977_v49, %v9999_v39  ;;  %v10251_v52 = vmul.f32 %v9704_v6, %v9704_v6  ;;  %v10269_v49 = vmul.f32 %v9733_v32, %v9733_v32 }
 0x2e9   :  { %v10212_v54 = vpop.f32.mrb[50].mxu1  ;;  %v10214_v26 = vpop.f32.mrb[52].mxu0  ;;  %12771 = vst [vmem:[#allocation48_spill] sm:$0xff] %v10226_v25  ;;  %v10234_v27 = vadd.f32 %v4672_v13, %v4576_v0  ;;  %v7874_v0 = vadd.f32 %v9983_v4, %v10011_v31  ;;  %v10257_v13 = vmul.f32 %v9715_v34, %v9715_v34  ;;  %v10273_v39 = vadd.f32 %v10013_v5, %v10025_v18 }
 0x2ea   :  { %v10220_v3 = vpop.f32.mrb[51].mxu1  ;;  %v10222_v24 = vpop.f32.mrb[53].mxu0  ;;  %12773 = vst [vmem:[#allocation51_spill] sm:$0xff] %v10237_v30  ;;  %v10277_v4 = vmul.f32 %v9762_v2, %v9762_v2  ;;  %v4399_v31 = vrot.slane %v10247_v55, 1  ;;  %v4680_v61 = vrot.slane %v10247_v55, 2  ;;  %v4961_v29 = vrot.slane %v10247_v55, 3 }
 0x2eb   :  { %12772 = vst [vmem:[#allocation50_spill] sm:$0xff] %v10234_v27  ;;  %v5242_v50 = vrot.slane %v10247_v55, 4  ;;  %v5523_v58 = vrot.slane %v10247_v55, 5  ;;  %v5804_v1 = vrot.slane %v10247_v55, 6  ;;  %v4398_v60 = vrot.slane %v7874_v0, 1 }
 0x2ec   :  { %v4679_v14 = vrot.slane %v7874_v0, 2  ;;  %v4583_v22 = vadd.f32 %v10247_v55, %v4399_v31  ;;  %v4960_v21 = vrot.slane %v7874_v0, 3  ;;  %v5241_v27 = vrot.slane %v7874_v0, 4 }
 0x2ed   :  { %v10241_v8 = vpop.f32.mrb[52].mxu1  ;;  %v10243_v9 = vpop.f32.mrb[54].mxu0  ;;  %v5522_v11 = vrot.slane %v7874_v0, 5  ;;  %v4400_v30 = vsel %vm4349_vm8, %v4398_v60, %v4399_v31  ;;  %v5803_v48 = vrot.slane %v7874_v0, 6  ;;  %v4402_v35 = vrot.slane %v10265_v53, 1 }
 0x2ee   :  { %12774 = vst [vmem:[#allocation52_spill] sm:$0xff] %v10243_v9  ;;  %v10259_v51 = vpop.f32.mrb[53].mxu1  ;;  %v10261_v47 = vpop.f32.mrb[55].mxu0  ;;  %v4681_v16 = vsel %vm4630_vm9, %v4679_v14, %v4680_v61  ;;  %v4864_v15 = vadd.f32 %v4680_v61, %v4583_v22  ;;  %v4582_v2 = vadd.f32 %v7874_v0, %v4400_v30  ;;  %v4962_v32 = vsel %vm4911_vm10, %v4960_v21, %v4961_v29 }
 0x2ef   :  { %12775 = vst [vmem:[#allocation56_spill] sm:$0xff] %v10261_v47  ;;  %v5243_v55 = vsel %vm5192_vm11, %v5241_v27, %v5242_v50  ;;  %v5524_v34 = vsel %vm5473_vm12, %v5522_v11, %v5523_v58  ;;  %v5805_v6 = vsel %vm5754_vm13, %v5803_v48, %v5804_v1  ;;  %v4964_v30 = vrot.slane %v10265_v53, 3 }
 0x2f0   :  { %v5145_v31 = vadd.f32 %v4961_v29, %v4864_v15  ;;  %v4863_v47 = vadd.f32 %v4681_v16, %v4582_v2  ;;  %v5245_v61 = vrot.slane %v10265_v53, 4  ;;  %v5526_v48 = vrot.slane %v10265_v53, 5 }
 0x2f1   :  { %v10285_v5 = vpop.f32.mrb[54].mxu1  ;;  %v10287_v18 = vpop.f32.mrb[56].mxu0  ;;  %v5807_v27 = vrot.slane %v10265_v53, 6  ;;  %v4401_v0 = vrot.slane %v10273_v39, 1  ;;  %v4682_v15 = vrot.slane %v10273_v39, 2  ;;  %v4963_v2 = vrot.slane %v10273_v39, 3 }
 0x2f2   :  { %12776 = vst [vmem:[#allocation57_spill] sm:$0xff] %v10285_v5  ;;  %12777 = vst [vmem:[#allocation58_spill] sm:$0xff] %v10287_v18  ;;  %v10290_v10 = vpop.f32.mrb[55].mxu1  ;;  %v10292_v25 = vpop.f32.mrb[57].mxu0  ;;  %v4585_v18 = vadd.f32 %v10265_v53, %v4402_v35 }
 0x2f3   :  { %12778 = vst [vmem:[#allocation62_spill] sm:$0xff] %v10290_v10  ;;  %12779 = vst [vmem:[#allocation63_spill] sm:$0xff] %v10292_v25  ;;  %v4683_v25 = vrot.slane %v10265_v53, 2  ;;  %v5144_v10 = vadd.f32 %v4962_v32, %v4863_v47  ;;  %v4403_v29 = vsel %vm4349_vm8, %v4401_v0, %v4402_v35  ;;  %v4965_v35 = vsel %vm4911_vm10, %v4963_v2, %v4964_v30 }
 0x2f5   :  { %v10303_v60 = vpop.f32.mrb[56].mxu1  ;;  %v10305_v14 = vpop.f32.mrb[58].mxu0  ;;  %v4866_v11 = vadd.f32 %v4683_v25, %v4585_v18  ;;  %v5425_v59 = vadd.f32 %v5243_v55, %v5144_v10  ;;  %v4684_v32 = vsel %vm4630_vm9, %v4682_v15, %v4683_v25  ;;  %v5806_v10 = vrot.slane %v10273_v39, 6 }
 0x2f6   :  { %12780 = vst [vmem:[#allocation65_spill] sm:$0xff] %v10303_v60  ;;  %12781 = vst [vmem:[#allocation68_spill] sm:$0xff] %v10305_v14  ;;  %v10309_v22 = vpop.f32.mrb[57].mxu1  ;;  %v10311_v21 = vpop.f32.mrb[59].mxu0  ;;  %v5426_v60 = vadd.f32 %v5242_v50, %v5145_v31  ;;  %v5244_v14 = vrot.slane %v10273_v39, 4  ;;  %v4584_v50 = vadd.f32 %v10273_v39, %v4403_v29  ;;  %v10337_v25 = vadd.f32 %v10020_v43, %v10037_v42 }
 0x2f7   :  { %12782 = vst [vmem:[#allocation69_spill] sm:$0xff] %v10309_v22  ;;  %12783 = vst [vmem:[#allocation72_spill] sm:$0xff] %v10311_v21  ;;  %v5147_v16 = vadd.f32 %v4964_v30, %v4866_v11  ;;  %v5525_v21 = vrot.slane %v10273_v39, 5  ;;  %v5706_v5 = vadd.f32 %v5524_v34, %v5425_v59  ;;  %v10341_v55 = vmul.f32 %v9785_v56, %v9785_v56 }
 0x2f8   :  { %v5707_v53 = vadd.f32 %v5523_v58, %v5426_v60  ;;  %v5246_v0 = vsel %vm5192_vm11, %v5244_v14, %v5245_v61  ;;  %v7878_v60 = vadd.f32 %v10027_v40, %v10046_v62  ;;  %v5808_v39 = vsel %vm5754_vm13, %v5806_v10, %v5807_v27 }
 0x2f9   :  { %v10321_v18 = vpop.f32.mrb[58].mxu1  ;;  %v10323_v22 = vpop.f32.mrb[60].mxu0  ;;  %v5428_v11 = vadd.f32 %v5245_v61, %v5147_v16  ;;  %v5527_v9 = vsel %vm5473_vm12, %v5525_v21, %v5526_v48  ;;  %12787 = vst [vmem:[#allocation80_spill] sm:$0xff] %v10341_v55  ;;  %v5987_v59 = vadd.f32 %v5805_v6, %v5706_v5  ;;  %v4405_v21 = vrot.slane %v10337_v25, 1 }
 0x2fa   :  { %12784 = vst [vmem:[#allocation73_spill] sm:$0xff] %v10321_v18  ;;  %12785 = vst [vmem:[#allocation74_spill] sm:$0xff] %v10323_v22  ;;  %v10327_v47 = vpop.f32.mrb[59].mxu1  ;;  %v10329_v31 = vpop.f32.mrb[61].mxu0  ;;  %v5988_v18 = vadd.f32 %v5804_v1, %v5707_v53  ;;  %v4865_v22 = vadd.f32 %v4684_v32, %v4584_v50  ;;  %v4967_v40 = vrot.slane %v10337_v25, 3  ;;  %v5248_v6 = vrot.slane %v10337_v25, 4 }
 0x2fb   :  { %12786 = vst [vmem:[#allocation79_spill] sm:$0xff] %v10329_v31  ;;  %v5709_v58 = vadd.f32 %v5526_v48, %v5428_v11  ;;  %v4686_v48 = vrot.slane %v10337_v25, 2  ;;  %v6067_v15 = vmul.f32 0.020408163, %v5987_v59  ;;  %v5529_v16 = vrot.slane %v10337_v25, 5 }
 0x2fc   :  { %v6068_v34 = vmul.f32 0.020408163, %v5988_v18  ;;  %v5146_v1 = vadd.f32 %v4965_v35, %v4865_v22  ;;  %v4587_v22 = vadd.f32 %v10337_v25, %v4405_v21  ;;  %v5810_v29 = vrot.slane %v10337_v25, 6 }
 0x2fd   :  { %v10345_v14 = vpop.f32.mrb[60].mxu1  ;;  %v10347_v30 = vpop.f32.mrb[62].mxu0  ;;  %v5990_v42 = vadd.f32 %v5807_v27, %v5709_v58  ;;  %v6131_v50 = vsub.f32 %v6067_v15, %v10257_v13  ;;  %v4404_v11 = vrot.slane %v7878_v60, 1  ;;  %v4966_v59 = vrot.slane %v7878_v60, 3 }
 0x2fe   :  { %12788 = vst [vmem:[#allocation78_spill] sm:$0xff] %v10347_v30  ;;  %v10350_v61 = vpop.f32.mrb[61].mxu1  ;;  %v10352_v43 = vpop.f32.mrb[63].mxu0  ;;  %v6132_v62 = vsub.f32 %v6068_v34, %v10251_v52  ;;  %v5427_v2 = vadd.f32 %v5246_v0, %v5146_v1  ;;  %v4868_v58 = vadd.f32 %v4686_v48, %v4587_v22  ;;  %v4685_v34 = vrot.slane %v7878_v60, 2 }
 0x2ff   :  { %12789 = vst [vmem:[#allocation81_spill] sm:$0xff] %v10352_v43  ;;  %v6070_v5 = vmul.f32 0.020408163, %v5990_v42  ;;  %v10374_v25 = vmul.f32 1.0208334, %v6131_v50  ;;  %v4406_v42 = vsel %vm4349_vm8, %v4404_v11, %v4405_v21  ;;  %v4968_v22 = vsel %vm4911_vm10, %v4966_v59, %v4967_v40 }
 0x300   :  { %v10366_v53 = vmul.f32 1.0208334, %v6132_v62  ;;  %v5708_v32 = vadd.f32 %v5527_v9, %v5427_v2  ;;  %v5247_v62 = vrot.slane %v7878_v60, 4  ;;  %v5149_v15 = vadd.f32 %v4967_v40, %v4868_v58  ;;  %v12801_v40 = vld [vmem:[#allocation66_spill] sm:$0xff] }
 0x301   :  { %v10362_v27 = vpop.f32.mrb[62].mxu1  ;;  %v10364_v18 = vpop.f32.mrb[64].mxu0  ;;  %v6134_v10 = vsub.f32 %v6070_v5, %v10269_v49  ;;  %v4586_v9 = vadd.f32 %v7878_v60, %v4406_v42  ;;  %v4687_v2 = vsel %vm4630_vm9, %v4685_v34, %v4686_v48  ;;  %v5528_v43 = vrot.slane %v7878_v60, 5  ;;  %v12800_v42 = vld [vmem:[#allocation76_spill] sm:$0xff] }
 0x302   :  { %12790 = vst [vmem:[#allocation83_spill] sm:$0xff] %v10362_v27  ;;  %12791 = vst [vmem:[#allocation82_spill] sm:$0xff] %v10364_v18  ;;  %v10369_v35 = vpop.f32.mrb[63].mxu1  ;;  %v10371_v0 = vpop.f32.mrb[65].mxu0  ;;  %v5989_v1 = vadd.f32 %v5808_v39, %v5708_v32  ;;  %v5249_v50 = vsel %vm5192_vm11, %v5247_v62, %v5248_v6  ;;  %v5430_v21 = vadd.f32 %v5248_v6, %v5149_v15  ;;  %v5809_v11 = vrot.slane %v7878_v60, 6  ;;  %v12802_v62 = vld [vmem:[#allocation35_spill] sm:$0xff] }
 0x303   :  { %12792 = vst [vmem:[#allocation84_spill] sm:$0xff] %v10369_v35  ;;  %12793 = vst [vmem:[#allocation85_spill] sm:$0xff] %v10371_v0  ;;  %v10377_v56 = vmul.f32 1.0208334, %v6134_v10  ;;  %v4867_v32 = vadd.f32 %v4687_v2, %v4586_v9  ;;  %v12797_v10 = vld [vmem:[#allocation30_spill] sm:$0xff]  ;;  %v10398_v59 = vadd.f32 %v12801_v40, %v12800_v42  ;;  %v12804_v9 = vld [vmem:[#allocation71_spill] sm:$0xff] }
 0x304   :  { %v6069_v5 = vmul.f32 0.020408163, %v5989_v1  ;;  %v10390_v58 = vmul.f32 %v12797_v10, %v12797_v10  ;;  %v5530_v1 = vsel %vm5473_vm12, %v5528_v43, %v5529_v16  ;;  %v5711_v6 = vadd.f32 %v5529_v16, %v5430_v21 }
 0x305   :  { %v10380_v18 = vpop.f32.mrb[64].mxu1  ;;  %v10382_v0 = vpop.f32.mrb[66].mxu0  ;;  %v5148_v60 = vadd.f32 %v4968_v22, %v4867_v32  ;;  %v5811_v15 = vsel %vm5754_vm13, %v5809_v11, %v5810_v29  ;;  %v7880_v2 = vadd.f32 %v12804_v9, %v10066_v41  ;;  %v4408_v42 = vrot.slane %v10398_v59, 1 }
 0x306   :  { %12794 = vst [vmem:[#allocation86_spill] sm:$0xff] %v10380_v18  ;;  %12795 = vst [vmem:[#allocation88_spill] sm:$0xff] %v10382_v0  ;;  %v10386_v39 = vpop.f32.mrb[65].mxu1  ;;  %v10392_v48 = vpop.f32.mrb[67].mxu0  ;;  %v6133_v34 = vsub.f32 %v6069_v5, %v10277_v4  ;;  %v10402_v0 = vmul.f32 %v12802_v62, %v12802_v62  ;;  %v4689_v40 = vrot.slane %v10398_v59, 2  ;;  %v4970_v62 = vrot.slane %v10398_v59, 3 }
 0x307   :  { %12796 = vst [vmem:[#allocation87_spill] sm:$0xff] %v10386_v39  ;;  %12798 = vst [vmem:[#allocation90_spill] sm:$0xff] %v10390_v58  ;;  %v5992_v16 = vadd.f32 %v5810_v29, %v5711_v6  ;;  %v5429_v22 = vadd.f32 %v5249_v50, %v5148_v60  ;;  %v5251_v21 = vrot.slane %v10398_v59, 4  ;;  %v5532_v41 = vrot.slane %v10398_v59, 5 }
 0x308   :  { %12799 = vst [vmem:[#allocation89_spill] sm:$0xff] %v10392_v48  ;;  %12803 = vst [vmem:[#allocation91_spill] sm:$0xff] %v10402_v0  ;;  %v10411_v43 = vmul.f32 1.0208334, %v6133_v34  ;;  %v4589_v32 = vadd.f32 %v10398_v59, %v4408_v42  ;;  %v5813_v11 = vrot.slane %v10398_v59, 6  ;;  %v4407_v34 = vrot.slane %v7880_v2, 1 }
 0x309   :  { %v10407_v10 = vpop.f32.mrb[66].mxu1  ;;  %v10409_v5 = vpop.f32.mrb[68].mxu0  ;;  %v4688_v9 = vrot.slane %v7880_v2, 2  ;;  %v5710_v39 = vadd.f32 %v5530_v1, %v5429_v22  ;;  %v4969_v18 = vrot.slane %v7880_v2, 3  ;;  %v5250_v35 = vrot.slane %v7880_v2, 4  ;;  %v12822_v0 = vld [vmem:[#allocation110_spill] sm:$0xff] }
 0x30a   :  { %12805 = vst [vmem:[#allocation92_spill] sm:$0xff] %v10407_v10  ;;  %12806 = vst [vmem:[#allocation93_spill] sm:$0xff] %v10409_v5  ;;  %v10416_v48 = vpop.f32.mrb[67].mxu1  ;;  %v10422_v5 = vpop.f32.mrb[69].mxu0  ;;  %v6072_v10 = vmul.f32 0.020408163, %v5992_v16  ;;  %v4870_v50 = vadd.f32 %v4689_v40, %v4589_v32  ;;  %v4409_v6 = vsel %vm4349_vm8, %v4407_v34, %v4408_v42 }
 0x30b   :  { %12807 = vst [vmem:[#allocation94_spill] sm:$0xff] %v10416_v48  ;;  %12808 = vst [vmem:[#allocation95_spill] sm:$0xff] %v10422_v5  ;;  %v4690_v60 = vsel %vm4630_vm9, %v4688_v9, %v4689_v40  ;;  %v5531_v48 = vrot.slane %v7880_v2, 5  ;;  %v5991_v31 = vadd.f32 %v5811_v15, %v5710_v39  ;;  %v4588_v5 = vadd.f32 %v7880_v2, %v4409_v6 }
 0x30c   :  { %v6136_v59 = vsub.f32 %v6072_v10, %v10341_v55  ;;  %v4971_v1 = vsel %vm4911_vm10, %v4969_v18, %v4970_v62  ;;  %v5151_v16 = vadd.f32 %v4970_v62, %v4870_v50  ;;  %v5252_v22 = vsel %vm5192_vm11, %v5250_v35, %v5251_v21  ;;  %v12813_v62 = vld [vmem:[#allocation77_spill] sm:$0xff] }
 0x30d   :  { %v10424_v30 = vpop.f32.mrb[68].mxu1  ;;  %v10426_v29 = vpop.f32.mrb[70].mxu0  ;;  %v6071_v42 = vmul.f32 0.020408163, %v5991_v31  ;;  %v4869_v34 = vadd.f32 %v4690_v60, %v4588_v5  ;;  %v10440_v40 = vadd.f32 %v10061_v23, %v10078_v7  ;;  %v7882_v35 = vadd.f32 %v10068_v20, %v10087_v17 }
 0x30e   :  { %12809 = vst [vmem:[#allocation96_spill] sm:$0xff] %v10424_v30  ;;  %12810 = vst [vmem:[#allocation97_spill] sm:$0xff] %v10426_v29  ;;  %v10430_v27 = vpop.f32.mrb[69].mxu1  ;;  %v5533_v30 = vsel %vm5473_vm12, %v5531_v48, %v5532_v41  ;;  %v5812_v29 = vrot.slane %v7880_v2, 6  ;;  %v10436_v32 = vmul.f32 1.0208334, %v6136_v59  ;;  %v5432_v10 = vadd.f32 %v5251_v21, %v5151_v16 }
 0x30f   :  { %v10442_v9 = vpop.f32.mrb[71].mxu0  ;;  %v12812_v48 = vld [vmem:[#allocation127_spill] sm:$0xff]  ;;  %v6135_v31 = vsub.f32 %v6071_v42, %v10390_v58  ;;  %v5150_v2 = vadd.f32 %v4971_v1, %v4869_v34  ;;  %v4411_v23 = vrot.slane %v10440_v40, 1  ;;  %v4692_v7 = vrot.slane %v10440_v40, 2 }
 0x310   :  { %12811 = vst [vmem:[#allocation98_spill] sm:$0xff] %v10436_v32  ;;  %v5814_v18 = vsel %vm5754_vm13, %v5812_v29, %v5813_v11  ;;  %v10451_v15 = vadd.f32 %v12813_v62, %v12812_v48  ;;  %v5713_v21 = vadd.f32 %v5532_v41, %v5432_v10  ;;  %v4973_v29 = vrot.slane %v10440_v40, 3 }
 0x311   :  { %v10444_v39 = vpop.f32.mrb[70].mxu1  ;;  %v10456_v5 = vpop.f32.mrb[72].mxu0  ;;  %v5254_v20 = vrot.slane %v10440_v40, 4  ;;  %v5535_v17 = vrot.slane %v10440_v40, 5  ;;  %v10463_v6 = vmul.f32 1.0208334, %v6135_v31  ;;  %v5431_v60 = vadd.f32 %v5252_v22, %v5150_v2 }
 0x312   :  { %12814 = vst [vmem:[#allocation100_spill] sm:$0xff] %v10451_v15  ;;  %12815 = vst [vmem:[#allocation99_spill] sm:$0xff] %v10456_v5  ;;  %v10458_v50 = vpop.f32.mrb[71].mxu1  ;;  %v4591_v59 = vadd.f32 %v10440_v40, %v4411_v23  ;;  %v5816_v1 = vrot.slane %v10440_v40, 6  ;;  %v5994_v16 = vadd.f32 %v5813_v11, %v5713_v21  ;;  %v4410_v42 = vrot.slane %v7882_v35, 1  ;;  %v10473_v40 = vpop.f32.mrb[73].mxu0 }
 0x313   :  { %12816 = vst [vmem:[#allocation101_spill] sm:$0xff] %v10463_v6  ;;  %v4691_v34 = vrot.slane %v7882_v35, 2  ;;  %v4972_v48 = vrot.slane %v7882_v35, 3  ;;  %v5712_v62 = vadd.f32 %v5533_v30, %v5431_v60  ;;  %v5253_v41 = vrot.slane %v7882_v35, 4 }
 0x314   :  { %v4872_v32 = vadd.f32 %v4692_v7, %v4591_v59  ;;  %v5534_v10 = vrot.slane %v7882_v35, 5  ;;  %v10467_v55 = vmul.f32 0.020408163, %v5994_v16  ;;  %v4412_v58 = vsel %vm4349_vm8, %v4410_v42, %v4411_v23 }
 0x315   :  { %v4693_v31 = vsel %vm4630_vm9, %v4691_v34, %v4692_v7  ;;  %v4974_v22 = vsel %vm4911_vm10, %v4972_v48, %v4973_v29  ;;  %v5993_v2 = vadd.f32 %v5814_v18, %v5712_v62  ;;  %v4590_v5 = vadd.f32 %v7882_v35, %v4412_v58  ;;  %v10475_v21 = vpop.f32.mrb[72].mxu1  ;;  %v10481_v7 = vpop.f32.mrb[74].mxu0 }
 0x316   :  { %12817 = vst [vmem:[#allocation102_spill] sm:$0xff] %v10467_v55  ;;  %v5153_v6 = vadd.f32 %v4973_v29, %v4872_v32  ;;  %v5255_v11 = vsel %vm5192_vm11, %v5253_v41, %v5254_v20  ;;  %v5536_v60 = vsel %vm5473_vm12, %v5534_v10, %v5535_v17  ;;  %v5815_v59 = vrot.slane %v7882_v35, 6  ;;  %v10483_v16 = vpop.f32.mrb[73].mxu1  ;;  %v10488_v42 = vpop.f32.mrb[75].mxu0  ;;  %v12824_v55 = vld [vmem:[#allocation17_spill] sm:$0xff] }
 0x317   :  { %v4414_v23 = vrot.slane %v10451_v15, 1  ;;  %v10485_v32 = vmul.f32 0.020408163, %v5993_v2  ;;  %v4871_v18 = vadd.f32 %v4693_v31, %v4590_v5  ;;  %v4695_v29 = vrot.slane %v10451_v15, 2  ;;  %12819 = vst [vmem:[#allocation104_spill] sm:$0xff] %v10488_v42  ;;  %v12826_v42 = vld [vmem:[#allocation18_spill] sm:$0xff] }
 0x318   :  { %v5434_v58 = vadd.f32 %v5254_v20, %v5153_v6  ;;  %v5817_v48 = vsel %vm5754_vm13, %v5815_v59, %v5816_v1  ;;  %v4976_v62 = vrot.slane %v10451_v15, 3  ;;  %v5257_v41 = vrot.slane %v10451_v15, 4 }
 0x319   :  { %12818 = vst [vmem:[#allocation103_spill] sm:$0xff] %v10485_v32  ;;  %v10490_v34 = vpop.f32.mrb[74].mxu1  ;;  %v4593_v35 = vadd.f32 %v10451_v15, %v4414_v23  ;;  %v10496_v10 = vpop.f32.mrb[76].mxu0  ;;  %v5152_v5 = vadd.f32 %v4974_v22, %v4871_v18  ;;  %v10504_v59 = vadd.f32 %v12822_v0, %v10112_v36  ;;  %v10508_v32 = vadd.f32 %v12824_v55, %v10125_v33 }
 0x31a   :  { %12820 = vst [vmem:[#allocation105_spill] sm:$0xff] %v10496_v10  ;;  %v10498_v2 = vpop.f32.mrb[75].mxu1  ;;  %v5715_v20 = vadd.f32 %v5535_v17, %v5434_v58  ;;  %v10512_v10 = vadd.f32 %v12826_v42, %v10131_v38  ;;  %v10516_v22 = vadd.f32 %v10127_v63, %v10145_v45  ;;  %v12829_v58 = vld [vmem:[#allocation21_spill] sm:$0xff]  ;;  %v10522_v36 = vpop.f32.mrb[77].mxu0 }
 0x31b   :  { %12821 = vst [vmem:[#allocation106_spill] sm:$0xff] %v10498_v2  ;;  %v4874_v30 = vadd.f32 %v4695_v29, %v4593_v35  ;;  %12823 = vst [vmem:[#allocation107_spill] sm:$0xff] %v10504_v59  ;;  %v5433_v17 = vadd.f32 %v5255_v11, %v5152_v5  ;;  %v10520_v18 = vadd.f32 %v12829_v58, %v10153_v28  ;;  %v4413_v55 = vrot.slane %v10504_v59, 1 }
 0x31c   :  { %12825 = vst [vmem:[#allocation111_spill] sm:$0xff] %v10508_v32  ;;  %12827 = vst [vmem:[#allocation109_spill] sm:$0xff] %v10512_v10  ;;  %v5996_v2 = vadd.f32 %v5816_v1, %v5715_v20  ;;  %v4694_v38 = vrot.slane %v10504_v59, 2  ;;  %v4975_v1 = vrot.slane %v10504_v59, 3  ;;  %v5256_v28 = vrot.slane %v10504_v59, 4 }
 0x31d   :  { %12828 = vst [vmem:[#allocation112_spill] sm:$0xff] %v10516_v22  ;;  %12830 = vst [vmem:[#allocation113_spill] sm:$0xff] %v10520_v18  ;;  %v10524_v0 = vpop.f32.mrb[76].mxu1  ;;  %v5155_v33 = vadd.f32 %v4976_v62, %v4874_v30  ;;  %v10529_v11 = vpop.f32.mrb[78].mxu0  ;;  %v5714_v45 = vadd.f32 %v5536_v60, %v5433_v17  ;;  %v5537_v35 = vrot.slane %v10504_v59, 5  ;;  %v4415_v58 = vsel %vm4349_vm8, %v4413_v55, %v4414_v23 }
 0x31e   :  { %12831 = vst [vmem:[#allocation115_spill] sm:$0xff] %v10522_v36  ;;  %12832 = vst [vmem:[#allocation116_spill] sm:$0xff] %v10529_v11  ;;  %v10531_v42 = vpop.f32.mrb[77].mxu1  ;;  %v10533_v63 = vmul.f32 0.020408163, %v5996_v2  ;;  %v10537_v20 = vpop.f32.mrb[79].mxu0  ;;  %v4696_v31 = vsel %vm4630_vm9, %v4694_v38, %v4695_v29  ;;  %v4977_v6 = vsel %vm4911_vm10, %v4975_v1, %v4976_v62  ;;  %v4592_v60 = vadd.f32 %v10504_v59, %v4415_v58 }
 0x31f   :  { %12834 = vst [vmem:[#allocation118_spill] sm:$0xff] %v10537_v20  ;;  %v10541_v5 = vadd.f32 %v5257_v41, %v5155_v33  ;;  %v10548_v2 = vadd.f32 %v5817_v48, %v5714_v45  ;;  %v5258_v17 = vsel %vm5192_vm11, %v5256_v28, %v5257_v41  ;;  %v4417_v23 = vrot.slane %v10508_v32, 1  ;;  %v12848_v28 = vld [vmem:[#allocation70_spill] sm:$0xff] }
 0x320   :  { %12833 = vst [vmem:[#allocation117_spill] sm:$0xff] %v10533_v63  ;;  %v12839_v63 = vrot.slane %v10451_v15, 5  ;;  %v4698_v29 = vrot.slane %v10508_v32, 2  ;;  %v12332_v62 = vrot.slane %v10508_v32, 3  ;;  %v4873_v55 = vadd.f32 %v4696_v31, %v4592_v60 }
 0x321   :  { %v10539_v30 = vpop.f32.mrb[78].mxu1  ;;  %12836 = vst [vmem:[#allocation122_spill] sm:$0xff] %v10541_v5  ;;  %12838 = vst [vmem:[#allocation125_spill] sm:$0xff] %v10548_v2  ;;  %v4416_v38 = vrot.slane %v10512_v10, 1  ;;  %v4697_v41 = vrot.slane %v10512_v10, 2  ;;  %v4595_v1 = vadd.f32 %v10508_v32, %v4417_v23  ;;  %v4420_v45 = vrot.slane %v10516_v22, 1 }
 0x322   :  { %12835 = vst [vmem:[#allocation121_spill] sm:$0xff] %v10539_v30  ;;  %v10546_v11 = vpop.f32.mrb[79].mxu1  ;;  %v10555_v20 = vsel %vm5473_vm12, %v5537_v35, %v12839_v63  ;;  %v4978_v63 = vrot.slane %v10512_v10, 3  ;;  %v5154_v35 = vadd.f32 %v4977_v6, %v4873_v55 }
 0x323   :  { %12837 = vst [vmem:[#allocation124_spill] sm:$0xff] %v10546_v11  ;;  %12840 = vst [vmem:[#allocation126_spill] sm:$0xff] %v10555_v20  ;;  %v4418_v58 = vsel %vm4349_vm8, %v4416_v38, %v4417_v23  ;;  %v4699_v33 = vsel %vm4630_vm9, %v4697_v41, %v4698_v29  ;;  %v10571_v60 = vadd.f32 %v4698_v29, %v4595_v1  ;;  %v4419_v23 = vrot.slane %v10520_v18, 1 }
 0x324   :  { %v4594_v48 = vadd.f32 %v10512_v10, %v4418_v58  ;;  %v10577_v2 = vsel %vm4911_vm10, %v4978_v63, %v12332_v62  ;;  %v10580_v59 = vadd.f32 %v5258_v17, %v5154_v35  ;;  %v10588_v29 = vadd.f32 %v10516_v22, %v4420_v45  ;;  %v12846_v58 = vld [vmem:[#allocation64_spill] sm:$0xff] }
 0x325   :  { %12841 = vst [vmem:[#allocation128_spill] sm:$0xff] %v10571_v60  ;;  %12842 = vst [vmem:[#allocation129_spill] sm:$0xff] %v10577_v2  ;;  %v4421_v63 = vsel %vm4349_vm8, %v4419_v23, %v4420_v45  ;;  %v7889_v35 = vadd.f32 %v10147_v37, %v10171_v46  ;;  %v10598_v31 = vmul.f32 %v12846_v58, %v12846_v58 }
 0x326   :  { %12843 = vst [vmem:[#allocation130_spill] sm:$0xff] %v10580_v59  ;;  %v10585_v38 = vadd.f32 %v4699_v33, %v4594_v48  ;;  %12845 = vst [vmem:[#allocation132_spill] sm:$0xff] %v10588_v29  ;;  %v10601_v33 = vadd.f32 %v10520_v18, %v4421_v63  ;;  %v7890_v48 = vadd.f32 %v10155_v57, %v10185_v44 }
 0x327   :  { %v10607_v1 = vmul.f32 %v12848_v28, %v12848_v28  ;;  %v10611_v45 = vadd.f32 %v10173_v12, %v10212_v54  ;;  %v4423_v23 = vrot.slane %v7889_v35, 1  ;;  %v4704_v37 = vrot.slane %v7889_v35, 2 }
 0x328   :  { %12844 = vst [vmem:[#allocation131_spill] sm:$0xff] %v10585_v38  ;;  %12847 = vst [vmem:[#allocation133_spill] sm:$0xff] %v10601_v33  ;;  %v4985_v46 = vrot.slane %v7889_v35, 3  ;;  %v5266_v17 = vrot.slane %v7889_v35, 4  ;;  %v5547_v62 = vrot.slane %v7889_v35, 5  ;;  %v5828_v41 = vrot.slane %v7889_v35, 6 }
 0x329   :  { %v6340_v63 = vadd.f32 %v10598_v31, %v10251_v52  ;;  %v4422_v55 = vrot.slane %v7890_v48, 1  ;;  %v4599_v6 = vadd.f32 %v7889_v35, %v4423_v23  ;;  %v4703_v57 = vrot.slane %v7890_v48, 2 }
 0x32a   :  { %v4984_v44 = vrot.slane %v7890_v48, 3  ;;  %v5265_v15 = vrot.slane %v7890_v48, 4  ;;  %v5546_v12 = vrot.slane %v7890_v48, 5  ;;  %v5827_v54 = vrot.slane %v7890_v48, 6 }
 0x32b   :  { %v10615_v5 = vadd.f32 0.0001, %v6340_v63  ;;  %v4424_v20 = vsel %vm4349_vm8, %v4422_v55, %v4423_v23  ;;  %v4880_v59 = vadd.f32 %v4704_v37, %v4599_v6  ;;  %v4705_v32 = vsel %vm4630_vm9, %v4703_v57, %v4704_v37 }
 0x32c   :  { %v4598_v10 = vadd.f32 %v7890_v48, %v4424_v20  ;;  %v4986_v60 = vsel %vm4911_vm10, %v4984_v44, %v4985_v46  ;;  %v5267_v2 = vsel %vm5192_vm11, %v5265_v15, %v5266_v17  ;;  %v5548_v52 = vsel %vm5473_vm12, %v5546_v12, %v5547_v62 }
 0x32d   :  { %v5829_v35 = vsel %vm5754_vm13, %v5827_v54, %v5828_v41  ;;  %v6339_v63 = vadd.f32 %v10607_v1, %v10257_v13  ;;  %v5161_v38 = vadd.f32 %v4985_v46, %v4880_v59  ;;  %v4426_v55 = vrot.slane %v10611_v45, 1  ;;  %v12850_v59 = vld [vmem:[#allocation75_spill] sm:$0xff]  ;;  %v12851_v46 = vld [vmem:[#allocation108_spill] sm:$0xff] }
 0x32e   :  { %v4879_v29 = vadd.f32 %v4705_v32, %v4598_v10  ;;  %v4707_v6 = vrot.slane %v10611_v45, 2  ;;  %v4988_v48 = vrot.slane %v10611_v45, 3  ;;  %v5269_v23 = vrot.slane %v10611_v45, 4 }
 0x32f   :  { %v10627_v20 = vadd.f32 0.0001, %v6339_v63  ;;  %v5550_v15 = vrot.slane %v10611_v45, 5  ;;  %v5442_v37 = vadd.f32 %v5266_v17, %v5161_v38  ;;  %v4601_v44 = vadd.f32 %v10611_v45, %v4426_v55  ;;  %v12852_v17 = vld [vmem:[#allocation123_spill] sm:$0xff] }
 0x330   :  { %v5160_v57 = vadd.f32 %v4986_v60, %v4879_v29  ;;  %v5831_v13 = vrot.slane %v10611_v45, 6  ;;  %v6166_v32 = vmul.f32 %v12850_v59, %v12850_v59  ;;  %v7892_v10 = vadd.f32 %v10187_v19, %v10220_v3 }
 0x331   :  { %12849 = vst [vmem:[#allocation134_spill] sm:$0xff] %v10627_v20  ;;  %v10640_v12 = vmul.f32 %v12851_v46, %v12851_v46  ;;  %v10644_v54 = vadd.f32 %v10214_v26, %v10241_v8  ;;  %v5723_v38 = vadd.f32 %v5547_v62, %v5442_v37  ;;  %v4882_v29 = vadd.f32 %v4707_v6, %v4601_v44 }
 0x332   :  { %v5441_v60 = vadd.f32 %v5267_v2, %v5160_v57  ;;  %v10648_v45 = vmul.f32 %v12852_v17, %v12852_v17  ;;  %v6342_v63 = vadd.f32 %v6166_v32, %v10269_v49  ;;  %v4425_v20 = vrot.slane %v7892_v10, 1 }
 0x333   :  { %v4706_v33 = vrot.slane %v7892_v10, 2  ;;  %v4987_v3 = vrot.slane %v7892_v10, 3  ;;  %v6004_v19 = vadd.f32 %v5828_v41, %v5723_v38  ;;  %v5163_v22 = vadd.f32 %v4988_v48, %v4882_v29 }
 0x334   :  { %12853 = vst [vmem:[#allocation135_spill] sm:$0xff] %v10648_v45  ;;  %v5722_v18 = vadd.f32 %v5548_v52, %v5441_v60  ;;  %v5268_v11 = vrot.slane %v7892_v10, 4  ;;  %v10651_v30 = vadd.f32 0.0001, %v6342_v63  ;;  %v4427_v8 = vsel %vm4349_vm8, %v4425_v20, %v4426_v55 }
 0x335   :  { %v4708_v26 = vsel %vm4630_vm9, %v4706_v33, %v4707_v6  ;;  %v4989_v2 = vsel %vm4911_vm10, %v4987_v3, %v4988_v48  ;;  %v6084_v62 = vmul.f32 0.020408163, %v6004_v19  ;;  %v5444_v57 = vadd.f32 %v5269_v23, %v5163_v22 }
 0x336   :  { %12854 = vst [vmem:[#allocation136_spill] sm:$0xff] %v10651_v30  ;;  %v6003_v37 = vadd.f32 %v5829_v35, %v5722_v18  ;;  %v4600_v44 = vadd.f32 %v7892_v10, %v4427_v8  ;;  %v5270_v49 = vsel %vm5192_vm11, %v5268_v11, %v5269_v23  ;;  %v5549_v17 = vrot.slane %v7892_v10, 5 }
 0x337   :  { %v5830_v36 = vrot.slane %v7892_v10, 6  ;;  %v10659_v41 = vadd.f32 %v10640_v12, %v10277_v4  ;;  %v6180_v52 = vsub.f32 %v6084_v62, %v10598_v31  ;;  %v5725_v55 = vadd.f32 %v5550_v15, %v5444_v57 }
 0x338   :  { %v6083_v38 = vmul.f32 0.020408163, %v6003_v37  ;;  %v4881_v20 = vadd.f32 %v4708_v26, %v4600_v44  ;;  %v5551_v33 = vsel %vm5473_vm12, %v5549_v17, %v5550_v15  ;;  %v4429_v22 = vrot.slane %v10644_v54, 1 }
 0x339   :  { %12855 = vst [vmem:[#allocation137_spill] sm:$0xff] %v10659_v41  ;;  %v5832_v6 = vsel %vm5754_vm13, %v5830_v36, %v5831_v13  ;;  %v4710_v18 = vrot.slane %v10644_v54, 2  ;;  %v6196_v11 = vmul.f32 1.0208334, %v6180_v52  ;;  %v6006_v48 = vadd.f32 %v5831_v13, %v5725_v55  ;;  %v12856_v13 = vld [vmem:[#allocation24_spill] sm:$0xff] }
 0x33a   :  { %v6179_v35 = vsub.f32 %v6083_v38, %v10607_v1  ;;  %v5162_v23 = vadd.f32 %v4989_v2, %v4881_v20  ;;  %v4603_v4 = vadd.f32 %v10644_v54, %v4429_v22  ;;  %v4991_v31 = vrot.slane %v10644_v54, 3 }
 0x33b   :  { %v5272_v10 = vrot.slane %v10644_v54, 4  ;;  %v5553_v60 = vrot.slane %v10644_v54, 5  ;;  %v6372_v15 = vadd.f32 %v6196_v11, %v10366_v53  ;;  %v6086_v29 = vmul.f32 0.020408163, %v6006_v48 }
 0x33c   :  { %v6195_v36 = vmul.f32 1.0208334, %v6179_v35  ;;  %v5443_v17 = vadd.f32 %v5270_v49, %v5162_v23  ;;  %v4884_v63 = vadd.f32 %v4710_v18, %v4603_v4  ;;  %v5834_v3 = vrot.slane %v10644_v54, 6 }
 0x33d   :  { %v7894_v1 = vadd.f32 %v10222_v24, %v10259_v51  ;;  %v10677_v19 = vmul.f32 %v12856_v13, %v12856_v13  ;;  %v6388_v8 = vadd.f32 0.0009, %v6372_v15  ;;  %v6182_v2 = vsub.f32 %v6086_v29, %v6166_v32  ;;  %v12862_v15 = vld [vmem:[#allocation52_spill] sm:$0xff] }
 0x33e   :  { %v6371_v26 = vadd.f32 %v6195_v36, %v10374_v25  ;;  %v5724_v62 = vadd.f32 %v5551_v33, %v5443_v17  ;;  %v5165_v37 = vadd.f32 %v4991_v31, %v4884_v63 }
 0x33f   :  { %12857 = vst [vmem:[#allocation138_spill] sm:$0xff] %v10677_v19  ;;  %v4428_v53 = vrot.slane %v7894_v1, 1  ;;  %v4709_v57 = vrot.slane %v7894_v1, 2  ;;  %v4990_v44 = vrot.slane %v7894_v1, 3  ;;  %v10681_v49 = vmul.f32 %v6388_v8, %v10615_v5 }
 0x340   :  { %v10683_v54 = vadd.f32 0.0009, %v6371_v26  ;;  %v6198_v52 = vmul.f32 1.0208334, %v6182_v2  ;;  %v6005_v24 = vadd.f32 %v5832_v6, %v5724_v62  ;;  %v5446_v51 = vadd.f32 %v5272_v10, %v5165_v37 }
 0x341   :  { %12858 = vst [vmem:[#allocation139_spill] sm:$0xff] %v10681_v49  ;;  %v4430_v38 = vsel %vm4349_vm8, %v4428_v53, %v4429_v22  ;;  %v4711_v55 = vsel %vm4630_vm9, %v4709_v57, %v4710_v18  ;;  %v4992_v25 = vsel %vm4911_vm10, %v4990_v44, %v4991_v31  ;;  %8258 = vrcp.f32 %v10681_v49  ;;  %v12861_v22 = vld [vmem:[#allocation57_spill] sm:$0xff] }
 0x342   :  { %12859 = vst [vmem:[#allocation140_spill] sm:$0xff] %v10683_v54  ;;  %v6374_v32 = vadd.f32 %v6198_v52, %v10377_v56  ;;  %v6085_v20 = vmul.f32 0.020408163, %v6005_v24  ;;  %v4602_v33 = vadd.f32 %v7894_v1, %v4430_v38  ;;  %v5727_v11 = vadd.f32 %v5553_v60, %v5446_v51  ;;  %v12866_v24 = vld [vmem:[#allocation56_spill] sm:$0xff]  ;;  %v12867_v38 = vld [vmem:[#allocation65_spill] sm:$0xff] }
 0x343   :  { %v5271_v5 = vrot.slane %v7894_v1, 4  ;;  %v5552_v35 = vrot.slane %v7894_v1, 5  ;;  %v5833_v48 = vrot.slane %v7894_v1, 6  ;;  %v7895_v18 = vadd.f32 %v12862_v15, %v12861_v22 }
 0x344   :  { %v10690_v23 = vadd.f32 0.0009, %v6374_v32  ;;  %v6181_v6 = vsub.f32 %v6085_v20, %v10640_v12  ;;  %v4883_v4 = vadd.f32 %v4711_v55, %v4602_v33  ;;  %v6008_v36 = vadd.f32 %v5834_v3, %v5727_v11  ;;  %v12868_v55 = vld [vmem:[#allocation58_spill] sm:$0xff]  ;;  %v12870_v33 = vld [vmem:[#allocation69_spill] sm:$0xff]  ;;  %v12871_v11 = vld [vmem:[#allocation63_spill] sm:$0xff] }
 0x345   :  { %v5273_v31 = vsel %vm5192_vm11, %v5271_v5, %v5272_v10  ;;  %v5554_v29 = vsel %vm5473_vm12, %v5552_v35, %v5553_v60  ;;  %v5835_v56 = vsel %vm5754_vm13, %v5833_v48, %v5834_v3  ;;  %v4432_v8 = vrot.slane %v7895_v18, 1  ;;  %v12863_v10 = vld [vmem:[#allocation25_spill] sm:$0xff]  ;;  %v12865_v3 = vld [vmem:[#allocation62_spill] sm:$0xff] }
 0x346   :  { %12860 = vst [vmem:[#allocation141_spill] sm:$0xff] %v10690_v23  ;;  %v6197_v17 = vmul.f32 1.0208334, %v6181_v6  ;;  %v5164_v63 = vadd.f32 %v4992_v25, %v4883_v4  ;;  %v4713_v26 = vrot.slane %v7895_v18, 2  ;;  %v6088_v1 = vmul.f32 0.020408163, %v6008_v36 }
 0x347   :  { %v4994_v2 = vrot.slane %v7895_v18, 3  ;;  %v5275_v62 = vrot.slane %v7895_v18, 4  ;;  %v5556_v37 = vrot.slane %v7895_v18, 5  ;;  %v4605_v57 = vadd.f32 %v7895_v18, %v4432_v8 }
 0x348   :  { %v6373_v12 = vadd.f32 %v6197_v17, %v10411_v43  ;;  %v5445_v53 = vadd.f32 %v5273_v31, %v5164_v63  ;;  %v5837_v44 = vrot.slane %v7895_v18, 6  ;;  %v6184_v52 = vsub.f32 %v6088_v1, %v10648_v45 }
 0x349   :  { %v10702_v60 = vmul.f32 %v12863_v10, %v12863_v10  ;;  %v7896_v51 = vadd.f32 %v12866_v24, %v12865_v3  ;;  %v10708_v25 = vadd.f32 %v12868_v55, %v12867_v38  ;;  %v4886_v43 = vadd.f32 %v4713_v26, %v4605_v57 }
 0x34a   :  { %v10710_v32 = vadd.f32 0.0009, %v6373_v12  ;;  %v5726_v20 = vadd.f32 %v5554_v29, %v5445_v53  ;;  %v7898_v5 = vadd.f32 %v12871_v11, %v12870_v33  ;;  %v10714_v35 = vmul.f32 1.0208334, %v6184_v52 }
 0x34b   :  { %12864 = vst [vmem:[#allocation142_spill] sm:$0xff] %v10702_v60  ;;  %v4431_v48 = vrot.slane %v7896_v51, 1  ;;  %v4712_v6 = vrot.slane %v7896_v51, 2  ;;  %v4993_v4 = vrot.slane %v7896_v51, 3  ;;  %v10716_v22 = vpop.eup %8258  ;;  %v5167_v18 = vadd.f32 %v4994_v2, %v4886_v43 }
 0x34c   :  { %12869 = vst [vmem:[#allocation143_spill] sm:$0xff] %v10710_v32  ;;  %12872 = vst [vmem:[#allocation144_spill] sm:$0xff] %v10714_v35  ;;  %v6007_v15 = vadd.f32 %v5835_v56, %v5726_v20  ;;  %v5274_v36 = vrot.slane %v7896_v51, 4  ;;  %v5555_v31 = vrot.slane %v7896_v51, 5  ;;  %v5836_v1 = vrot.slane %v7896_v51, 6  ;;  %v12904_v32 = vld [vmem:[#allocation88_spill] sm:$0xff] }
 0x34d   :  { %12873 = vst [vmem:[#allocation145_spill] sm:$0xff] %v10716_v22  ;;  %v4433_v17 = vsel %vm4349_vm8, %v4431_v48, %v4432_v8  ;;  %v4714_v63 = vsel %vm4630_vm9, %v4712_v6, %v4713_v26  ;;  %v4995_v29 = vsel %vm4911_vm10, %v4993_v4, %v4994_v2  ;;  %v5448_v53 = vadd.f32 %v5275_v62, %v5167_v18 }
 0x34e   :  { %v6087_v12 = vmul.f32 0.020408163, %v6007_v15  ;;  %v4604_v57 = vadd.f32 %v7896_v51, %v4433_v17  ;;  %v5276_v52 = vsel %vm5192_vm11, %v5274_v36, %v5275_v62  ;;  %v5557_v3 = vsel %vm5473_vm12, %v5555_v31, %v5556_v37 }
 0x34f   :  { %v5838_v24 = vsel %vm5754_vm13, %v5836_v1, %v5837_v44  ;;  %v4435_v56 = vrot.slane %v10708_v25, 1  ;;  %v4716_v38 = vrot.slane %v10708_v25, 2  ;;  %v5729_v55 = vadd.f32 %v5556_v37, %v5448_v53 }
 0x350   :  { %v6183_v8 = vsub.f32 %v6087_v12, %v10677_v19  ;;  %v4885_v26 = vadd.f32 %v4714_v63, %v4604_v57  ;;  %v4997_v2 = vrot.slane %v10708_v25, 3  ;;  %v5278_v51 = vrot.slane %v10708_v25, 4 }
 0x351   :  { %v4607_v20 = vadd.f32 %v10708_v25, %v4435_v56  ;;  %v5559_v62 = vrot.slane %v10708_v25, 5  ;;  %v5840_v43 = vrot.slane %v10708_v25, 6  ;;  %v6010_v11 = vadd.f32 %v5837_v44, %v5729_v55 }
 0x352   :  { %v10732_v33 = vmul.f32 1.0208334, %v6183_v8  ;;  %v5166_v48 = vadd.f32 %v4995_v29, %v4885_v26  ;;  %v4434_v6 = vrot.slane %v7898_v5, 1  ;;  %v4715_v15 = vrot.slane %v7898_v5, 2 }
 0x353   :  { %v4888_v4 = vadd.f32 %v4716_v38, %v4607_v20  ;;  %v4996_v18 = vrot.slane %v7898_v5, 3  ;;  %v5277_v37 = vrot.slane %v7898_v5, 4  ;;  %v10734_v36 = vmul.f32 0.020408163, %v6010_v11  ;;  %v12876_v20 = vld [vmem:[#allocation73_spill] sm:$0xff] }
 0x354   :  { %12874 = vst [vmem:[#allocation146_spill] sm:$0xff] %v10732_v33  ;;  %v5447_v31 = vadd.f32 %v5276_v52, %v5166_v48  ;;  %v4436_v17 = vsel %vm4349_vm8, %v4434_v6, %v4435_v56  ;;  %v5558_v63 = vrot.slane %v7898_v5, 5  ;;  %v4717_v53 = vsel %vm4630_vm9, %v4715_v15, %v4716_v38  ;;  %v12877_v56 = vld [vmem:[#allocation68_spill] sm:$0xff] }
 0x355   :  { %12875 = vst [vmem:[#allocation147_spill] sm:$0xff] %v10734_v36  ;;  %v5169_v1 = vadd.f32 %v4997_v2, %v4888_v4  ;;  %v4606_v12 = vadd.f32 %v7898_v5, %v4436_v17  ;;  %v4998_v25 = vsel %vm4911_vm10, %v4996_v18, %v4997_v2  ;;  %v5279_v57 = vsel %vm5192_vm11, %v5277_v37, %v5278_v51  ;;  %v12879_v38 = vld [vmem:[#allocation72_spill] sm:$0xff]  ;;  %v12881_v2 = vld [vmem:[#allocation74_spill] sm:$0xff] }
 0x356   :  { %v5728_v29 = vadd.f32 %v5557_v3, %v5447_v31  ;;  %v5560_v8 = vsel %vm5473_vm12, %v5558_v63, %v5559_v62  ;;  %v5839_v52 = vrot.slane %v7898_v5, 6  ;;  %v10745_v11 = vadd.f32 %v12877_v56, %v12876_v20  ;;  %v12883_v3 = vld [vmem:[#allocation79_spill] sm:$0xff] }
 0x357   :  { %v5450_v55 = vadd.f32 %v5278_v51, %v5169_v1  ;;  %v4887_v26 = vadd.f32 %v4717_v53, %v4606_v12  ;;  %v10749_v6 = vadd.f32 %v12879_v38, %v10327_v47  ;;  %v10753_v4 = vadd.f32 %v12881_v2, %v10345_v14 }
 0x358   :  { %12878 = vst [vmem:[#allocation148_spill] sm:$0xff] %v10745_v11  ;;  %v6009_v48 = vadd.f32 %v5838_v24, %v5728_v29  ;;  %v10757_v15 = vadd.f32 %v12883_v3, %v10350_v61  ;;  %v5841_v5 = vsel %vm5754_vm13, %v5839_v52, %v5840_v43  ;;  %v4438_v37 = vrot.slane %v10745_v11, 1 }
 0x359   :  { %12880 = vst [vmem:[#allocation149_spill] sm:$0xff] %v10749_v6  ;;  %12882 = vst [vmem:[#allocation150_spill] sm:$0xff] %v10753_v4  ;;  %v5731_v51 = vadd.f32 %v5559_v62, %v5450_v55  ;;  %v5168_v18 = vadd.f32 %v4998_v25, %v4887_v26  ;;  %v4719_v24 = vrot.slane %v10745_v11, 2  ;;  %v5000_v47 = vrot.slane %v10745_v11, 3 }
 0x35a   :  { %12884 = vst [vmem:[#allocation151_spill] sm:$0xff] %v10757_v15  ;;  %v10761_v31 = vmul.f32 0.020408163, %v6009_v48  ;;  %v5281_v17 = vrot.slane %v10745_v11, 4  ;;  %v4609_v1 = vadd.f32 %v10745_v11, %v4438_v37  ;;  %v12343_v61 = vrot.slane %v10745_v11, 5 }
 0x35b   :  { %v6012_v14 = vadd.f32 %v5840_v43, %v5731_v51  ;;  %v5449_v63 = vadd.f32 %v5279_v57, %v5168_v18  ;;  %v4437_v12 = vrot.slane %v10749_v6, 1  ;;  %v4718_v53 = vrot.slane %v10749_v6, 2 }
 0x35c   :  { %12885 = vst [vmem:[#allocation152_spill] sm:$0xff] %v10761_v31  ;;  %v4999_v25 = vrot.slane %v10749_v6, 3  ;;  %v4890_v26 = vadd.f32 %v4719_v24, %v4609_v1  ;;  %v5280_v52 = vrot.slane %v10749_v6, 4  ;;  %v5561_v56 = vrot.slane %v10749_v6, 5 }
 0x35d   :  { %v10772_v29 = vmul.f32 0.020408163, %v6012_v14  ;;  %v5730_v55 = vadd.f32 %v5560_v8, %v5449_v63  ;;  %v4439_v43 = vsel %vm4349_vm8, %v4437_v12, %v4438_v37  ;;  %v4720_v57 = vsel %vm4630_vm9, %v4718_v53, %v4719_v24 }
 0x35e   :  { %v5001_v20 = vsel %vm4911_vm10, %v4999_v25, %v5000_v47  ;;  %v5171_v38 = vadd.f32 %v5000_v47, %v4890_v26  ;;  %v4608_v2 = vadd.f32 %v10749_v6, %v4439_v43  ;;  %v5282_v3 = vsel %vm5192_vm11, %v5280_v52, %v5281_v17 }
 0x35f   :  { %12886 = vst [vmem:[#allocation153_spill] sm:$0xff] %v10772_v29  ;;  %v10779_v48 = vadd.f32 %v5841_v5, %v5730_v55  ;;  %v10786_v8 = vsel %vm5473_vm12, %v5561_v56, %v12343_v61  ;;  %v4441_v18 = vrot.slane %v10753_v4, 1  ;;  %v4722_v37 = vrot.slane %v10753_v4, 2  ;;  %v12902_v61 = vld [vmem:[#allocation15_spill] sm:$0xff] }
 0x360   :  { %12888 = vst [vmem:[#allocation66_spill] sm:$0xff] %v10786_v8  ;;  %v10791_v24 = vadd.f32 %v5281_v17, %v5171_v38  ;;  %v4889_v5 = vadd.f32 %v4720_v57, %v4608_v2  ;;  %v12344_v47 = vrot.slane %v10753_v4, 3  ;;  %v4440_v1 = vrot.slane %v10757_v15, 1  ;;  %v12891_v2 = vld [vmem:[#allocation83_spill] sm:$0xff]  ;;  %v12894_v17 = vld [vmem:[#allocation84_spill] sm:$0xff] }
 0x361   :  { %12887 = vst [vmem:[#allocation76_spill] sm:$0xff] %v10779_v48  ;;  %v4611_v63 = vadd.f32 %v10753_v4, %v4441_v18  ;;  %v4721_v12 = vrot.slane %v10757_v15, 2  ;;  %v5002_v53 = vrot.slane %v10757_v15, 3  ;;  %v12958_v48 = vld [vmem:[#allocation55_spill] sm:$0xff] }
 0x362   :  { %12889 = vst [vmem:[#allocation71_spill] sm:$0xff] %v10791_v24  ;;  %v5170_v25 = vadd.f32 %v5001_v20, %v4889_v5  ;;  %v4442_v43 = vsel %vm4349_vm8, %v4440_v1, %v4441_v18  ;;  %v12892_v5 = vld [vmem:[#allocation78_spill] sm:$0xff] }
 0x363   :  { %v10802_v52 = vadd.f32 %v4722_v37, %v4611_v63  ;;  %v4723_v57 = vsel %vm4630_vm9, %v4721_v12, %v4722_v37  ;;  %v10809_v56 = vsel %vm4911_vm10, %v5002_v53, %v12344_v47  ;;  %v4610_v20 = vadd.f32 %v10757_v15, %v4442_v43  ;;  %v12895_v63 = vld [vmem:[#allocation81_spill] sm:$0xff]  ;;  %v12897_v18 = vld [vmem:[#allocation86_spill] sm:$0xff]  ;;  %v12900_v53 = vld [vmem:[#allocation87_spill] sm:$0xff] }
 0x364   :  { %v10811_v38 = vadd.f32 %v5282_v3, %v5170_v25  ;;  %v10816_v44 = vadd.f32 %v12892_v5, %v12891_v2  ;;  %v10820_v51 = vadd.f32 %v12895_v63, %v12894_v17  ;;  %v12898_v1 = vld [vmem:[#allocation82_spill] sm:$0xff]  ;;  %v12901_v3 = vld [vmem:[#allocation85_spill] sm:$0xff]  ;;  %v10832_v43 = vmul.f32 %v12848_v28, %v12902_v61 }
 0x365   :  { %v7905_v37 = vadd.f32 %v12898_v1, %v12897_v18  ;;  %v12899_v12 = vld [vmem:[#allocation14_spill] sm:$0xff]  ;;  %v7906_v25 = vadd.f32 %v12901_v3, %v12900_v53  ;;  %v10834_v2 = vadd.f32 %v4723_v57, %v4610_v20 }
 0x366   :  { %12890 = vst [vmem:[#allocation127_spill] sm:$0xff] %v10811_v38  ;;  %12893 = vst [vmem:[#allocation77_spill] sm:$0xff] %v10816_v44  ;;  %v10826_v62 = vmul.f32 %v12846_v58, %v12899_v12  ;;  %v4444_v5 = vrot.slane %v10816_v44, 1  ;;  %v4443_v63 = vrot.slane %v10820_v51, 1 }
 0x367   :  { %12896 = vst [vmem:[#allocation110_spill] sm:$0xff] %v10820_v51  ;;  %v4447_v57 = vrot.slane %v7905_v37, 1  ;;  %v4728_v20 = vrot.slane %v7905_v37, 2  ;;  %v5009_v26 = vrot.slane %v7905_v37, 3  ;;  %v5290_v55 = vrot.slane %v7905_v37, 4 }
 0x368   :  { %v10844_v53 = vadd.f32 %v10816_v44, %v4444_v5  ;;  %v4445_v61 = vsel %vm4349_vm8, %v4443_v63, %v4444_v5  ;;  %v5571_v14 = vrot.slane %v7905_v37, 5  ;;  %v5852_v18 = vrot.slane %v7905_v37, 6  ;;  %v12903_v63 = vld [vmem:[#allocation92_spill] sm:$0xff] }
 0x369   :  { %v10848_v3 = vadd.f32 %v10820_v51, %v4445_v61  ;;  %v4615_v47 = vadd.f32 %v7905_v37, %v4447_v57  ;;  %v4446_v58 = vrot.slane %v7906_v25, 1  ;;  %v4727_v17 = vrot.slane %v7906_v25, 2 }
 0x36a   :  { %v5008_v1 = vrot.slane %v7906_v25, 3  ;;  %v5289_v22 = vrot.slane %v7906_v25, 4  ;;  %v5570_v12 = vrot.slane %v7906_v25, 5  ;;  %v5851_v49 = vrot.slane %v7906_v25, 6 }
 0x36b   :  { %v4896_v23 = vadd.f32 %v4728_v20, %v4615_v47  ;;  %v4448_v30 = vsel %vm4349_vm8, %v4446_v58, %v4447_v57  ;;  %v4729_v5 = vsel %vm4630_vm9, %v4727_v17, %v4728_v20  ;;  %v7907_v61 = vadd.f32 %v12904_v32, %v12903_v63  ;;  %v12905_v32 = vld [vmem:[#allocation16_spill] sm:$0xff] }
 0x36c   :  { %v4614_v54 = vadd.f32 %v7906_v25, %v4448_v30  ;;  %v5010_v35 = vsel %vm4911_vm10, %v5008_v1, %v5009_v26  ;;  %v5291_v33 = vsel %vm5192_vm11, %v5289_v22, %v5290_v55  ;;  %v5572_v37 = vsel %vm5473_vm12, %v5570_v12, %v5571_v14  ;;  %v12906_v1 = vld [vmem:[#allocation94_spill] sm:$0xff]  ;;  %v12907_v22 = vld [vmem:[#allocation89_spill] sm:$0xff] }
 0x36d   :  { %v5177_v41 = vadd.f32 %v5009_v26, %v4896_v23  ;;  %v5853_v45 = vsel %vm5754_vm13, %v5851_v49, %v5852_v18  ;;  %v4450_v19 = vrot.slane %v7907_v61, 1  ;;  %v4731_v28 = vrot.slane %v7907_v61, 2  ;;  %v12908_v12 = vld [vmem:[#allocation22_spill] sm:$0xff]  ;;  %v12909_v49 = vld [vmem:[#allocation96_spill] sm:$0xff]  ;;  %v12910_v26 = vld [vmem:[#allocation93_spill] sm:$0xff] }
 0x36e   :  { %v4895_v47 = vadd.f32 %v4729_v5, %v4614_v54  ;;  %v5012_v10 = vrot.slane %v7907_v61, 3  ;;  %v5293_v58 = vrot.slane %v7907_v61, 4  ;;  %v5574_v57 = vrot.slane %v7907_v61, 5 }
 0x36f   :  { %v5458_v17 = vadd.f32 %v5290_v55, %v5177_v41  ;;  %v4617_v20 = vadd.f32 %v7907_v61, %v4450_v19  ;;  %v5855_v60 = vrot.slane %v7907_v61, 6  ;;  %v6214_v30 = vmul.f32 %v12850_v59, %v12905_v32  ;;  %v12911_v41 = vld [vmem:[#allocation95_spill] sm:$0xff]  ;;  %v12912_v61 = vld [vmem:[#allocation97_spill] sm:$0xff] }
 0x370   :  { %v5176_v25 = vadd.f32 %v5010_v35, %v4895_v47  ;;  %v7908_v63 = vadd.f32 %v12907_v22, %v12906_v1  ;;  %v10864_v23 = vmul.f32 %v12851_v46, %v12908_v12  ;;  %v10868_v54 = vadd.f32 %v12910_v26, %v12909_v49 }
 0x371   :  { %v5739_v5 = vadd.f32 %v5571_v14, %v5458_v17  ;;  %v4898_v36 = vadd.f32 %v4731_v28, %v4617_v20  ;;  %v10872_v55 = vadd.f32 %v12911_v41, %v10430_v27  ;;  %v10876_v35 = vadd.f32 %v12912_v61, %v10444_v39 }
 0x372   :  { %v5457_v47 = vadd.f32 %v5291_v33, %v5176_v25  ;;  %v4449_v32 = vrot.slane %v7908_v63, 1  ;;  %v4730_v1 = vrot.slane %v7908_v63, 2  ;;  %v5011_v22 = vrot.slane %v7908_v63, 3 }
 0x373   :  { %12913 = vst [vmem:[#allocation17_spill] sm:$0xff] %v10876_v35  ;;  %v6020_v46 = vadd.f32 %v5852_v18, %v5739_v5  ;;  %v5179_v12 = vadd.f32 %v5012_v10, %v4898_v36  ;;  %v5292_v59 = vrot.slane %v7908_v63, 4  ;;  %v5573_v29 = vrot.slane %v7908_v63, 5 }
 0x374   :  { %v5738_v49 = vadd.f32 %v5572_v37, %v5457_v47  ;;  %v4451_v14 = vsel %vm4349_vm8, %v4449_v32, %v4450_v19  ;;  %v4732_v17 = vsel %vm4630_vm9, %v4730_v1, %v4731_v28  ;;  %v5013_v27 = vsel %vm4911_vm10, %v5011_v22, %v5012_v10 }
 0x375   :  { %v6100_v20 = vmul.f32 0.020408163, %v6020_v46  ;;  %v5460_v26 = vadd.f32 %v5293_v58, %v5179_v12  ;;  %v4616_v41 = vadd.f32 %v7908_v63, %v4451_v14  ;;  %v5294_v39 = vsel %vm5192_vm11, %v5292_v59, %v5293_v58 }
 0x376   :  { %v6019_v33 = vadd.f32 %v5853_v45, %v5738_v49  ;;  %v5575_v25 = vsel %vm5473_vm12, %v5573_v29, %v5574_v57  ;;  %v5854_v61 = vrot.slane %v7908_v63, 6  ;;  %v4453_v36 = vrot.slane %v10868_v54, 1 }
 0x377   :  { %v6228_v18 = vsub.f32 %v6100_v20, %v10826_v62  ;;  %v5741_v37 = vadd.f32 %v5574_v57, %v5460_v26  ;;  %v4897_v5 = vadd.f32 %v4732_v17, %v4616_v41  ;;  %v4734_v19 = vrot.slane %v10868_v54, 2 }
 0x378   :  { %v6099_v28 = vmul.f32 0.020408163, %v6019_v33  ;;  %v5856_v10 = vsel %vm5754_vm13, %v5854_v61, %v5855_v60  ;;  %v4619_v46 = vadd.f32 %v10868_v54, %v4453_v36  ;;  %v5015_v12 = vrot.slane %v10868_v54, 3 }
 0x379   :  { %v6244_v59 = vmul.f32 1.0208334, %v6228_v18  ;;  %v6022_v45 = vadd.f32 %v5855_v60, %v5741_v37  ;;  %v5178_v58 = vadd.f32 %v5013_v27, %v4897_v5  ;;  %v5296_v29 = vrot.slane %v10868_v54, 4 }
 0x37a   :  { %v6227_v63 = vsub.f32 %v6099_v28, %v10832_v43  ;;  %v4900_v47 = vadd.f32 %v4734_v19, %v4619_v46  ;;  %v5577_v62 = vrot.slane %v10868_v54, 5  ;;  %v5858_v57 = vrot.slane %v10868_v54, 6 }
 0x37b   :  { %v6308_v32 = vmul.f32 2.0, %v6244_v59  ;;  %v6102_v1 = vmul.f32 0.020408163, %v6022_v45  ;;  %v5459_v22 = vadd.f32 %v5294_v39, %v5178_v58  ;;  %v4452_v49 = vrot.slane %v10872_v55, 1 }
 0x37c   :  { %v6243_v14 = vmul.f32 1.0208334, %v6227_v63  ;;  %v5181_v17 = vadd.f32 %v5015_v12, %v4900_v47  ;;  %v4733_v20 = vrot.slane %v10872_v55, 2  ;;  %v5014_v60 = vrot.slane %v10872_v55, 3 }
 0x37d   :  { %v10896_v27 = vadd.f32 0.0009, %v6308_v32  ;;  %v6230_v26 = vsub.f32 %v6102_v1, %v6214_v30  ;;  %v5740_v43 = vadd.f32 %v5575_v25, %v5459_v22  ;;  %v4454_v41 = vsel %vm4349_vm8, %v4452_v49, %v4453_v36 }
 0x37e   :  { %v6307_v33 = vmul.f32 2.0, %v6243_v14  ;;  %v5462_v61 = vadd.f32 %v5296_v29, %v5181_v17  ;;  %v4618_v54 = vadd.f32 %v10872_v55, %v4454_v41  ;;  %v4735_v39 = vsel %vm4630_vm9, %v4733_v20, %v4734_v19 }
 0x37f   :  { %12914 = vst [vmem:[#allocation18_spill] sm:$0xff] %v10896_v27  ;;  %v6246_v18 = vmul.f32 1.0208334, %v6230_v26  ;;  %v6021_v37 = vadd.f32 %v5856_v10, %v5740_v43  ;;  %v5016_v5 = vsel %vm4911_vm10, %v5014_v60, %v5015_v12  ;;  %v5295_v28 = vrot.slane %v10872_v55, 4  ;;  %v12919_v43 = vld [vmem:[#allocation99_spill] sm:$0xff]  ;;  %v12952_v27 = vld [vmem:[#allocation112_spill] sm:$0xff] }
 0x380   :  { %v10903_v46 = vadd.f32 0.0009, %v6307_v33  ;;  %v5743_v59 = vadd.f32 %v5577_v62, %v5462_v61  ;;  %v4899_v45 = vadd.f32 %v4735_v39, %v4618_v54  ;;  %v5576_v30 = vrot.slane %v10872_v55, 5 }
 0x381   :  { %v10906_v25 = vmul.f32 2.0, %v6246_v18  ;;  %v6101_v36 = vmul.f32 0.020408163, %v6021_v37  ;;  %v5297_v58 = vsel %vm5192_vm11, %v5295_v28, %v5296_v29  ;;  %v5857_v63 = vrot.slane %v10872_v55, 6 }
 0x382   :  { %12915 = vst [vmem:[#allocation21_spill] sm:$0xff] %v10903_v46  ;;  %v6024_v19 = vadd.f32 %v5858_v57, %v5743_v59  ;;  %v5180_v47 = vadd.f32 %v5016_v5, %v4899_v45  ;;  %v5578_v10 = vsel %vm5473_vm12, %v5576_v30, %v5577_v62  ;;  %v4456_v12 = vrot.slane %v10876_v35, 1 }
 0x383   :  { %12916 = vst [vmem:[#allocation64_spill] sm:$0xff] %v10906_v25  ;;  %v6229_v32 = vsub.f32 %v6101_v36, %v10864_v23  ;;  %v5859_v1 = vsel %vm5754_vm13, %v5857_v63, %v5858_v57  ;;  %v4737_v22 = vrot.slane %v10876_v35, 2  ;;  %v5018_v49 = vrot.slane %v10876_v35, 3  ;;  %v12954_v25 = vld [vmem:[#allocation113_spill] sm:$0xff] }
 0x384   :  { %v10916_v14 = vmul.f32 0.020408163, %v6024_v19  ;;  %v5461_v17 = vadd.f32 %v5297_v58, %v5180_v47  ;;  %v4621_v29 = vadd.f32 %v10876_v35, %v4456_v12  ;;  %v5299_v55 = vrot.slane %v10876_v35, 4 }
 0x385   :  { %v10920_v20 = vmul.f32 1.0208334, %v6229_v32  ;;  %v5580_v62 = vrot.slane %v10876_v35, 5  ;;  %v12355_v60 = vrot.slane %v10876_v35, 6  ;;  %v7912_v23 = vadd.f32 %v10442_v9, %v10458_v50 }
 0x386   :  { %12917 = vst [vmem:[#allocation57_spill] sm:$0xff] %v10916_v14  ;;  %v5742_v57 = vadd.f32 %v5578_v10, %v5461_v17  ;;  %v4902_v26 = vadd.f32 %v4737_v22, %v4621_v29  ;;  %v10928_v41 = vadd.f32 %v12919_v43, %v10475_v21  ;;  %v10932_v33 = vadd.f32 %v10473_v40, %v10483_v16 }
 0x387   :  { %12918 = vst [vmem:[#allocation52_spill] sm:$0xff] %v10920_v20  ;;  %v4455_v61 = vrot.slane %v7912_v23, 1  ;;  %v4736_v54 = vrot.slane %v7912_v23, 2  ;;  %v5017_v39 = vrot.slane %v7912_v23, 3  ;;  %v5298_v18 = vrot.slane %v7912_v23, 4 }
 0x388   :  { %12920 = vst [vmem:[#allocation62_spill] sm:$0xff] %v10928_v41  ;;  %12921 = vst [vmem:[#allocation56_spill] sm:$0xff] %v10932_v33  ;;  %v6023_v37 = vadd.f32 %v5859_v1, %v5742_v57  ;;  %v5183_v5 = vadd.f32 %v5018_v49, %v4902_v26  ;;  %v5579_v28 = vrot.slane %v7912_v23, 5  ;;  %v5860_v59 = vrot.slane %v7912_v23, 6 }
 0x389   :  { %v4457_v9 = vsel %vm4349_vm8, %v4455_v61, %v4456_v12  ;;  %v4738_v50 = vsel %vm4630_vm9, %v4736_v54, %v4737_v22  ;;  %v5019_v45 = vsel %vm4911_vm10, %v5017_v39, %v5018_v49  ;;  %v5300_v21 = vsel %vm5192_vm11, %v5298_v18, %v5299_v55 }
 0x38a   :  { %v10938_v30 = vmul.f32 0.020408163, %v6023_v37  ;;  %v5464_v40 = vadd.f32 %v5299_v55, %v5183_v5  ;;  %v4620_v16 = vadd.f32 %v7912_v23, %v4457_v9  ;;  %v5581_v36 = vsel %vm5473_vm12, %v5579_v28, %v5580_v62  ;;  %v12929_v9 = vld [vmem:[#allocation104_spill] sm:$0xff] }
 0x38b   :  { %v10944_v58 = vsel %vm5754_vm13, %v5860_v59, %v12355_v60  ;;  %v4459_v63 = vrot.slane %v10928_v41, 1  ;;  %v4740_v19 = vrot.slane %v10928_v41, 2  ;;  %v5021_v47 = vrot.slane %v10928_v41, 3  ;;  %v12928_v59 = vld [vmem:[#allocation106_spill] sm:$0xff] }
 0x38c   :  { %12922 = vst [vmem:[#allocation65_spill] sm:$0xff] %v10938_v30  ;;  %12923 = vst [vmem:[#allocation58_spill] sm:$0xff] %v10944_v58  ;;  %v10949_v10 = vadd.f32 %v5580_v62, %v5464_v40  ;;  %v4901_v12 = vadd.f32 %v4738_v50, %v4620_v16  ;;  %v12356_v32 = vrot.slane %v10928_v41, 4  ;;  %v4458_v49 = vrot.slane %v10932_v33, 1  ;;  %v12933_v40 = vld [vmem:[#allocation115_spill] sm:$0xff]  ;;  %v12961_v58 = vld [vmem:[#allocation49_spill] sm:$0xff] }
 0x38d   :  { %v4623_v22 = vadd.f32 %v10928_v41, %v4459_v63  ;;  %v4739_v17 = vrot.slane %v10932_v33, 2  ;;  %v5020_v29 = vrot.slane %v10932_v33, 3  ;;  %v5301_v23 = vrot.slane %v10932_v33, 4 }
 0x38e   :  { %12924 = vst [vmem:[#allocation69_spill] sm:$0xff] %v10949_v10  ;;  %v5182_v55 = vadd.f32 %v5019_v45, %v4901_v12  ;;  %v4460_v43 = vsel %vm4349_vm8, %v4458_v49, %v4459_v63  ;;  %v10971_v5 = vadd.f32 %v10481_v7, %v10490_v34  ;;  %v10977_v50 = vadd.f32 %v12929_v9, %v12928_v59  ;;  %v12931_v45 = vld [vmem:[#allocation105_spill] sm:$0xff]  ;;  %v12938_v9 = vld [vmem:[#allocation116_spill] sm:$0xff] }
 0x38f   :  { %v4904_v26 = vadd.f32 %v4740_v19, %v4623_v22  ;;  %v4741_v61 = vsel %vm4630_vm9, %v4739_v17, %v4740_v19  ;;  %v5022_v54 = vsel %vm4911_vm10, %v5020_v29, %v5021_v47  ;;  %v4622_v18 = vadd.f32 %v10932_v33, %v4460_v43  ;;  %v12937_v59 = vld [vmem:[#allocation121_spill] sm:$0xff] }
 0x390   :  { %v5463_v39 = vadd.f32 %v5300_v21, %v5182_v55  ;;  %v10967_v37 = vsel %vm5192_vm11, %v5301_v23, %v12356_v32  ;;  %12926 = vst [vmem:[#allocation73_spill] sm:$0xff] %v10971_v5  ;;  %12930 = vst [vmem:[#allocation72_spill] sm:$0xff] %v10977_v50  ;;  %v10981_v21 = vadd.f32 %v12931_v45, %v10524_v0  ;;  %v4462_v7 = vrot.slane %v10971_v5, 1  ;;  %v12944_v23 = vld [vmem:[#allocation54_spill] sm:$0xff] }
 0x391   :  { %12925 = vst [vmem:[#allocation63_spill] sm:$0xff] %v10967_v37  ;;  %v10973_v28 = vadd.f32 %v5021_v47, %v4904_v26  ;;  %v10985_v16 = vadd.f32 %v12933_v40, %v10531_v42  ;;  %v4903_v19 = vadd.f32 %v4741_v61, %v4622_v18  ;;  %v4743_v34 = vrot.slane %v10971_v5, 2  ;;  %v12940_v40 = vld [vmem:[#allocation124_spill] sm:$0xff]  ;;  %v12948_v18 = vld [vmem:[#allocation34_spill] sm:$0xff] }
 0x392   :  { %12932 = vst [vmem:[#allocation74_spill] sm:$0xff] %v10981_v21  ;;  %v10987_v63 = vadd.f32 %v5581_v36, %v5463_v39  ;;  %v4461_v12 = vrot.slane %v10977_v50, 1  ;;  %v4742_v22 = vrot.slane %v10977_v50, 2  ;;  %v4625_v42 = vadd.f32 %v10971_v5, %v4462_v7  ;;  %v12950_v36 = vld [vmem:[#allocation38_spill] sm:$0xff] }
 0x393   :  { %12927 = vst [vmem:[#allocation68_spill] sm:$0xff] %v10973_v28  ;;  %12934 = vst [vmem:[#allocation79_spill] sm:$0xff] %v10985_v16  ;;  %v10995_v49 = vadd.f32 %v5022_v54, %v4903_v19  ;;  %v4465_v26 = vrot.slane %v10981_v21, 1  ;;  %v4464_v61 = vrot.slane %v10985_v16, 1  ;;  %v4745_v54 = vrot.slane %v10985_v16, 2  ;;  %v12941_v19 = vld [vmem:[#allocation118_spill] sm:$0xff] }
 0x394   :  { %12935 = vst [vmem:[#allocation83_spill] sm:$0xff] %v10987_v63  ;;  %v4463_v29 = vsel %vm4349_vm8, %v4461_v12, %v4462_v7  ;;  %v4744_v55 = vsel %vm4630_vm9, %v4742_v22, %v4743_v34  ;;  %v5026_v39 = vrot.slane %v10985_v16, 3  ;;  %v11011_v45 = vadd.f32 %v12938_v9, %v12937_v59  ;;  %v12943_v12 = vld [vmem:[#allocation41_spill] sm:$0xff] }
 0x395   :  { %12936 = vst [vmem:[#allocation78_spill] sm:$0xff] %v10995_v49  ;;  %v4624_v43 = vadd.f32 %v10977_v50, %v4463_v29  ;;  %v11015_v7 = vadd.f32 %v12941_v19, %v12940_v40  ;;  %v4396_v22 = vrot.slane %v12943_v12, 1  ;;  %v4466_v29 = vsel %vm4349_vm8, %v4464_v61, %v4465_v26  ;;  %v12946_v40 = vld [vmem:[#allocation42_spill] sm:$0xff]  ;;  %v12964_v63 = vld [vmem:[#allocation61_spill] sm:$0xff]  ;;  %v12969_v49 = vld [vmem:[#allocation132_spill] sm:$0xff] }
 0x396   :  { %12939 = vst [vmem:[#allocation84_spill] sm:$0xff] %v11011_v45  ;;  %v12945_v62 = vrot.slane %v12944_v23, 1  ;;  %v4627_v57 = vadd.f32 %v10981_v21, %v4465_v26  ;;  %v4626_v1 = vadd.f32 %v10985_v16, %v4466_v29  ;;  %v12947_v19 = vrot.slane %v12946_v40, 1  ;;  %v12968_v28 = vld [vmem:[#allocation133_spill] sm:$0xff]  ;;  %v12986_v16 = vld [vmem:[#allocation60_spill] sm:$0xff] }
 0x397   :  { %12942 = vst [vmem:[#allocation81_spill] sm:$0xff] %v11015_v7  ;;  %v11018_v60 = vadd.f32 %v4744_v55, %v4624_v43  ;;  %v4467_v59 = vrot.slane %v11015_v7, 1  ;;  %v4748_v9 = vrot.slane %v11015_v7, 2  ;;  %v4468_v55 = vrot.slane %v11011_v45, 1 }
 0x398   :  { %v4565_v17 = vadd.f32 %v12944_v23, %v12945_v62  ;;  %v4397_v32 = vsel %vm4349_vm8, %v12947_v19, %v4396_v22  ;;  %v4581_v61 = vadd.f32 %v12943_v12, %v4396_v22  ;;  %v4653_v62 = vrot.slane %v12944_v23, 2 }
 0x399   :  { %v4580_v43 = vadd.f32 %v12946_v40, %v4397_v32  ;;  %v12949_v26 = vrot.slane %v12948_v18, 2  ;;  %v12951_v29 = vrot.slane %v12950_v36, 2  ;;  %v4677_v47 = vrot.slane %v12943_v12, 2 }
 0x39a   :  { %v12953_v46 = vrot.slane %v12952_v27, 2  ;;  %v12955_v19 = vrot.slane %v12954_v25, 2  ;;  %v12956_v32 = vrot.slane %v10816_v44, 2  ;;  %v12957_v22 = vrot.slane %v10820_v51, 2 }
 0x39b   :  { %v4675_v0 = vsel %vm4630_vm9, %v12951_v29, %v12949_v26  ;;  %v4469_v30 = vsel %vm4349_vm8, %v4467_v59, %v4468_v55  ;;  %v4629_v31 = vadd.f32 %v11011_v45, %v4468_v55  ;;  %v12959_v26 = vrot.slane %v12958_v48, 2 }
 0x39c   :  { %v4702_v20 = vsel %vm4630_vm9, %v12955_v19, %v12953_v46  ;;  %v4726_v14 = vsel %vm4630_vm9, %v12957_v22, %v12956_v32  ;;  %v4746_v13 = vrot.slane %v10981_v21, 2  ;;  %v4628_v35 = vadd.f32 %v11015_v7, %v4469_v30  ;;  %v12962_v32 = vld [vmem:[#allocation40_spill] sm:$0xff] }
 0x39d   :  { %v4654_v29 = vsel %vm4630_vm9, %v12959_v26, %v4653_v62  ;;  %v12960_v46 = vrot.slane %v12946_v40, 2  ;;  %v4749_v10 = vrot.slane %v11011_v45, 2  ;;  %v12963_v22 = vrot.slane %v12962_v32, 2  ;;  %v12965_v26 = vld [vmem:[#allocation51_spill] sm:$0xff]  ;;  %v12966_v30 = vld [vmem:[#allocation48_spill] sm:$0xff] }
 0x39e   :  { %v4747_v55 = vsel %vm4630_vm9, %v4745_v54, %v4746_v13  ;;  %v4845_v6 = vadd.f32 %v4654_v29, %v12964_v63  ;;  %v4846_v11 = vadd.f32 %v4653_v62, %v4565_v17  ;;  %v4859_v24 = vadd.f32 %v4675_v0, %v12965_v26 }
 0x39f   :  { %v4678_v19 = vsel %vm4630_vm9, %v12960_v46, %v4677_v47  ;;  %v4844_v59 = vadd.f32 %v12963_v22, %v12961_v58  ;;  %v4750_v8 = vsel %vm4630_vm9, %v4748_v9, %v4749_v10  ;;  %v12967_v38 = vrot.slane %v12948_v18, 2 }
 0x3a0   :  { %v4861_v46 = vadd.f32 %v4678_v19, %v4580_v43  ;;  %v4862_v41 = vadd.f32 %v4677_v47, %v4581_v61  ;;  %v4877_v37 = vadd.f32 %v4702_v20, %v12968_v28  ;;  %v12970_v58 = vrot.slane %v12952_v27, 2  ;;  %v12973_v47 = vld [vmem:[#allocation53_spill] sm:$0xff] }
 0x3a1   :  { %v4860_v33 = vadd.f32 %v12967_v38, %v12966_v30  ;;  %v4893_v54 = vadd.f32 %v4726_v14, %v10848_v3  ;;  %v12971_v63 = vrot.slane %v10816_v44, 2  ;;  %v4906_v17 = vadd.f32 %v4743_v34, %v4625_v42  ;;  %v12977_v3 = vld [vmem:[#allocation33_spill] sm:$0xff] }
 0x3a2   :  { %v4878_v22 = vadd.f32 %v12970_v58, %v12969_v49  ;;  %v4907_v9 = vadd.f32 %v4747_v55, %v4626_v1  ;;  %v4908_v62 = vadd.f32 %v4746_v13, %v4627_v57  ;;  %v4909_v29 = vadd.f32 %v4750_v8, %v4628_v35  ;;  %v12975_v49 = vld [vmem:[#allocation120_spill] sm:$0xff] }
 0x3a3   :  { %v4894_v0 = vadd.f32 %v12971_v63, %v10844_v53  ;;  %v4910_v26 = vadd.f32 %v4749_v10, %v4629_v31  ;;  %v12972_v38 = vrot.slane %v12962_v32, 3  ;;  %v12974_v43 = vrot.slane %v12973_v47, 3 }
 0x3a4   :  { %v4934_v28 = vrot.slane %v12944_v23, 3  ;;  %v12976_v61 = vrot.slane %v12975_v49, 3  ;;  %v12978_v14 = vrot.slane %v12977_v3, 3  ;;  %v4955_v53 = vrot.slane %v12948_v18, 3 }
 0x3a5   :  { %v4932_v20 = vsel %vm4911_vm10, %v12974_v43, %v12972_v38  ;;  %v4958_v13 = vrot.slane %v12943_v12, 3  ;;  %v4982_v31 = vrot.slane %v12952_v27, 3  ;;  %v5006_v8 = vrot.slane %v10816_v44, 3  ;;  %v12992_v27 = vld [vmem:[#allocation129_spill] sm:$0xff]  ;;  %v12994_v12 = vld [vmem:[#allocation111_spill] sm:$0xff] }
 0x3a6   :  { %v4953_v19 = vsel %vm4911_vm10, %v12978_v14, %v12976_v61  ;;  %v12979_v35 = vrot.slane %v12958_v48, 3  ;;  %v12980_v1 = vrot.slane %v10971_v5, 3  ;;  %v12981_v57 = vrot.slane %v10977_v50, 3 }
 0x3a7   :  { %v5027_v42 = vrot.slane %v10981_v21, 3  ;;  %v5029_v55 = vrot.slane %v11015_v7, 3  ;;  %v12982_v30 = vrot.slane %v12950_v36, 3  ;;  %v12983_v63 = vrot.slane %v12946_v40, 3 }
 0x3a8   :  { %v4935_v10 = vsel %vm4911_vm10, %v12979_v35, %v4934_v28  ;;  %v5025_v34 = vsel %vm4911_vm10, %v12981_v57, %v12980_v1  ;;  %v12984_v43 = vrot.slane %v12954_v25, 3  ;;  %v12985_v14 = vrot.slane %v10820_v51, 3  ;;  %v12989_v25 = vld [vmem:[#allocation44_spill] sm:$0xff] }
 0x3a9   :  { %v4956_v58 = vsel %vm4911_vm10, %v12982_v30, %v4955_v53  ;;  %v4959_v38 = vsel %vm4911_vm10, %v12983_v63, %v4958_v13  ;;  %v5028_v1 = vsel %vm4911_vm10, %v5026_v39, %v5027_v42  ;;  %v5030_v57 = vrot.slane %v11011_v45, 3  ;;  %v12988_v63 = vld [vmem:[#allocation50_spill] sm:$0xff]  ;;  %v12991_v45 = vld [vmem:[#allocation131_spill] sm:$0xff] }
 0x3aa   :  { %v4983_v61 = vsel %vm4911_vm10, %v12984_v43, %v4982_v31  ;;  %v5007_v35 = vsel %vm4911_vm10, %v12985_v14, %v5006_v8  ;;  %v5124_v50 = vadd.f32 %v4932_v20, %v12986_v16  ;;  %v12987_v30 = vrot.slane %v12962_v32, 3  ;;  %v12993_v20 = vld [vmem:[#allocation128_spill] sm:$0xff] }
 0x3ab   :  { %v5126_v21 = vadd.f32 %v4935_v10, %v4845_v6  ;;  %v5127_v44 = vadd.f32 %v4934_v28, %v4846_v11  ;;  %v5138_v15 = vadd.f32 %v4953_v19, %v12988_v63  ;;  %v12990_v43 = vrot.slane %v12975_v49, 3 }
 0x3ac   :  { %v5125_v7 = vadd.f32 %v12987_v30, %v4844_v59  ;;  %v5031_v51 = vsel %vm4911_vm10, %v5029_v55, %v5030_v57  ;;  %v5140_v14 = vadd.f32 %v4956_v58, %v4859_v24  ;;  %v5141_v48 = vadd.f32 %v4955_v53, %v4860_v33 }
 0x3ad   :  { %v5139_v36 = vadd.f32 %v12990_v43, %v12989_v25  ;;  %v5142_v39 = vadd.f32 %v4959_v38, %v4861_v46  ;;  %v5143_v47 = vadd.f32 %v4958_v13, %v4862_v41  ;;  %v5156_v16 = vadd.f32 %v12992_v27, %v12991_v45  ;;  %v13013_v43 = vld [vmem:[#allocation38_spill] sm:$0xff] }
 0x3ae   :  { %v12995_v59 = vrot.slane %v12994_v12, 3  ;;  %v5158_v11 = vadd.f32 %v4983_v61, %v4877_v37  ;;  %v5159_v28 = vadd.f32 %v4982_v31, %v4878_v22  ;;  %v5172_v19 = vadd.f32 %v10809_v56, %v10834_v2  ;;  %v12998_v37 = vld [vmem:[#allocation36_spill] sm:$0xff]  ;;  %v13000_v31 = vld [vmem:[#allocation39_spill] sm:$0xff]  ;;  %v13009_v61 = vld [vmem:[#allocation53_spill] sm:$0xff] }
 0x3af   :  { %v12996_v25 = vrot.slane %v10753_v4, 3  ;;  %v5174_v24 = vadd.f32 %v5007_v35, %v4893_v54  ;;  %v5175_v33 = vadd.f32 %v5006_v8, %v4894_v0  ;;  %v5186_v41 = vadd.f32 %v5025_v34, %v11018_v60 }
 0x3b0   :  { %v5157_v6 = vadd.f32 %v12995_v59, %v12993_v20  ;;  %v12997_v46 = vrot.slane %v10971_v5, 3  ;;  %v5188_v45 = vadd.f32 %v5028_v1, %v4907_v9  ;;  %v5189_v53 = vadd.f32 %v5027_v42, %v4908_v62  ;;  %v13004_v9 = vld [vmem:[#allocation41_spill] sm:$0xff]  ;;  %v13008_v42 = vld [vmem:[#allocation112_spill] sm:$0xff] }
 0x3b1   :  { %v5173_v10 = vadd.f32 %v12996_v25, %v10802_v52  ;;  %v5190_v13 = vadd.f32 %v5031_v51, %v4909_v29  ;;  %v5191_v55 = vadd.f32 %v5030_v57, %v4910_v26  ;;  %v12999_v22 = vrot.slane %v12998_v37, 4  ;;  %v13006_v26 = vld [vmem:[#allocation109_spill] sm:$0xff]  ;;  %v13011_v57 = vld [vmem:[#allocation55_spill] sm:$0xff] }
 0x3b2   :  { %v5187_v27 = vadd.f32 %v12997_v46, %v4906_v17  ;;  %v13001_v58 = vrot.slane %v13000_v31, 4  ;;  %v5212_v2 = vrot.slane %v12962_v32, 4  ;;  %v5215_v52 = vrot.slane %v12944_v23, 4  ;;  %v13016_v46 = vld [vmem:[#allocation151_spill] sm:$0xff]  ;;  %v13036_v32 = vld [vmem:[#allocation28_spill] sm:$0xff] }
 0x3b3   :  { %v13002_v54 = vrot.slane %v12975_v49, 4  ;;  %v13003_v60 = vrot.slane %v12977_v3, 4  ;;  %v5236_v17 = vrot.slane %v12948_v18, 4  ;;  %v5238_v51 = vrot.slane %v12946_v40, 4  ;;  %v13022_v3 = vld [vmem:[#allocation81_spill] sm:$0xff]  ;;  %v13024_v40 = vld [vmem:[#allocation59_spill] sm:$0xff] }
 0x3b4   :  { %v5210_v56 = vsel %vm5192_vm11, %v13001_v58, %v12999_v22  ;;  %v5239_v62 = vrot.slane %v13004_v9, 4  ;;  %v13005_v29 = vrot.slane %v12994_v12, 4  ;;  %v13007_v8 = vrot.slane %v13006_v26, 4  ;;  %v13023_v9 = vld [vmem:[#allocation84_spill] sm:$0xff] }
 0x3b5   :  { %v5234_v0 = vsel %vm5192_vm11, %v13003_v60, %v13002_v54  ;;  %v5263_v38 = vrot.slane %v13008_v42, 4  ;;  %v13010_v35 = vrot.slane %v13009_v61, 4  ;;  %v13012_v30 = vrot.slane %v13011_v57, 4  ;;  %v13018_v60 = vld [vmem:[#allocation113_spill] sm:$0xff]  ;;  %v13021_v42 = vld [vmem:[#allocation74_spill] sm:$0xff] }
 0x3b6   :  { %v5261_v34 = vsel %vm5192_vm11, %v13007_v8, %v13005_v29  ;;  %v13014_v20 = vrot.slane %v13013_v43, 4  ;;  %v13015_v25 = vrot.slane %v10753_v4, 4  ;;  %v13017_v22 = vrot.slane %v13016_v46, 4 }
 0x3b7   :  { %v5213_v1 = vsel %vm5192_vm11, %v13010_v35, %v5212_v2  ;;  %v5216_v63 = vsel %vm5192_vm11, %v13012_v30, %v5215_v52  ;;  %v5240_v54 = vsel %vm5192_vm11, %v5238_v51, %v5239_v62  ;;  %v13019_v29 = vrot.slane %v13018_v60, 4  ;;  %v13020_v35 = vld [vmem:[#allocation77_spill] sm:$0xff]  ;;  %v13028_v60 = vld [vmem:[#allocation72_spill] sm:$0xff] }
 0x3b8   :  { %v5237_v59 = vsel %vm5192_vm11, %v13014_v20, %v5236_v17  ;;  %v5285_v58 = vsel %vm5192_vm11, %v13017_v22, %v13015_v25  ;;  %v5287_v26 = vrot.slane %v13020_v35, 4  ;;  %v5305_v30 = vrot.slane %v10971_v5, 4  ;;  %v13026_v25 = vld [vmem:[#allocation110_spill] sm:$0xff]  ;;  %v13030_v35 = vld [vmem:[#allocation47_spill] sm:$0xff] }
 0x3b9   :  { %v5264_v8 = vsel %vm5192_vm11, %v13019_v29, %v5263_v38  ;;  %v5308_v43 = vrot.slane %v13021_v42, 4  ;;  %v5310_v20 = vrot.slane %v13022_v3, 4  ;;  %v5311_v61 = vrot.slane %v13023_v9, 4  ;;  %v13033_v3 = vld [vmem:[#allocation79_spill] sm:$0xff] }
 0x3ba   :  { %v11185_v46 = vadd.f32 %v5210_v56, %v13024_v40  ;;  %v13027_v22 = vrot.slane %v13026_v25, 4  ;;  %v13029_v18 = vrot.slane %v13028_v60, 4  ;;  %v13031_v5 = vrot.slane %v12998_v37, 4 }
 0x3bb   :  { %v11196_v42 = vadd.f32 %v5213_v1, %v5124_v50  ;;  %v13034_v57 = vrot.slane %v13033_v3, 4  ;;  %v5312_v40 = vsel %vm5192_vm11, %v5310_v20, %v5311_v61  ;;  %v5406_v56 = vadd.f32 %v5212_v2, %v5125_v7 }
 0x3bc   :  { %13025 = vst [vmem:[#allocation86_spill] sm:$0xff] %v11185_v46  ;;  %v5288_v51 = vsel %vm5192_vm11, %v13027_v22, %v5287_v26  ;;  %v5306_v29 = vsel %vm5192_vm11, %v13029_v18, %v5305_v30  ;;  %v5404_v23 = vadd.f32 %v13031_v5, %v13030_v35  ;;  %v5407_v46 = vadd.f32 %v5216_v63, %v5126_v21  ;;  %v13035_v22 = vld [vmem:[#allocation37_spill] sm:$0xff]  ;;  %v13056_v63 = vld [vmem:[#allocation40_spill] sm:$0xff] }
 0x3bd   :  { %13032 = vst [vmem:[#allocation82_spill] sm:$0xff] %v11196_v42  ;;  %v5309_v9 = vsel %vm5192_vm11, %v13034_v57, %v5308_v43  ;;  %v5408_v25 = vadd.f32 %v5215_v52, %v5127_v44  ;;  %v5417_v60 = vadd.f32 %v13036_v32, %v13035_v22  ;;  %v5419_v31 = vadd.f32 %v5234_v0, %v5138_v15  ;;  %v13039_v15 = vld [vmem:[#allocation150_spill] sm:$0xff] }
 0x3be   :  { %v13037_v18 = vrot.slane %v12975_v49, 4  ;;  %v5421_v37 = vadd.f32 %v5237_v59, %v5140_v14  ;;  %v5422_v5 = vadd.f32 %v5236_v17, %v5141_v48  ;;  %v5423_v50 = vadd.f32 %v5240_v54, %v5142_v39  ;;  %v13042_v14 = vld [vmem:[#allocation63_spill] sm:$0xff]  ;;  %v13052_v17 = vld [vmem:[#allocation36_spill] sm:$0xff] }
 0x3bf   :  { %v5424_v1 = vadd.f32 %v5239_v62, %v5143_v47  ;;  %v11206_v35 = vadd.f32 %v5261_v34, %v5156_v16  ;;  %v13038_v57 = vrot.slane %v12994_v12, 4  ;;  %v11212_v7 = vadd.f32 %v5264_v8, %v5158_v11  ;;  %v13041_v47 = vld [vmem:[#allocation78_spill] sm:$0xff]  ;;  %v13043_v16 = vld [vmem:[#allocation68_spill] sm:$0xff] }
 0x3c0   :  { %v5420_v4 = vadd.f32 %v13037_v18, %v5139_v36  ;;  %v11214_v44 = vadd.f32 %v5263_v38, %v5159_v28  ;;  %v11216_v21 = vadd.f32 %v5285_v58, %v5172_v19  ;;  %v13040_v32 = vrot.slane %v13039_v15, 4  ;;  %v13067_v18 = vld [vmem:[#allocation41_spill] sm:$0xff] }
 0x3c1   :  { %v11210_v42 = vadd.f32 %v13038_v57, %v5157_v6  ;;  %v11222_v36 = vadd.f32 %v5288_v51, %v5174_v24  ;;  %v11224_v48 = vadd.f32 %v5287_v26, %v5175_v33  ;;  %v11228_v39 = vadd.f32 %v13042_v14, %v13041_v47  ;;  %v13044_v6 = vld [vmem:[#allocation62_spill] sm:$0xff]  ;;  %v13054_v26 = vld [vmem:[#allocation39_spill] sm:$0xff]  ;;  %v13065_v51 = vld [vmem:[#allocation53_spill] sm:$0xff] }
 0x3c2   :  { %v11220_v2 = vadd.f32 %v13040_v32, %v5173_v10  ;;  %v13045_v11 = vrot.slane %v13044_v6, 4  ;;  %v11235_v28 = vadd.f32 %v5306_v29, %v5186_v41  ;;  %v11237_v19 = vadd.f32 %v5305_v30, %v5187_v27  ;;  %v13057_v41 = vld [vmem:[#allocation55_spill] sm:$0xff]  ;;  %v13058_v27 = vld [vmem:[#allocation54_spill] sm:$0xff]  ;;  %v13068_v47 = vld [vmem:[#allocation33_spill] sm:$0xff] }
 0x3c3   :  { %v11239_v0 = vadd.f32 %v5309_v9, %v5188_v45  ;;  %v11241_v10 = vadd.f32 %v5308_v43, %v5189_v53  ;;  %v11243_v24 = vadd.f32 %v5312_v40, %v5190_v13  ;;  %v11245_v33 = vadd.f32 %v5311_v61, %v5191_v55  ;;  %v13059_v45 = vld [vmem:[#allocation114_spill] sm:$0xff]  ;;  %v13061_v53 = vld [vmem:[#allocation119_spill] sm:$0xff] }
 0x3c4   :  { %v11233_v52 = vadd.f32 %v13045_v11, %v13043_v16  ;;  %13046 = vst [vmem:[#allocation14_spill] sm:$0xff] %v11235_v28  ;;  %13047 = vst [vmem:[#allocation87_spill] sm:$0xff] %v11237_v19  ;;  %v13053_v62 = vrot.slane %v13052_v17, 5  ;;  %v13055_v34 = vrot.slane %v13054_v26, 5  ;;  %v5493_v59 = vrot.slane %v13056_v63, 5  ;;  %v13063_v61 = vld [vmem:[#allocation34_spill] sm:$0xff] }
 0x3c5   :  { %13048 = vst [vmem:[#allocation85_spill] sm:$0xff] %v11239_v0  ;;  %13049 = vst [vmem:[#allocation15_spill] sm:$0xff] %v11241_v10  ;;  %v5495_v58 = vrot.slane %v13057_v41, 5  ;;  %v5496_v54 = vrot.slane %v13058_v27, 5  ;;  %v13060_v9 = vrot.slane %v13059_v45, 5  ;;  %v13062_v43 = vrot.slane %v13061_v53, 5 }
 0x3c6   :  { %13050 = vst [vmem:[#allocation92_spill] sm:$0xff] %v11243_v24  ;;  %13051 = vst [vmem:[#allocation88_spill] sm:$0xff] %v11245_v33  ;;  %v5491_v38 = vsel %vm5473_vm12, %v13055_v34, %v13053_v62  ;;  %v5514_v55 = vrot.slane %v12975_v49, 5  ;;  %v5517_v8 = vrot.slane %v13063_v61, 5  ;;  %v13064_v30 = vld [vmem:[#allocation42_spill] sm:$0xff]  ;;  %v13066_v29 = vrot.slane %v13065_v51, 5 }
 0x3c7   :  { %v5512_v13 = vsel %vm5473_vm12, %v13062_v43, %v13060_v9  ;;  %v5519_v20 = vrot.slane %v13064_v30, 5  ;;  %v5497_v22 = vsel %vm5473_vm12, %v5495_v58, %v5496_v54  ;;  %v5520_v57 = vrot.slane %v13067_v18, 5  ;;  %v13070_v11 = vld [vmem:[#allocation38_spill] sm:$0xff]  ;;  %v13072_v9 = vld [vmem:[#allocation112_spill] sm:$0xff]  ;;  %v13073_v51 = vld [vmem:[#allocation109_spill] sm:$0xff] }
 0x3c8   :  { %v5494_v40 = vsel %vm5473_vm12, %v13066_v29, %v5493_v59  ;;  %v5541_v32 = vrot.slane %v12994_v12, 5  ;;  %v13069_v14 = vrot.slane %v13068_v47, 5  ;;  %v13071_v62 = vrot.slane %v13070_v11, 5  ;;  %v13075_v61 = vld [vmem:[#allocation77_spill] sm:$0xff]  ;;  %v13077_v49 = vld [vmem:[#allocation56_spill] sm:$0xff]  ;;  %v13081_v53 = vld [vmem:[#allocation151_spill] sm:$0xff] }
 0x3c9   :  { %v5544_v43 = vrot.slane %v13072_v9, 5  ;;  %v5565_v30 = vrot.slane %v13039_v15, 5  ;;  %v5521_v29 = vsel %vm5473_vm12, %v5519_v20, %v5520_v57  ;;  %v13074_v58 = vrot.slane %v13073_v51, 5  ;;  %v13079_v26 = vld [vmem:[#allocation113_spill] sm:$0xff]  ;;  %v13084_v41 = vld [vmem:[#allocation110_spill] sm:$0xff]  ;;  %v13089_v10 = vld [vmem:[#allocation72_spill] sm:$0xff] }
 0x3ca   :  { %v5515_v16 = vsel %vm5473_vm12, %v13069_v14, %v5514_v55  ;;  %v5518_v34 = vsel %vm5473_vm12, %v13071_v62, %v5517_v8  ;;  %v5568_v12 = vrot.slane %v13075_v61, 5  ;;  %v13076_v47 = vrot.slane %v13044_v6, 5  ;;  %v13083_v27 = vld [vmem:[#allocation73_spill] sm:$0xff]  ;;  %v13086_v33 = vld [vmem:[#allocation74_spill] sm:$0xff] }
 0x3cb   :  { %v5542_v18 = vsel %vm5473_vm12, %v13074_v58, %v5541_v32  ;;  %v13078_v14 = vrot.slane %v13077_v49, 5  ;;  %v13080_v62 = vrot.slane %v13079_v26, 5  ;;  %v13082_v15 = vrot.slane %v13081_v53, 5  ;;  %v13087_v24 = vld [vmem:[#allocation81_spill] sm:$0xff]  ;;  %v13091_v0 = vld [vmem:[#allocation46_spill] sm:$0xff] }
 0x3cc   :  { %v5586_v51 = vrot.slane %v13083_v27, 5  ;;  %v5588_v58 = vrot.slane %v13033_v3, 5  ;;  %v13085_v61 = vrot.slane %v13084_v41, 5  ;;  %v5589_v49 = vrot.slane %v13086_v33, 5  ;;  %v13093_v27 = vld [vmem:[#allocation86_spill] sm:$0xff] }
 0x3cd   :  { %v5584_v11 = vsel %vm5473_vm12, %v13078_v14, %v13076_v47  ;;  %v5545_v9 = vsel %vm5473_vm12, %v13080_v62, %v5544_v43  ;;  %v5566_v20 = vsel %vm5473_vm12, %v13082_v15, %v5565_v30  ;;  %v5591_v47 = vrot.slane %v13087_v24, 5  ;;  %v13088_v14 = vld [vmem:[#allocation84_spill] sm:$0xff]  ;;  %v13092_v15 = vld [vmem:[#allocation31_spill] sm:$0xff] }
 0x3ce   :  { %v5569_v63 = vsel %vm5473_vm12, %v13085_v61, %v5568_v12  ;;  %v5592_v26 = vrot.slane %v13088_v14, 5  ;;  %v13090_v62 = vrot.slane %v13089_v10, 5  ;;  %v11306_v19 = vadd.f32 %v13092_v15, %v13091_v0  ;;  %v13095_v14 = vld [vmem:[#allocation82_spill] sm:$0xff] }
 0x3cf   :  { %v11309_v3 = vadd.f32 %v5491_v38, %v13093_v27  ;;  %v13094_v41 = vrot.slane %v13052_v17, 5  ;;  %v5590_v33 = vsel %vm5473_vm12, %v5588_v58, %v5589_v49  ;;  %v11318_v28 = vadd.f32 %v5494_v40, %v13095_v14  ;;  %v13096_v38 = vld [vmem:[#allocation32_spill] sm:$0xff] }
 0x3d0   :  { %v5587_v53 = vsel %vm5473_vm12, %v13090_v62, %v5586_v51  ;;  %v5593_v24 = vsel %vm5473_vm12, %v5591_v47, %v5592_v26  ;;  %v11320_v10 = vadd.f32 %v5493_v59, %v5406_v56  ;;  %v11322_v62 = vadd.f32 %v5497_v22, %v5407_v46 }
 0x3d1   :  { %v11313_v61 = vadd.f32 %v13094_v41, %v5404_v23  ;;  %v11324_v0 = vadd.f32 %v5496_v54, %v5408_v25  ;;  %v11326_v15 = vadd.f32 %v5512_v13, %v5417_v60  ;;  %v13097_v27 = vrot.slane %v13059_v45, 5  ;;  %v13098_v25 = vld [vmem:[#allocation130_spill] sm:$0xff]  ;;  %v13101_v13 = vld [vmem:[#allocation100_spill] sm:$0xff] }
 0x3d2   :  { %v11333_v41 = vadd.f32 %v5515_v16, %v5419_v31  ;;  %v11335_v58 = vadd.f32 %v5514_v55, %v5420_v4  ;;  %v11337_v47 = vadd.f32 %v5518_v34, %v5421_v37  ;;  %v11339_v40 = vadd.f32 %v5517_v8, %v5422_v5  ;;  %v13099_v60 = vld [vmem:[#allocation126_spill] sm:$0xff]  ;;  %v13110_v8 = vld [vmem:[#allocation71_spill] sm:$0xff] }
 0x3d3   :  { %v11331_v23 = vadd.f32 %v13097_v27, %v13096_v38  ;;  %v11341_v56 = vadd.f32 %v5521_v29, %v5423_v50  ;;  %v11343_v46 = vadd.f32 %v5520_v57, %v5424_v1  ;;  %v11347_v59 = vadd.f32 %v13099_v60, %v13098_v25  ;;  %v13100_v54 = vld [vmem:[#allocation122_spill] sm:$0xff]  ;;  %v13107_v50 = vld [vmem:[#allocation127_spill] sm:$0xff]  ;;  %v13111_v57 = vld [vmem:[#allocation148_spill] sm:$0xff] }
 0x3d4   :  { %v13102_v22 = vrot.slane %v13101_v13, 5  ;;  %v11355_v4 = vadd.f32 %v5542_v18, %v11206_v35  ;;  %v11358_v37 = vadd.f32 %v5541_v32, %v11210_v42  ;;  %v11361_v31 = vadd.f32 %v5545_v9, %v11212_v7  ;;  %v13108_v1 = vld [vmem:[#allocation66_spill] sm:$0xff]  ;;  %v13123_v29 = vld [vmem:[#allocation87_spill] sm:$0xff]  ;;  %v13137_v60 = vld [vmem:[#allocation40_spill] sm:$0xff] }
 0x3d5   :  { %v11364_v5 = vadd.f32 %v5544_v43, %v11214_v44  ;;  %v11368_v55 = vadd.f32 %v13108_v1, %v13107_v50  ;;  %v13112_v16 = vrot.slane %v13111_v57, 5  ;;  %v11376_v35 = vadd.f32 %v5566_v20, %v11216_v21  ;;  %v13121_v43 = vld [vmem:[#allocation14_spill] sm:$0xff]  ;;  %v13135_v27 = vld [vmem:[#allocation27_spill] sm:$0xff] }
 0x3d6   :  { %v11352_v14 = vadd.f32 %v13102_v22, %v13100_v54  ;;  %13103 = vst [vmem:[#allocation16_spill] sm:$0xff] %v11355_v4  ;;  %13104 = vst [vmem:[#allocation94_spill] sm:$0xff] %v11358_v37  ;;  %v11379_v42 = vadd.f32 %v5565_v30, %v11220_v2  ;;  %v11382_v7 = vadd.f32 %v5569_v63, %v11222_v36  ;;  %v13119_v32 = vrot.slane %v13044_v6, 5  ;;  %v13125_v30 = vld [vmem:[#allocation85_spill] sm:$0xff]  ;;  %v13127_v63 = vld [vmem:[#allocation15_spill] sm:$0xff] }
 0x3d7   :  { %13105 = vst [vmem:[#allocation89_spill] sm:$0xff] %v11361_v31  ;;  %13106 = vst [vmem:[#allocation96_spill] sm:$0xff] %v11364_v5  ;;  %v11373_v34 = vadd.f32 %v13112_v16, %v13110_v8  ;;  %v11385_v44 = vadd.f32 %v5568_v12, %v11224_v48  ;;  %v11388_v18 = vadd.f32 %v5584_v11, %v11228_v39  ;;  %v13129_v48 = vld [vmem:[#allocation92_spill] sm:$0xff]  ;;  %v13138_v54 = vld [vmem:[#allocation55_spill] sm:$0xff] }
 0x3d8   :  { %13109 = vst [vmem:[#allocation93_spill] sm:$0xff] %v11368_v55  ;;  %13114 = vst [vmem:[#allocation97_spill] sm:$0xff] %v11376_v35  ;;  %v11393_v9 = vadd.f32 %v13119_v32, %v11233_v52  ;;  %v11396_v21 = vadd.f32 %v5587_v53, %v13121_v43  ;;  %v11399_v2 = vadd.f32 %v5586_v51, %v13123_v29  ;;  %v13131_v11 = vld [vmem:[#allocation88_spill] sm:$0xff]  ;;  %v13133_v52 = vld [vmem:[#allocation23_spill] sm:$0xff]  ;;  %v13136_v53 = vrot.slane %v13135_v27, 6 }
 0x3d9   :  { %13113 = vst [vmem:[#allocation95_spill] sm:$0xff] %v11373_v34  ;;  %13115 = vst [vmem:[#allocation99_spill] sm:$0xff] %v11379_v42  ;;  %v11402_v36 = vadd.f32 %v5590_v33, %v13125_v30  ;;  %v11405_v12 = vadd.f32 %v5589_v49, %v13127_v63  ;;  %v11408_v39 = vadd.f32 %v5593_v24, %v13129_v48  ;;  %v13134_v38 = vrot.slane %v13133_v52, 6  ;;  %v13139_v49 = vld [vmem:[#allocation54_spill] sm:$0xff]  ;;  %v13141_v1 = vld [vmem:[#allocation119_spill] sm:$0xff] }
 0x3da   :  { %13116 = vst [vmem:[#allocation106_spill] sm:$0xff] %v11382_v7  ;;  %13117 = vst [vmem:[#allocation104_spill] sm:$0xff] %v11385_v44  ;;  %v11411_v20 = vadd.f32 %v5592_v26, %v13131_v11  ;;  %v5771_v51 = vrot.slane %v13052_v17, 6  ;;  %v5774_v33 = vrot.slane %v13137_v60, 6  ;;  %v5776_v22 = vrot.slane %v13138_v54, 6  ;;  %v13143_v16 = vld [vmem:[#allocation39_spill] sm:$0xff] }
 0x3db   :  { %13118 = vst [vmem:[#allocation105_spill] sm:$0xff] %v11388_v18  ;;  %13120 = vst [vmem:[#allocation115_spill] sm:$0xff] %v11393_v9  ;;  %v5769_v25 = vsel %vm5754_vm13, %v13136_v53, %v13134_v38  ;;  %v5777_v50 = vrot.slane %v13139_v49, 6  ;;  %v13140_v24 = vrot.slane %v13059_v45, 6  ;;  %v13142_v8 = vrot.slane %v13141_v1, 6  ;;  %v13145_v29 = vld [vmem:[#allocation120_spill] sm:$0xff] }
 0x3dc   :  { %13122 = vst [vmem:[#allocation121_spill] sm:$0xff] %v11396_v21  ;;  %13124 = vst [vmem:[#allocation116_spill] sm:$0xff] %v11399_v2  ;;  %v13144_v32 = vrot.slane %v13143_v16, 6  ;;  %v5795_v30 = vrot.slane %v13145_v29, 6  ;;  %v13146_v63 = vld [vmem:[#allocation38_spill] sm:$0xff]  ;;  %v13148_v38 = vld [vmem:[#allocation53_spill] sm:$0xff] }
 0x3dd   :  { %13126 = vst [vmem:[#allocation124_spill] sm:$0xff] %v11402_v36  ;;  %13128 = vst [vmem:[#allocation118_spill] sm:$0xff] %v11405_v12  ;;  %v5793_v26 = vsel %vm5754_vm13, %v13142_v8, %v13140_v24  ;;  %v5797_v17 = vrot.slane %v13146_v63, 6  ;;  %v13147_v48 = vld [vmem:[#allocation34_spill] sm:$0xff]  ;;  %v13149_v27 = vrot.slane %v13148_v38, 6  ;;  %v5778_v60 = vsel %vm5754_vm13, %v5776_v22, %v5777_v50  ;;  %v13151_v1 = vld [vmem:[#allocation41_spill] sm:$0xff] }
 0x3de   :  { %13130 = vst [vmem:[#allocation49_spill] sm:$0xff] %v11408_v39  ;;  %13132 = vst [vmem:[#allocation61_spill] sm:$0xff] %v11411_v20  ;;  %v5772_v43 = vsel %vm5754_vm13, %v13144_v32, %v5771_v51  ;;  %v5798_v11 = vrot.slane %v13147_v48, 6  ;;  %v13150_v54 = vld [vmem:[#allocation42_spill] sm:$0xff]  ;;  %v5801_v24 = vrot.slane %v13151_v1, 6  ;;  %v13152_v8 = vld [vmem:[#allocation33_spill] sm:$0xff] }
 0x3df   :  { %v5775_v53 = vsel %vm5754_vm13, %v13149_v27, %v5774_v33  ;;  %v5800_v49 = vrot.slane %v13150_v54, 6  ;;  %v13153_v16 = vrot.slane %v13152_v8, 6  ;;  %v13154_v63 = vrot.slane %v13101_v13, 6  ;;  %v13155_v20 = vld [vmem:[#allocation107_spill] sm:$0xff]  ;;  %v13158_v12 = vld [vmem:[#allocation113_spill] sm:$0xff]  ;;  %v13159_v36 = vld [vmem:[#allocation112_spill] sm:$0xff] }
 0x3e0   :  { %v5799_v29 = vsel %vm5754_vm13, %v5797_v17, %v5798_v11  ;;  %v13156_v48 = vrot.slane %v13155_v20, 6  ;;  %v13157_v39 = vld [vmem:[#allocation111_spill] sm:$0xff]  ;;  %v5824_v54 = vrot.slane %v13158_v12, 6  ;;  %v5825_v1 = vrot.slane %v13159_v36, 6  ;;  %v13161_v2 = vld [vmem:[#allocation149_spill] sm:$0xff]  ;;  %v13165_v18 = vld [vmem:[#allocation150_spill] sm:$0xff] }
 0x3e1   :  { %v5796_v32 = vsel %vm5754_vm13, %v13153_v16, %v5795_v30  ;;  %v5822_v27 = vrot.slane %v13157_v39, 6  ;;  %v5802_v22 = vsel %vm5754_vm13, %v5800_v49, %v5801_v24  ;;  %v13160_v8 = vrot.slane %v13111_v57, 6  ;;  %v13163_v21 = vld [vmem:[#allocation109_spill] sm:$0xff]  ;;  %v13169_v35 = vld [vmem:[#allocation79_spill] sm:$0xff]  ;;  %v13174_v55 = vld [vmem:[#allocation56_spill] sm:$0xff] }
 0x3e2   :  { %v5820_v38 = vsel %vm5754_vm13, %v13156_v48, %v13154_v63  ;;  %v13162_v16 = vrot.slane %v13161_v2, 6  ;;  %v13164_v9 = vrot.slane %v13163_v21, 6  ;;  %v5846_v63 = vrot.slane %v13165_v18, 6  ;;  %v13166_v48 = vld [vmem:[#allocation110_spill] sm:$0xff]  ;;  %v13167_v44 = vld [vmem:[#allocation77_spill] sm:$0xff]  ;;  %v13170_v57 = vld [vmem:[#allocation151_spill] sm:$0xff] }
 0x3e3   :  { %v5848_v39 = vrot.slane %v13166_v48, 6  ;;  %v5849_v49 = vrot.slane %v13167_v44, 6  ;;  %v5826_v12 = vsel %vm5754_vm13, %v5824_v54, %v5825_v1  ;;  %v5864_v36 = vrot.slane %v13044_v6, 6  ;;  %v13168_v7 = vld [vmem:[#allocation73_spill] sm:$0xff]  ;;  %v13176_v5 = vld [vmem:[#allocation72_spill] sm:$0xff] }
 0x3e4   :  { %v5844_v17 = vsel %vm5754_vm13, %v13162_v16, %v13160_v8  ;;  %v5823_v20 = vsel %vm5754_vm13, %v13164_v9, %v5822_v27  ;;  %v5867_v42 = vrot.slane %v13168_v7, 6  ;;  %v5869_v2 = vrot.slane %v13169_v35, 6  ;;  %v13172_v16 = vld [vmem:[#allocation74_spill] sm:$0xff]  ;;  %v13173_v34 = vld [vmem:[#allocation81_spill] sm:$0xff]  ;;  %v13178_v31 = vld [vmem:[#allocation84_spill] sm:$0xff] }
 0x3e5   :  { %v13171_v8 = vrot.slane %v13170_v57, 6  ;;  %v5850_v9 = vsel %vm5754_vm13, %v5848_v39, %v5849_v49  ;;  %v5870_v18 = vrot.slane %v13172_v16, 6  ;;  %v5872_v48 = vrot.slane %v13173_v34, 6  ;;  %v13179_v37 = vld [vmem:[#allocation45_spill] sm:$0xff] }
 0x3e6   :  { %v13175_v44 = vrot.slane %v13174_v55, 6  ;;  %v13177_v6 = vrot.slane %v13176_v5, 6  ;;  %v5873_v35 = vrot.slane %v13178_v31, 6  ;;  %v5963_v57 = vadd.f32 %v5769_v25, %v11306_v19  ;;  %v13181_v25 = vld [vmem:[#allocation26_spill] sm:$0xff] }
 0x3e7   :  { %v5847_v21 = vsel %vm5754_vm13, %v13171_v8, %v5846_v63  ;;  %v5871_v8 = vsel %vm5754_vm13, %v5869_v2, %v5870_v18  ;;  %v13180_v39 = vrot.slane %v13133_v52, 6  ;;  %v5965_v34 = vadd.f32 %v5772_v43, %v11309_v3  ;;  %v13182_v2 = vld [vmem:[#allocation19_spill] sm:$0xff]  ;;  %v13187_v43 = vld [vmem:[#allocation89_spill] sm:$0xff] }
 0x3e8   :  { %v5865_v54 = vsel %vm5754_vm13, %v13175_v44, %v5864_v36  ;;  %v5868_v7 = vsel %vm5754_vm13, %v13177_v6, %v5867_v42  ;;  %v5966_v55 = vadd.f32 %v5771_v51, %v11313_v61  ;;  %v5874_v44 = vsel %vm5754_vm13, %v5872_v48, %v5873_v35 }
 0x3e9   :  { %v5964_v16 = vadd.f32 %v13180_v39, %v13179_v37  ;;  %v5967_v5 = vadd.f32 %v5775_v53, %v11318_v28  ;;  %v5968_v6 = vadd.f32 %v5774_v33, %v11320_v10  ;;  %v5969_v31 = vadd.f32 %v5778_v60, %v11322_v62  ;;  %v13189_v53 = vld [vmem:[#allocation93_spill] sm:$0xff] }
 0x3ea   :  { %v5970_v19 = vadd.f32 %v5777_v50, %v11324_v0  ;;  %v5977_v4 = vadd.f32 %v13182_v2, %v13181_v25  ;;  %v5979_v52 = vadd.f32 %v5793_v26, %v11326_v15  ;;  %v13183_v3 = vrot.slane %v13059_v45, 6  ;;  %v13185_v45 = vld [vmem:[#allocation16_spill] sm:$0xff]  ;;  %v13186_v26 = vld [vmem:[#allocation94_spill] sm:$0xff]  ;;  %v13200_v39 = vld [vmem:[#allocation17_spill] sm:$0xff] }
 0x3eb   :  { %v5981_v61 = vadd.f32 %v5796_v32, %v11333_v41  ;;  %v5982_v51 = vadd.f32 %v5795_v30, %v11335_v58  ;;  %v5983_v28 = vadd.f32 %v5799_v29, %v11337_v47  ;;  %v5984_v10 = vadd.f32 %v5798_v11, %v11339_v40  ;;  %v13188_v30 = vld [vmem:[#allocation96_spill] sm:$0xff]  ;;  %v13190_v11 = vld [vmem:[#allocation95_spill] sm:$0xff] }
 0x3ec   :  { %v5980_v37 = vadd.f32 %v13183_v3, %v11331_v23  ;;  %v5985_v62 = vadd.f32 %v5802_v22, %v11341_v56  ;;  %v5986_v0 = vadd.f32 %v5801_v24, %v11343_v46  ;;  %v5997_v33 = vadd.f32 %v5820_v38, %v11347_v59  ;;  %v13191_v56 = vld [vmem:[#allocation148_spill] sm:$0xff]  ;;  %v13193_v24 = vld [vmem:[#allocation97_spill] sm:$0xff]  ;;  %v13194_v32 = vld [vmem:[#allocation99_spill] sm:$0xff] }
 0x3ed   :  { %v13184_v15 = vrot.slane %v13101_v13, 6  ;;  %v5999_v23 = vadd.f32 %v5823_v20, %v13185_v45  ;;  %v6000_v41 = vadd.f32 %v5822_v27, %v13186_v26  ;;  %v6001_v58 = vadd.f32 %v5826_v12, %v13187_v43  ;;  %v13195_v13 = vld [vmem:[#allocation106_spill] sm:$0xff]  ;;  %v13196_v38 = vld [vmem:[#allocation104_spill] sm:$0xff]  ;;  %v13197_v20 = vld [vmem:[#allocation83_spill] sm:$0xff] }
 0x3ee   :  { %v6002_v47 = vadd.f32 %v5825_v1, %v13188_v30  ;;  %v6013_v40 = vadd.f32 %v5844_v17, %v13189_v53  ;;  %v13192_v60 = vrot.slane %v13191_v56, 6  ;;  %v6015_v59 = vadd.f32 %v5847_v21, %v13193_v24  ;;  %v13198_v27 = vld [vmem:[#allocation58_spill] sm:$0xff]  ;;  %v13199_v12 = vld [vmem:[#allocation69_spill] sm:$0xff]  ;;  %v13203_v3 = vld [vmem:[#allocation115_spill] sm:$0xff] }
 0x3ef   :  { %v5998_v50 = vadd.f32 %v13184_v15, %v11352_v14  ;;  %v6016_v29 = vadd.f32 %v5846_v63, %v13194_v32  ;;  %v6017_v14 = vadd.f32 %v5850_v9, %v13195_v13  ;;  %v6018_v22 = vadd.f32 %v5849_v49, %v13196_v38  ;;  %v13202_v17 = vld [vmem:[#allocation105_spill] sm:$0xff]  ;;  %v13205_v21 = vld [vmem:[#allocation116_spill] sm:$0xff]  ;;  %v13207_v9 = vld [vmem:[#allocation118_spill] sm:$0xff] }
 0x3f0   :  { %v6014_v46 = vadd.f32 %v13192_v60, %v13190_v11  ;;  %v6025_v48 = vadd.f32 %v13198_v27, %v13197_v20  ;;  %v13201_v1 = vrot.slane %v13200_v39, 6  ;;  %v6027_v2 = vadd.f32 %v5865_v54, %v13202_v17  ;;  %v13204_v45 = vld [vmem:[#allocation121_spill] sm:$0xff]  ;;  %v13206_v63 = vld [vmem:[#allocation124_spill] sm:$0xff]  ;;  %v13210_v54 = vld [vmem:[#allocation43_spill] sm:$0xff] }
 0x3f1   :  { %v6028_v15 = vadd.f32 %v5864_v36, %v13203_v3  ;;  %v6029_v26 = vadd.f32 %v5868_v7, %v13204_v45  ;;  %v6030_v43 = vadd.f32 %v5867_v42, %v13205_v21  ;;  %v6031_v30 = vadd.f32 %v5871_v8, %v13206_v63  ;;  %v13208_v49 = vld [vmem:[#allocation49_spill] sm:$0xff] }
 0x3f2   :  { %v6026_v25 = vadd.f32 %v13201_v1, %v13199_v12  ;;  %v6032_v53 = vadd.f32 %v5870_v18, %v13207_v9  ;;  %v6033_v11 = vadd.f32 %v5874_v44, %v13208_v49  ;;  %v13209_v56 = vld [vmem:[#allocation61_spill] sm:$0xff]  ;;  %v11533_v24 = vmul.f32 0.020408163, %v5963_v57  ;;  %v13211_v18 = vld [vmem:[#allocation30_spill] sm:$0xff]  ;;  %v13212_v44 = vld [vmem:[#allocation24_spill] sm:$0xff] }
 0x3f3   :  { %v6034_v60 = vadd.f32 %v5873_v35, %v13209_v56  ;;  %v11535_v32 = vmul.f32 0.020408163, %v5964_v16  ;;  %v11537_v13 = vmul.f32 0.020408163, %v5965_v34  ;;  %v11541_v36 = vmul.f32 %v13210_v54, %v13210_v54 }
 0x3f4   :  { %v11543_v7 = vmul.f32 0.020408163, %v5966_v55  ;;  %v11545_v42 = vmul.f32 0.020408163, %v5967_v5  ;;  %v11547_v8 = vmul.f32 0.020408163, %v5968_v6  ;;  %v11551_v38 = vmul.f32 %v13212_v44, %v13211_v18 }
 0x3f5   :  { %v11553_v35 = vmul.f32 0.020408163, %v5969_v31  ;;  %v11555_v57 = vmul.f32 0.020408163, %v5970_v19  ;;  %v11557_v16 = vmul.f32 0.020408163, %v5977_v4  ;;  %v11561_v34 = vmul.f32 %v11533_v24, %v11533_v24 }
 0x3f6   :  { %v11563_v55 = vmul.f32 0.020408163, %v5979_v52  ;;  %v11565_v5 = vmul.f32 0.020408163, %v5980_v37  ;;  %v11567_v6 = vmul.f32 0.020408163, %v5981_v61  ;;  %v11571_v20 = vmul.f32 %v11535_v32, %v11535_v32 }
 0x3f7   :  { %13213 = vst [vmem:[#allocation51_spill] sm:$0xff] %v11561_v34  ;;  %v11573_v31 = vmul.f32 0.020408163, %v5982_v51  ;;  %v11575_v19 = vmul.f32 0.020408163, %v5983_v28  ;;  %v11581_v27 = vmul.f32 %v11537_v13, %v11537_v13  ;;  %v13215_v61 = vld [vmem:[#allocation125_spill] sm:$0xff]  ;;  %v11590_v39 = vmul.f32 %v11543_v7, %v11543_v7 }
 0x3f8   :  { %13214 = vst [vmem:[#allocation48_spill] sm:$0xff] %v11571_v20  ;;  %v11577_v4 = vmul.f32 0.020408163, %v5984_v10  ;;  %v11583_v52 = vmul.f32 0.020408163, %v5985_v62  ;;  %v11594_v10 = vmul.f32 %v11545_v42, %v11545_v42  ;;  %v11598_v62 = vmul.f32 %v11547_v8, %v11547_v8 }
 0x3f9   :  { %v11585_v37 = vmul.f32 0.020408163, %v5986_v0  ;;  %v6075_v12 = vmul.f32 0.020408163, %v13215_v61  ;;  %13216 = vst [vmem:[#allocation133_spill] sm:$0xff] %v11590_v39  ;;  %v13219_v0 = vld [vmem:[#allocation76_spill] sm:$0xff] }
 0x3fa   :  { %v6077_v51 = vmul.f32 0.020408163, %v5997_v33  ;;  %v6078_v1 = vmul.f32 0.020408163, %v5998_v50  ;;  %v6079_v28 = vmul.f32 0.020408163, %v5999_v23  ;;  %v11603_v33 = vmul.f32 %v11553_v35, %v11553_v35 }
 0x3fb   :  { %13217 = vst [vmem:[#allocation132_spill] sm:$0xff] %v11594_v10  ;;  %v6080_v17 = vmul.f32 0.020408163, %v6000_v41  ;;  %v6081_v3 = vmul.f32 0.020408163, %v6001_v58  ;;  %13218 = vst [vmem:[#allocation60_spill] sm:$0xff] %v11598_v62  ;;  %v11607_v41 = vmul.f32 %v11555_v57, %v11555_v57 }
 0x3fc   :  { %v6082_v45 = vmul.f32 0.020408163, %v6002_v47  ;;  %v6091_v21 = vmul.f32 0.020408163, %v13219_v0  ;;  %v6093_v63 = vmul.f32 0.020408163, %v6013_v40 }
 0x3fd   :  { %v6094_v9 = vmul.f32 0.020408163, %v6014_v46  ;;  %13220 = vst [vmem:[#allocation50_spill] sm:$0xff] %v11603_v33  ;;  %v6095_v50 = vmul.f32 0.020408163, %v6015_v59  ;;  %13221 = vst [vmem:[#allocation44_spill] sm:$0xff] %v11607_v41  ;;  %v6139_v59 = vsub.f32 %v6075_v12, %v11561_v34 }
 0x3fe   :  { %v6096_v23 = vmul.f32 0.020408163, %v6016_v29  ;;  %v6097_v49 = vmul.f32 0.020408163, %v6017_v14  ;;  %v6098_v58 = vmul.f32 0.020408163, %v6018_v22 }
 0x3ff   :  { %v11609_v47 = vmul.f32 0.020408163, %v6025_v48  ;;  %v11611_v56 = vmul.f32 0.020408163, %v6026_v25  ;;  %v13222_v61 = vld [vmem:[#allocation103_spill] sm:$0xff]  ;;  %v13223_v48 = vld [vmem:[#allocation117_spill] sm:$0xff] }
 0x400   :  { %v6137_v40 = vsub.f32 %v13222_v61, %v11541_v36  ;;  %v11615_v46 = vmul.f32 0.020408163, %v6027_v2  ;;  %v11617_v0 = vmul.f32 0.020408163, %v6028_v15  ;;  %v11619_v44 = vmul.f32 0.020408163, %v6029_v26 }
 0x401   :  { %v11622_v29 = vmul.f32 0.020408163, %v6030_v43  ;;  %v11624_v14 = vmul.f32 0.020408163, %v6031_v30  ;;  %v11626_v22 = vmul.f32 0.020408163, %v6032_v53  ;;  %v6140_v25 = vsub.f32 %v13223_v48, %v11571_v20 }
 0x402   :  { %v11630_v18 = vmul.f32 0.020408163, %v6033_v11  ;;  %v11632_v61 = vmul.f32 0.020408163, %v6034_v60  ;;  %v6141_v2 = vsub.f32 %v6077_v51, %v11581_v27  ;;  %v6142_v15 = vsub.f32 %v6078_v1, %v11590_v39  ;;  %v13225_v34 = vld [vmem:[#allocation102_spill] sm:$0xff]  ;;  %v13226_v48 = vld [vmem:[#allocation91_spill] sm:$0xff] }
 0x403   :  { %v6143_v26 = vsub.f32 %v6079_v28, %v11594_v10  ;;  %v6144_v43 = vsub.f32 %v6080_v17, %v11598_v62  ;;  %v6145_v30 = vsub.f32 %v6081_v3, %v11603_v33  ;;  %v6146_v53 = vsub.f32 %v6082_v45, %v11607_v41  ;;  %v13246_v33 = vld [vmem:[#allocation142_spill] sm:$0xff]  ;;  %v13251_v10 = vld [vmem:[#allocation123_spill] sm:$0xff] }
 0x404   :  { %v11640_v12 = vmul.f32 1.0208334, %v6137_v40  ;;  %v13227_v11 = vsub.f32 %v13225_v34, %v13226_v48  ;;  %v11647_v60 = vmul.f32 1.0208334, %v6139_v59  ;;  %v11651_v51 = vmul.f32 %v11557_v16, %v11557_v16 }
 0x405   :  { %v11653_v1 = vmul.f32 1.0208334, %v6140_v25  ;;  %v11655_v28 = vmul.f32 1.0208334, %v6141_v2  ;;  %v11657_v17 = vmul.f32 1.0208334, %v6142_v15  ;;  %v11661_v3 = vmul.f32 %v11563_v55, %v11563_v55 }
 0x406   :  { %13224 = vst [vmem:[#allocation131_spill] sm:$0xff] %v11640_v12  ;;  %v11645_v20 = vmul.f32 1.0208334, %v13227_v11  ;;  %13229 = vst [vmem:[#allocation128_spill] sm:$0xff] %v11647_v60  ;;  %v11663_v45 = vmul.f32 1.0208334, %v6143_v26  ;;  %v11671_v59 = vmul.f32 %v11565_v5, %v11565_v5  ;;  %v11677_v2 = vmul.f32 %v11567_v6, %v11567_v6 }
 0x407   :  { %13230 = vst [vmem:[#allocation59_spill] sm:$0xff] %v11653_v1  ;;  %13231 = vst [vmem:[#allocation47_spill] sm:$0xff] %v11655_v28  ;;  %v11665_v34 = vmul.f32 1.0208334, %v6144_v43  ;;  %v11667_v40 = vmul.f32 1.0208334, %v6145_v30  ;;  %v11681_v15 = vmul.f32 %v11573_v31, %v11573_v31  ;;  %v11685_v26 = vmul.f32 %v11575_v19, %v11575_v19 }
 0x408   :  { %13228 = vst [vmem:[#allocation129_spill] sm:$0xff] %v11645_v20  ;;  %13232 = vst [vmem:[#allocation37_spill] sm:$0xff] %v11657_v17  ;;  %v11673_v25 = vmul.f32 1.0208334, %v6146_v53  ;;  %v11689_v43 = vmul.f32 %v11577_v4, %v11577_v4  ;;  %v11693_v30 = vmul.f32 %v11583_v52, %v11583_v52  ;;  %v11697_v53 = vmul.f32 %v11585_v37, %v11585_v37  ;;  %v13242_v11 = vld [vmem:[#allocation152_spill] sm:$0xff] }
 0x409   :  { %13233 = vst [vmem:[#allocation28_spill] sm:$0xff] %v11663_v45  ;;  %13234 = vst [vmem:[#allocation78_spill] sm:$0xff] %v11665_v34  ;;  %v13243_v34 = vld [vmem:[#allocation153_spill] sm:$0xff]  ;;  %v6189_v17 = vsub.f32 %v6093_v63, %v11677_v2  ;;  %v6190_v28 = vsub.f32 %v6094_v9, %v11681_v15  ;;  %v6191_v1 = vsub.f32 %v6095_v50, %v11685_v26 }
 0x40a   :  { %13235 = vst [vmem:[#allocation63_spill] sm:$0xff] %v11667_v40  ;;  %13236 = vst [vmem:[#allocation68_spill] sm:$0xff] %v11673_v25  ;;  %v6185_v25 = vsub.f32 %v13242_v11, %v11651_v51  ;;  %v6187_v40 = vsub.f32 %v6091_v21, %v11661_v3  ;;  %v6188_v45 = vsub.f32 %v13243_v34, %v11671_v59  ;;  %v13245_v11 = vld [vmem:[#allocation147_spill] sm:$0xff]  ;;  %v13250_v63 = vld [vmem:[#allocation29_spill] sm:$0xff] }
 0x40b   :  { %13237 = vst [vmem:[#allocation62_spill] sm:$0xff] %v11681_v15  ;;  %13238 = vst [vmem:[#allocation36_spill] sm:$0xff] %v11685_v26  ;;  %v6192_v60 = vsub.f32 %v6096_v23, %v11689_v43  ;;  %v6193_v20 = vsub.f32 %v6097_v49, %v11693_v30  ;;  %v6194_v12 = vsub.f32 %v6098_v58, %v11697_v53  ;;  %v11723_v50 = vmul.f32 1.0208334, %v6189_v17 }
 0x40c   :  { %13239 = vst [vmem:[#allocation114_spill] sm:$0xff] %v11689_v43  ;;  %13240 = vst [vmem:[#allocation46_spill] sm:$0xff] %v11693_v30  ;;  %v11710_v41 = vmul.f32 1.0208334, %v6185_v25  ;;  %v13247_v21 = vsub.f32 %v13245_v11, %v13246_v33  ;;  %v11717_v34 = vmul.f32 1.0208334, %v6187_v40  ;;  %v6216_v9 = vmul.f32 %v13251_v10, %v13250_v63 }
 0x40d   :  { %13241 = vst [vmem:[#allocation31_spill] sm:$0xff] %v11697_v53  ;;  %v11721_v15 = vmul.f32 1.0208334, %v6188_v45  ;;  %13253 = vst [vmem:[#allocation126_spill] sm:$0xff] %v11723_v50  ;;  %v11725_v23 = vmul.f32 1.0208334, %v6190_v28  ;;  %v6217_v49 = vmul.f32 %v11557_v16, %v13210_v54  ;;  %v6219_v17 = vmul.f32 %v11563_v55, %v11533_v24 }
 0x40e   :  { %13244 = vst [vmem:[#allocation86_spill] sm:$0xff] %v11710_v41  ;;  %v11715_v62 = vmul.f32 1.0208334, %v13247_v21  ;;  %13249 = vst [vmem:[#allocation32_spill] sm:$0xff] %v11717_v34  ;;  %v11729_v58 = vmul.f32 1.0208334, %v6191_v1  ;;  %v6220_v28 = vmul.f32 %v11565_v5, %v11535_v32  ;;  %v6221_v45 = vmul.f32 %v11567_v6, %v11537_v13 }
 0x40f   :  { %13252 = vst [vmem:[#allocation130_spill] sm:$0xff] %v11721_v15  ;;  %13254 = vst [vmem:[#allocation122_spill] sm:$0xff] %v11725_v23  ;;  %v11731_v25 = vmul.f32 1.0208334, %v6192_v60  ;;  %v11733_v11 = vmul.f32 1.0208334, %v6193_v20  ;;  %v6222_v60 = vmul.f32 %v11573_v31, %v11543_v7  ;;  %v6223_v20 = vmul.f32 %v11575_v19, %v11545_v42 }
 0x410   :  { %13248 = vst [vmem:[#allocation82_spill] sm:$0xff] %v11715_v62  ;;  %13255 = vst [vmem:[#allocation100_spill] sm:$0xff] %v11729_v58  ;;  %v13258_v40 = vld [vmem:[#allocation35_spill] sm:$0xff]  ;;  %v13259_v21 = vld [vmem:[#allocation25_spill] sm:$0xff]  ;;  %v11737_v62 = vmul.f32 1.0208334, %v6194_v12  ;;  %v6224_v1 = vmul.f32 %v11577_v4, %v11547_v8  ;;  %v6225_v12 = vmul.f32 %v11583_v52, %v11553_v35  ;;  %v6233_v50 = vsub.f32 %v11609_v47, %v6217_v49 }
 0x411   :  { %13256 = vst [vmem:[#allocation127_spill] sm:$0xff] %v11731_v25  ;;  %13257 = vst [vmem:[#allocation66_spill] sm:$0xff] %v11733_v11  ;;  %v6218_v34 = vmul.f32 %v13259_v21, %v13258_v40  ;;  %v13261_v11 = vld [vmem:[#allocation65_spill] sm:$0xff]  ;;  %v6235_v41 = vsub.f32 %v11615_v46, %v6219_v17  ;;  %v6236_v53 = vsub.f32 %v11617_v0, %v6220_v28 }
 0x412   :  { %13260 = vst [vmem:[#allocation71_spill] sm:$0xff] %v11737_v62  ;;  %v6226_v62 = vmul.f32 %v11585_v37, %v11555_v57  ;;  %v6231_v25 = vsub.f32 %v13261_v11, %v11551_v38  ;;  %v13262_v58 = vld [vmem:[#allocation57_spill] sm:$0xff]  ;;  %v6237_v30 = vsub.f32 %v11619_v44, %v6221_v45  ;;  %v6238_v43 = vsub.f32 %v11622_v29, %v6222_v60  ;;  %v13263_v11 = vld [vmem:[#allocation70_spill] sm:$0xff]  ;;  %v13265_v45 = vld [vmem:[#allocation75_spill] sm:$0xff] }
 0x413   :  { %v6232_v23 = vsub.f32 %v13262_v58, %v6216_v9  ;;  %v6234_v15 = vsub.f32 %v11611_v56, %v6218_v34  ;;  %v6239_v26 = vsub.f32 %v11624_v14, %v6223_v20  ;;  %v6240_v39 = vsub.f32 %v11626_v22, %v6224_v1  ;;  %v13264_v0 = vld [vmem:[#allocation13_spill] sm:$0xff]  ;;  %v13266_v14 = vld [vmem:[#allocation20_spill] sm:$0xff]  ;;  %v13267_v1 = vld [vmem:[#allocation90_spill] sm:$0xff] }
 0x414   :  { %v6241_v38 = vsub.f32 %v11630_v18, %v6225_v12  ;;  %v6242_v9 = vsub.f32 %v11632_v61, %v6226_v62  ;;  %v6247_v58 = vmul.f32 1.0208334, %v6231_v25  ;;  %v6249_v49 = vmul.f32 1.0208334, %v6233_v50  ;;  %v13268_v62 = vld [vmem:[#allocation138_spill] sm:$0xff] }
 0x415   :  { %v6248_v47 = vmul.f32 1.0208334, %v6232_v23  ;;  %v6250_v56 = vmul.f32 1.0208334, %v6234_v15  ;;  %v6251_v34 = vmul.f32 1.0208334, %v6235_v41  ;;  %v6275_v17 = vmul.f32 %v13264_v0, %v13263_v11 }
 0x416   :  { %v6252_v46 = vmul.f32 1.0208334, %v6236_v53  ;;  %v6253_v44 = vmul.f32 1.0208334, %v6237_v30  ;;  %v6254_v28 = vmul.f32 1.0208334, %v6238_v43  ;;  %v6278_v60 = vmul.f32 %v13266_v14, %v13265_v45 }
 0x417   :  { %v6255_v29 = vmul.f32 1.0208334, %v6239_v26  ;;  %v6256_v22 = vmul.f32 1.0208334, %v6240_v39  ;;  %v6257_v20 = vmul.f32 1.0208334, %v6241_v38  ;;  %v11774_v61 = vadd.f32 %v13268_v62, %v13267_v1 }
 0x418   :  { %v6258_v18 = vmul.f32 1.0208334, %v6242_v9  ;;  %v13269_v50 = vld [vmem:[#allocation22_spill] sm:$0xff]  ;;  %v6264_v23 = vmul.f32 2.0, %v13250_v63  ;;  %v6265_v30 = vmul.f32 2.0, %v13210_v54  ;;  %v6266_v26 = vmul.f32 2.0, %v13258_v40 }
 0x419   :  { %v6261_v15 = vmul.f32 2.0, %v13269_v50  ;;  %v13270_v41 = vld [vmem:[#allocation30_spill] sm:$0xff]  ;;  %v6267_v43 = vmul.f32 2.0, %v11533_v24  ;;  %v6268_v39 = vmul.f32 2.0, %v11535_v32  ;;  %v6269_v25 = vmul.f32 2.0, %v11537_v13  ;;  %v13271_v0 = vld [vmem:[#allocation108_spill] sm:$0xff] }
 0x41a   :  { %v6263_v53 = vmul.f32 2.0, %v13270_v41  ;;  %v6270_v12 = vmul.f32 2.0, %v11543_v7  ;;  %v6271_v38 = vmul.f32 2.0, %v11545_v42  ;;  %v6272_v9 = vmul.f32 2.0, %v11547_v8  ;;  %v13272_v45 = vld [vmem:[#allocation24_spill] sm:$0xff] }
 0x41b   :  { %v6273_v11 = vmul.f32 2.0, %v11553_v35  ;;  %v6274_v63 = vmul.f32 2.0, %v11555_v57  ;;  %v6277_v54 = vmul.f32 %v6261_v15, %v13271_v0  ;;  %v6280_v24 = vmul.f32 %v6264_v23, %v13251_v10 }
 0x41c   :  { %v6279_v40 = vmul.f32 %v6263_v53, %v13272_v45  ;;  %v6281_v32 = vmul.f32 %v6265_v30, %v11557_v16  ;;  %v6282_v13 = vmul.f32 %v6266_v26, %v13259_v21  ;;  %v6283_v7 = vmul.f32 %v6267_v43, %v11563_v55  ;;  %v13279_v26 = vld [vmem:[#allocation51_spill] sm:$0xff] }
 0x41d   :  { %v6284_v42 = vmul.f32 %v6268_v39, %v11565_v5  ;;  %v6285_v8 = vmul.f32 %v6269_v25, %v11567_v6  ;;  %v6286_v35 = vmul.f32 %v6270_v12, %v11573_v31  ;;  %v6287_v57 = vmul.f32 %v6271_v38, %v11575_v19  ;;  %v13273_v6 = vld [vmem:[#allocation80_spill] sm:$0xff]  ;;  %v13274_v31 = vld [vmem:[#allocation135_spill] sm:$0xff] }
 0x41e   :  { %v6288_v14 = vmul.f32 %v6272_v9, %v11577_v4  ;;  %v6289_v1 = vmul.f32 %v6273_v11, %v11583_v52  ;;  %v6290_v10 = vmul.f32 %v6274_v63, %v11585_v37  ;;  %v11802_v62 = vadd.f32 0.0001, %v6275_v17 }
 0x41f   :  { %v11804_v16 = vadd.f32 0.0001, %v6277_v54  ;;  %v11806_v21 = vadd.f32 0.0001, %v6278_v60  ;;  %v11808_v55 = vadd.f32 0.0001, %v6279_v40  ;;  %v6344_v50 = vadd.f32 %v13274_v31, %v13273_v6 }
 0x420   :  { %v11810_v5 = vadd.f32 0.0001, %v6280_v24  ;;  %v11814_v19 = vadd.f32 0.0001, %v6281_v32  ;;  %v11816_v4 = vadd.f32 0.0001, %v6282_v13  ;;  %v6345_v37 = vadd.f32 %v11651_v51, %v11541_v36 }
 0x421   :  { %v11818_v52 = vadd.f32 0.0001, %v6283_v7  ;;  %v11822_v17 = vadd.f32 0.0001, %v6284_v42  ;;  %v11824_v60 = vadd.f32 0.0001, %v6285_v8  ;;  %v6346_v41 = vadd.f32 %v13246_v33, %v13226_v48 }
 0x422   :  { %v11826_v15 = vadd.f32 0.0001, %v6286_v35  ;;  %v11830_v53 = vadd.f32 0.0001, %v6287_v57  ;;  %v11832_v23 = vadd.f32 0.0001, %v6288_v14  ;;  %v6347_v43 = vadd.f32 %v11661_v3, %v13279_v26 }
 0x423   :  { %v11834_v30 = vadd.f32 0.0001, %v6289_v1  ;;  %v11838_v39 = vadd.f32 0.0001, %v6290_v10  ;;  %v13281_v36 = vld [vmem:[#allocation52_spill] sm:$0xff]  ;;  %v6311_v25 = vmul.f32 2.0, %v6247_v58 }
 0x424   :  { %13275 = vst [vmem:[#allocation14_spill] sm:$0xff] %v11826_v15  ;;  %13276 = vst [vmem:[#allocation87_spill] sm:$0xff] %v11830_v53  ;;  %v6309_v51 = vmul.f32 2.0, %v13281_v36  ;;  %v6312_v12 = vmul.f32 2.0, %v6248_v47  ;;  %v6313_v38 = vmul.f32 2.0, %v6249_v49  ;;  %v6314_v9 = vmul.f32 2.0, %v6250_v56 }
 0x425   :  { %13277 = vst [vmem:[#allocation85_spill] sm:$0xff] %v11832_v23  ;;  %13278 = vst [vmem:[#allocation15_spill] sm:$0xff] %v11834_v30  ;;  %v6315_v11 = vmul.f32 2.0, %v6251_v34  ;;  %v6316_v63 = vmul.f32 2.0, %v6252_v46  ;;  %v6317_v33 = vmul.f32 2.0, %v6253_v44  ;;  %v6318_v48 = vmul.f32 2.0, %v6254_v28 }
 0x426   :  { %13280 = vst [vmem:[#allocation92_spill] sm:$0xff] %v11838_v39  ;;  %v6319_v0 = vmul.f32 2.0, %v6255_v29  ;;  %v6320_v54 = vmul.f32 2.0, %v6256_v22  ;;  %v6321_v45 = vmul.f32 2.0, %v6257_v20  ;;  %v6322_v40 = vmul.f32 2.0, %v6258_v18  ;;  %v13282_v32 = vld [vmem:[#allocation64_spill] sm:$0xff] }
 0x427   :  { %v11841_v24 = vadd.f32 0.0009, %v6309_v51  ;;  %v11844_v3 = vadd.f32 0.0009, %v13282_v32  ;;  %v11846_v13 = vadd.f32 0.0009, %v6311_v25  ;;  %v6349_v44 = vadd.f32 %v11677_v2, %v11581_v27 }
 0x428   :  { %v11848_v7 = vadd.f32 0.0009, %v6312_v12  ;;  %v11850_v58 = vadd.f32 0.0009, %v6313_v38  ;;  %v13283_v47 = vld [vmem:[#allocation48_spill] sm:$0xff]  ;;  %v13287_v20 = vld [vmem:[#allocation133_spill] sm:$0xff] }
 0x429   :  { %v6348_v49 = vadd.f32 %v11671_v59, %v13283_v47  ;;  %v11854_v56 = vadd.f32 0.0009, %v6314_v9  ;;  %v11856_v34 = vadd.f32 0.0009, %v6315_v11  ;;  %v11858_v46 = vadd.f32 0.0009, %v6316_v63 }
 0x42a   :  { %v11862_v28 = vadd.f32 0.0009, %v6317_v33  ;;  %v11864_v29 = vadd.f32 0.0009, %v6318_v48  ;;  %v11866_v22 = vadd.f32 0.0009, %v6319_v0 }
 0x42b   :  { %v13288_v18 = vld [vmem:[#allocation62_spill] sm:$0xff]  ;;  %v11870_v8 = vadd.f32 0.0009, %v6320_v54  ;;  %v11872_v59 = vadd.f32 0.0009, %v6321_v45  ;;  %v13292_v57 = vld [vmem:[#allocation132_spill] sm:$0xff] }
 0x42c   :  { %13284 = vst [vmem:[#allocation88_spill] sm:$0xff] %v11862_v28  ;;  %13285 = vst [vmem:[#allocation23_spill] sm:$0xff] %v11864_v29  ;;  %v6350_v42 = vadd.f32 %v13288_v18, %v13287_v20  ;;  %v11874_v35 = vadd.f32 0.0009, %v6322_v40  ;;  %v13293_v14 = vld [vmem:[#allocation36_spill] sm:$0xff]  ;;  %v13295_v27 = vld [vmem:[#allocation114_spill] sm:$0xff] }
 0x42d   :  { %13286 = vst [vmem:[#allocation27_spill] sm:$0xff] %v11866_v22  ;;  %13289 = vst [vmem:[#allocation40_spill] sm:$0xff] %v11870_v8  ;;  %v6351_v1 = vadd.f32 %v13293_v14, %v13292_v57  ;;  %v13294_v10 = vld [vmem:[#allocation60_spill] sm:$0xff]  ;;  %v13296_v6 = vld [vmem:[#allocation50_spill] sm:$0xff]  ;;  %v6359_v9 = vadd.f32 0.0001, %v11774_v61 }
 0x42e   :  { %13290 = vst [vmem:[#allocation55_spill] sm:$0xff] %v11872_v59  ;;  %13291 = vst [vmem:[#allocation54_spill] sm:$0xff] %v11874_v35  ;;  %v6352_v2 = vadd.f32 %v13295_v27, %v13294_v10  ;;  %v13297_v31 = vld [vmem:[#allocation46_spill] sm:$0xff]  ;;  %v13298_v36 = vld [vmem:[#allocation44_spill] sm:$0xff]  ;;  %v6360_v11 = vadd.f32 0.0001, %v6344_v50 }
 0x42f   :  { %v6353_v26 = vadd.f32 %v13297_v31, %v13296_v6  ;;  %v13299_v51 = vld [vmem:[#allocation31_spill] sm:$0xff]  ;;  %v13300_v12 = vld [vmem:[#allocation137_spill] sm:$0xff]  ;;  %v6361_v63 = vadd.f32 0.0001, %v6345_v37  ;;  %v13302_v48 = vld [vmem:[#allocation146_spill] sm:$0xff] }
 0x430   :  { %v6354_v25 = vadd.f32 %v13299_v51, %v13298_v36  ;;  %v6357_v38 = vadd.f32 0.0001, %v13300_v12  ;;  %v13301_v33 = vld [vmem:[#allocation101_spill] sm:$0xff]  ;;  %v6362_v54 = vadd.f32 0.0001, %v6346_v41  ;;  %v13303_v32 = vld [vmem:[#allocation98_spill] sm:$0xff] }
 0x431   :  { %v6375_v0 = vadd.f32 %v13302_v48, %v13301_v33  ;;  %v6363_v45 = vadd.f32 0.0001, %v6347_v43  ;;  %v6364_v40 = vadd.f32 0.0001, %v6348_v49  ;;  %v13304_v47 = vld [vmem:[#allocation144_spill] sm:$0xff]  ;;  %v13305_v10 = vld [vmem:[#allocation131_spill] sm:$0xff] }
 0x432   :  { %v6376_v20 = vadd.f32 %v13304_v47, %v13303_v32  ;;  %v6365_v18 = vadd.f32 0.0001, %v6349_v44  ;;  %v6366_v57 = vadd.f32 0.0001, %v6350_v42  ;;  %v6367_v14 = vadd.f32 0.0001, %v6351_v1 }
 0x433   :  { %v13306_v27 = vld [vmem:[#allocation86_spill] sm:$0xff]  ;;  %v6368_v31 = vadd.f32 0.0001, %v6352_v2  ;;  %v6369_v36 = vadd.f32 0.0001, %v6353_v26  ;;  %v13307_v50 = vld [vmem:[#allocation129_spill] sm:$0xff] }
 0x434   :  { %v6377_v6 = vadd.f32 %v13306_v27, %v13305_v10  ;;  %v6370_v61 = vadd.f32 0.0001, %v6354_v25  ;;  %v13308_v37 = vld [vmem:[#allocation82_spill] sm:$0xff]  ;;  %v13309_v12 = vld [vmem:[#allocation128_spill] sm:$0xff]  ;;  %v13311_v43 = vld [vmem:[#allocation59_spill] sm:$0xff] }
 0x435   :  { %v6378_v51 = vadd.f32 %v13308_v37, %v13307_v50  ;;  %v13310_v33 = vld [vmem:[#allocation32_spill] sm:$0xff]  ;;  %v13312_v49 = vld [vmem:[#allocation130_spill] sm:$0xff]  ;;  %v13313_v35 = vld [vmem:[#allocation47_spill] sm:$0xff]  ;;  %v6391_v8 = vadd.f32 0.0009, %v6375_v0 }
 0x436   :  { %v6379_v41 = vadd.f32 %v13310_v33, %v13309_v12  ;;  %v6380_v48 = vadd.f32 %v13312_v49, %v13311_v43  ;;  %v13314_v32 = vld [vmem:[#allocation126_spill] sm:$0xff]  ;;  %v13315_v42 = vld [vmem:[#allocation37_spill] sm:$0xff]  ;;  %v13317_v39 = vld [vmem:[#allocation28_spill] sm:$0xff]  ;;  %v6392_v43 = vadd.f32 0.0009, %v6376_v20 }
 0x437   :  { %v6381_v44 = vadd.f32 %v13314_v32, %v13313_v35  ;;  %v13316_v1 = vld [vmem:[#allocation122_spill] sm:$0xff]  ;;  %v13318_v10 = vld [vmem:[#allocation100_spill] sm:$0xff]  ;;  %v13320_v25 = vld [vmem:[#allocation127_spill] sm:$0xff]  ;;  %v6393_v49 = vadd.f32 0.0009, %v6377_v6  ;;  %v6407_v0 = vmul.f32 %v6391_v8, %v6359_v9 }
 0x438   :  { %v6382_v47 = vadd.f32 %v13316_v1, %v13315_v42  ;;  %v6383_v2 = vadd.f32 %v13318_v10, %v13317_v39  ;;  %v13319_v26 = vld [vmem:[#allocation78_spill] sm:$0xff]  ;;  %v13321_v59 = vld [vmem:[#allocation63_spill] sm:$0xff]  ;;  %v13323_v30 = vld [vmem:[#allocation68_spill] sm:$0xff]  ;;  %v6394_v22 = vadd.f32 0.0009, %v6378_v51  ;;  %v6408_v20 = vmul.f32 %v6392_v43, %v6360_v11 }
 0x439   :  { %v6384_v27 = vadd.f32 %v13320_v25, %v13319_v26  ;;  %v13322_v50 = vld [vmem:[#allocation66_spill] sm:$0xff]  ;;  %v13324_v12 = vld [vmem:[#allocation71_spill] sm:$0xff]  ;;  %v13326_v35 = vld [vmem:[#allocation140_spill] sm:$0xff]  ;;  %v6395_v42 = vadd.f32 0.0009, %v6379_v41  ;;  %v11915_v6 = vmul.f32 %v6393_v49, %v6361_v63 }
 0x43a   :  { %v6385_v37 = vadd.f32 %v13322_v50, %v13321_v59  ;;  %v6386_v33 = vadd.f32 %v13324_v12, %v13323_v30  ;;  %v13325_v23 = vld [vmem:[#allocation134_spill] sm:$0xff]  ;;  %v6396_v1 = vadd.f32 0.0009, %v6380_v48  ;;  %v13327_v53 = vld [vmem:[#allocation143_spill] sm:$0xff]  ;;  %v6397_v10 = vadd.f32 0.0009, %v6381_v44 }
 0x43b   :  { %v6403_v32 = vmul.f32 %v13326_v35, %v13325_v23  ;;  %v6405_v39 = vmul.f32 %v13327_v53, %v6357_v38  ;;  %v6398_v29 = vadd.f32 0.0009, %v6382_v47  ;;  %v6399_v26 = vadd.f32 0.0009, %v6383_v2  ;;  %v13328_v25 = vld [vmem:[#allocation136_spill] sm:$0xff]  ;;  %v13329_v15 = vld [vmem:[#allocation141_spill] sm:$0xff] }
 0x43c   :  { %v6406_v59 = vmul.f32 %v13329_v15, %v13328_v25  ;;  %v6400_v50 = vadd.f32 0.0009, %v6384_v27  ;;  %v6401_v28 = vadd.f32 0.0009, %v6385_v37  ;;  %v6402_v30 = vadd.f32 0.0009, %v6386_v33 }
 0x43d   :  { %v11917_v12 = vmul.f32 %v6394_v22, %v6362_v54  ;;  %v11919_v23 = vmul.f32 %v6395_v42, %v6363_v45  ;;  %v11921_v51 = vmul.f32 %v6396_v1, %v6364_v40  ;;  %v11923_v53 = vmul.f32 %v6397_v10, %v6365_v18  ;;  %v13330_v22 = vld [vmem:[#allocation139_spill] sm:$0xff]  ;;  %v13331_v9 = vld [vmem:[#allocation145_spill] sm:$0xff]  ;;  %v13334_v40 = vld [vmem:[#allocation18_spill] sm:$0xff] }
 0x43e   :  { %v11925_v38 = vmul.f32 %v6398_v29, %v6366_v57  ;;  %v11927_v41 = vmul.f32 %v6399_v26, %v6367_v14  ;;  %v11929_v15 = vmul.f32 %v6400_v50, %v6368_v31  ;;  %v11931_v48 = vmul.f32 %v6401_v28, %v6369_v36  ;;  %v13332_v63 = vld [vmem:[#allocation21_spill] sm:$0xff]  ;;  %v13333_v45 = vld [vmem:[#allocation67_spill] sm:$0xff]  ;;  %v13345_v44 = vld [vmem:[#allocation54_spill] sm:$0xff] }
 0x43f   :  { %v11933_v8 = vmul.f32 %v6402_v30, %v6370_v61  ;;  %8260 = vrcp.f32 %v6403_v32  ;;  %v6436_v11 = vmul.f32 %v13331_v9, %v13330_v22  ;;  %v6483_v54 = vmul.f32 %v13332_v63, %v11802_v62  ;;  %v13343_v36 = vld [vmem:[#allocation55_spill] sm:$0xff] }
 0x440   :  { %8262 = vrcp.f32 %v6405_v39  ;;  %v6484_v29 = vmul.f32 %v13334_v40, %v13333_v45  ;;  %v6485_v18 = vmul.f32 %v11841_v24, %v11804_v16  ;;  %v11945_v28 = vmul.f32 %v11844_v3, %v11806_v21  ;;  %v13336_v3 = vld [vmem:[#allocation14_spill] sm:$0xff] }
 0x441   :  { %8264 = vrcp.f32 %v6406_v59  ;;  %v11949_v57 = vmul.f32 %v11846_v13, %v11808_v55  ;;  %v6452_v14 = vsub.f32 2.0, %v6436_v11  ;;  %v11953_v62 = vmul.f32 %v11848_v7, %v11810_v5  ;;  %v13337_v13 = vld [vmem:[#allocation23_spill] sm:$0xff] }
 0x442   :  { %8266 = vrcp.f32 %v6407_v0  ;;  %v11957_v31 = vmul.f32 %v11850_v58, %v11814_v19  ;;  %v11961_v16 = vmul.f32 %v11854_v56, %v11816_v4  ;;  %v11965_v21 = vmul.f32 %v11856_v34, %v11818_v52  ;;  %v13335_v19 = vld [vmem:[#allocation88_spill] sm:$0xff]  ;;  %v13338_v52 = vld [vmem:[#allocation87_spill] sm:$0xff] }
 0x443   :  { %8268 = vrcp.f32 %v6408_v20  ;;  %v11969_v55 = vmul.f32 %v11858_v46, %v11822_v17  ;;  %v6468_v5 = vmul.f32 %v13331_v9, %v6452_v14  ;;  %v11975_v24 = vmul.f32 %v13335_v19, %v11824_v60  ;;  %v13339_v7 = vld [vmem:[#allocation27_spill] sm:$0xff]  ;;  %v13340_v17 = vld [vmem:[#allocation85_spill] sm:$0xff]  ;;  %v13341_v56 = vld [vmem:[#allocation40_spill] sm:$0xff] }
 0x444   :  { %8270 = vrcp.f32 %v11915_v6  ;;  %v11979_v4 = vmul.f32 %v13337_v13, %v13336_v3  ;;  %v11984_v58 = vmul.f32 %v13339_v7, %v13338_v52  ;;  %v11988_v34 = vmul.f32 %v13341_v56, %v13340_v17  ;;  %v13342_v46 = vld [vmem:[#allocation15_spill] sm:$0xff]  ;;  %v13344_v60 = vld [vmem:[#allocation92_spill] sm:$0xff] }
 0x445   :  { %8272 = vrcp.f32 %v11917_v12  ;;  %v11992_v61 = vmul.f32 %v13343_v36, %v13342_v46  ;;  %v11997_v47 = vmul.f32 %v13345_v44, %v13344_v60  ;;  %v6500_v2 = vmul.f32 %v6484_v29, %v6468_v5 }
 0x446   :  { %8274 = vrcp.f32 %v11919_v23 }
 0x447   :  { %8276 = vrcp.f32 %v11921_v51  ;;  %v6518_v45 = vsel %vm6517_vm14, %v6500_v2, 0.0 }
 0x448   :  { %8278 = vrcp.f32 %v11923_v53 }
 0x449   :  { %v8261_v27 = vpop.eup %8260  ;;  %8280 = vrcp.f32 %v11925_v38 }
 0x44a   :  { %v8263_v37 = vpop.eup %8262  ;;  %8282 = vrcp.f32 %v11927_v41  ;;  %v6435_v33 = vmul.f32 %v8261_v27, %v6403_v32 }
 0x44b   :  { %v8265_v43 = vpop.eup %8264  ;;  %8284 = vrcp.f32 %v11929_v15  ;;  %v6437_v49 = vmul.f32 %v8263_v37, %v6405_v39 }
 0x44c   :  { %v8267_v35 = vpop.eup %8266  ;;  %8286 = vrcp.f32 %v11931_v48  ;;  %v6438_v42 = vmul.f32 %v8265_v43, %v6406_v59  ;;  %v6451_v1 = vsub.f32 2.0, %v6435_v33 }
 0x44d   :  { %v8269_v10 = vpop.eup %8268  ;;  %8288 = vrcp.f32 %v11933_v8  ;;  %v6439_v26 = vmul.f32 %v8267_v35, %v6407_v0  ;;  %v6453_v25 = vsub.f32 2.0, %v6437_v49 }
 0x44e   :  { %v8271_v50 = vpop.eup %8270  ;;  %v6440_v30 = vmul.f32 %v8269_v10, %v6408_v20  ;;  %v6454_v22 = vsub.f32 2.0, %v6438_v42  ;;  %v6467_v9 = vmul.f32 %v8261_v27, %v6451_v1 }
 0x44f   :  { %v8273_v32 = vpop.eup %8272  ;;  %v6441_v11 = vmul.f32 %v8271_v50, %v11915_v6  ;;  %v6455_v39 = vsub.f32 2.0, %v6439_v26  ;;  %v6469_v63 = vmul.f32 %v8263_v37, %v6453_v25 }
 0x450   :  { %v8275_v59 = vpop.eup %8274  ;;  %v6442_v40 = vmul.f32 %v8273_v32, %v11917_v12  ;;  %v6456_v29 = vsub.f32 2.0, %v6440_v30  ;;  %v6470_v14 = vmul.f32 %v8265_v43, %v6454_v22  ;;  %v6499_v5 = vmul.f32 %v6483_v54, %v6467_v9 }
 0x451   :  { %v8277_v0 = vpop.eup %8276  ;;  %v6443_v19 = vmul.f32 %v8275_v59, %v11919_v23  ;;  %v6457_v20 = vsub.f32 2.0, %v6441_v11  ;;  %v6471_v3 = vmul.f32 %v8267_v35, %v6455_v39  ;;  %v6501_v13 = vmul.f32 %v6485_v18, %v6469_v63 }
 0x452   :  { %v8279_v52 = vpop.eup %8278  ;;  %v6444_v7 = vmul.f32 %v8277_v0, %v11921_v51  ;;  %v6458_v6 = vsub.f32 2.0, %v6442_v40  ;;  %v6472_v17 = vmul.f32 %v8269_v10, %v6456_v29  ;;  %v6502_v56 = vmul.f32 %v11945_v28, %v6470_v14 }
 0x453   :  { %v8281_v46 = vpop.eup %8280  ;;  %v6445_v36 = vmul.f32 %v8279_v52, %v11923_v53  ;;  %v6459_v12 = vsub.f32 2.0, %v6443_v19  ;;  %v6473_v60 = vmul.f32 %v8271_v50, %v6457_v20  ;;  %v6503_v54 = vmul.f32 %v11949_v57, %v6471_v3 }
 0x454   :  { %v8283_v44 = vpop.eup %8282  ;;  %v6446_v23 = vmul.f32 %v8281_v46, %v11925_v38  ;;  %v6460_v2 = vsub.f32 2.0, %v6444_v7  ;;  %v6474_v27 = vmul.f32 %v8273_v32, %v6458_v6  ;;  %v6504_v18 = vmul.f32 %v11953_v62, %v6472_v17 }
 0x455   :  { %v8285_v37 = vpop.eup %8284  ;;  %v6447_v51 = vmul.f32 %v8283_v44, %v11927_v41  ;;  %v6461_v33 = vsub.f32 2.0, %v6445_v36  ;;  %v6475_v43 = vmul.f32 %v8275_v59, %v6459_v12  ;;  %v6505_v28 = vmul.f32 %v11957_v31, %v6473_v60 }
 0x456   :  { %v8287_v49 = vpop.eup %8286  ;;  %v6448_v53 = vmul.f32 %v8285_v37, %v11929_v15  ;;  %v6462_v35 = vsub.f32 2.0, %v6446_v23  ;;  %v6476_v42 = vmul.f32 %v8277_v0, %v6460_v2  ;;  %v6506_v57 = vmul.f32 %v11961_v16, %v6474_v27 }
 0x457   :  { %v8289_v1 = vpop.eup %8288  ;;  %v6449_v38 = vmul.f32 %v8287_v49, %v11931_v48  ;;  %v6463_v10 = vsub.f32 2.0, %v6447_v51  ;;  %v6477_v26 = vmul.f32 %v8279_v52, %v6461_v33  ;;  %v6507_v62 = vmul.f32 %v11965_v21, %v6475_v43 }
 0x458   :  { %v6450_v41 = vmul.f32 %v8289_v1, %v11933_v8  ;;  %v6464_v25 = vsub.f32 2.0, %v6448_v53  ;;  %v6478_v50 = vmul.f32 %v8281_v46, %v6462_v35  ;;  %v6508_v31 = vmul.f32 %v11969_v55, %v6476_v42 }
 0x459   :  { %v6465_v30 = vsub.f32 2.0, %v6449_v38  ;;  %v6479_v22 = vmul.f32 %v8283_v44, %v6463_v10  ;;  %v6509_v15 = vmul.f32 %v11975_v24, %v6477_v26  ;;  %v6516_v9 = vsel %vm6515_vm15, %v6499_v5, 0.0 }
 0x45a   :  { %v6466_v16 = vsub.f32 2.0, %v6450_v41  ;;  %v6480_v32 = vmul.f32 %v8285_v37, %v6464_v25  ;;  %v6510_v48 = vmul.f32 %v11979_v4, %v6478_v50  ;;  %v6519_v11 = vadd.f32 %v6518_v45, %v6516_v9 }
 0x45b   :  { %v6481_v39 = vmul.f32 %v8287_v49, %v6465_v30  ;;  %v6511_v21 = vmul.f32 %v11984_v58, %v6479_v22  ;;  %v6520_v8 = vsel %vm6515_vm15, %v6501_v13, 0.0  ;;  %v6522_v24 = vsel %vm6517_vm14, %v6502_v56, 0.0 }
 0x45c   :  { %v6482_v63 = vmul.f32 %v8289_v1, %v6466_v16  ;;  %v6512_v59 = vmul.f32 %v11988_v34, %v6480_v32  ;;  %v6521_v55 = vadd.f32 %v6520_v8, %v6519_v11  ;;  %v6524_v29 = vsel %vm6515_vm15, %v6503_v54, 0.0 }
 0x45d   :  { %v6513_v40 = vmul.f32 %v11992_v61, %v6481_v39  ;;  %v6526_v45 = vsel %vm6517_vm14, %v6504_v18, 0.0  ;;  %v6528_v58 = vsel %vm6515_vm15, %v6505_v28, 0.0  ;;  %v6530_v20 = vsel %vm6517_vm14, %v6506_v57, 0.0 }
 0x45e   :  { %v6514_v14 = vmul.f32 %v11997_v47, %v6482_v63  ;;  %v6523_v5 = vadd.f32 %v6522_v24, %v6521_v55  ;;  %v6532_v34 = vsel %vm6515_vm15, %v6507_v62, 0.0  ;;  %v6534_v13 = vsel %vm6517_vm14, %v6508_v31, 0.0 }
 0x45f   :  { %v6536_v52 = vsel %vm6515_vm15, %v6509_v15, 0.0  ;;  %v6538_v6 = vsel %vm6517_vm14, %v6510_v48, 0.0  ;;  %v6540_v17 = vsel %vm6515_vm15, %v6511_v21, 0.0  ;;  %v6542_v36 = vsel %vm6517_vm14, %v6512_v59, 0.0 }
 0x460   :  { %v6525_v4 = vadd.f32 %v6524_v29, %v6523_v5  ;;  %v6544_v12 = vsel %vm6515_vm15, %v6513_v40, 0.0  ;;  %v6546_v44 = vsel %vm6517_vm14, %v6514_v14, 0.0 }
 0x462   :  { %v6527_v0 = vadd.f32 %v6526_v45, %v6525_v4 }
 0x464   :  { %v6529_v19 = vadd.f32 %v6528_v58, %v6527_v0 }
 0x466   :  { %v6531_v3 = vadd.f32 %v6530_v20, %v6529_v19 }
 0x468   :  { %v6533_v61 = vadd.f32 %v6532_v34, %v6531_v3 }
 0x46a   :  { %v6535_v7 = vadd.f32 %v6534_v13, %v6533_v61 }
 0x46c   :  { %v6537_v47 = vadd.f32 %v6536_v52, %v6535_v7 }
 0x46e   :  { %v6539_v56 = vadd.f32 %v6538_v6, %v6537_v47 }
 0x470   :  { %v6541_v46 = vadd.f32 %v6540_v17, %v6539_v56 }
 0x472   :  { %v6543_v60 = vadd.f32 %v6542_v36, %v6541_v46 }
 0x474   :  { %v6545_v54 = vadd.f32 %v6544_v12, %v6543_v60 }
 0x476   :  { %v6547_v23 = vadd.f32 %v6546_v44, %v6545_v54 }
 0x478   :  { %6548 = vadd.xlane.f32.xlu0 %v6547_v23 }
 0x505   :  { %v6549_v2 = vpop.xlane.xlu0 %6548 }
 0x506   :  { %v6550_v27 = vrot.slane %v6549_v2, 4 }
 0x508   :  { %v6551_v18 = vadd.f32 %v6550_v27, %v6549_v2 }
 0x50a   :  { %v6552_v37 = vrot.slane %v6551_v18, 2 }
 0x50c   :  { %v6553_v51 = vadd.f32 %v6552_v37, %v6551_v18 }
 0x50e   :  { %v6554_v33 = vrot.slane %v6553_v51, 1 }
 0x510   :  { %v6555_v43 = vadd.f32 %v6554_v33, %v6553_v51 }
 0x512   :  { %8245 = vpush %v6555_v43 }
 0x543   :  { %s8246_s19 = spop %8245 }
 0x544   :  { %v6557_v28 = vstv %s8246_s19 }
 0x545   :  { %6558 = vst [vmem:[#allocation9] sm:$0xff] %v6557_v28 }
 0x546   :  { %8345 = shalt.err (!%p8342_p6)
}
 0x547   :  { %s8346_s23 = scalar_lea.hbm %s12061_s4, 128 }
 0x548   :  { %p8347_p7 = scmp.ne.s32.totalorder %s12061_s4, %s8346_s23  ;;  %p8350_p8 = scmp.lt.u32.totalorder %s8346_s23, %s12061_s4 }
 0x54a   :  { %p8352_p9 = pnand %p8350_p8, %p8347_p7 }
 0x54c   :  { %8355 = shalt.err (!%p8352_p9)
}
 0x54d   :  { %6568 = dma.vmem_to_hbm [thread:$0]  %s6566_s18, 128, %s12061_s4, [#allocation6]  }
 0x54e   :  { %8360 = dma.done.wait [#allocation6], 128  }
 0x54f   :  { %8361 = vsyncadd [#allocation6], 4294967168 }
 0x550   :  { %6572 = vsyncpa [#allocation5], 1 }
 0x551   :  { %6573 = vsyncpa [#allocation8], 1 }
 0x552   :  { %6574 = vsyncpa [#allocation6], 1 }

</bundles_post_ra>
